<compile_context>
chip_gen: v7x
topology: tpu7x:2x2x1
jax: 0.10.0
libtpu: 0.0.40
codegen_flags: <defaults>
</compile_context>

<pallas_src>
import functools
import math

import jax
import jax.numpy as jnp
from jax import lax
from jax.experimental import pallas as pl
from jax.experimental.pallas import tpu as pltpu

# ----------------------------- model hyper-params (small) -----------------------------
BATCH       = 2
IMG_SIZE    = 16
PATCH       = 8            # -> 2x2 = 4 patches
IN_CH       = 3
WIDTH       = 32           # vision/text transformer width (== clip_dim)
HEADS       = 4
V_LAYERS    = 2
T_LAYERS    = 2
EMBED_DIM   = 16           # output projection dim
VOCAB       = 64
CONTEXT     = 8
NUM_TASKS   = 3
NUM_EMBEDS  = 2
CLIP_DIM    = WIDTH        # task embeddings must match transformer width
METHOD      = "first"

F32 = jnp.float32
BF16 = jnp.bfloat16
NEG_INF = -1e30
OUT_LANES = 128            # lane-dense output slab width


# ----------------------------------- small helpers -------------------------------------
def _fullspec(shape):
    nd = len(shape)
    return pl.BlockSpec(shape, lambda i, _nd=nd: (0,) * _nd)


def _div_c(x, d):
    if d & (d - 1) == 0:
        return x >> int(math.log2(d))
    return x // d


def _mod_c(x, d):
    if d & (d - 1) == 0:
        return x & (d - 1)
    return x % d


def _mm(a, b):
    # bf16 MXU matmul with f32 accumulation (weights are packed as bf16 in glue)
    return jnp.dot(a.astype(BF16), b.astype(BF16), preferred_element_type=F32)


def _gelu_exact(x):
    # exact (erf) GELU, matching torch.nn.GELU default
    return 0.5 * x * (1.0 + lax.erf(x * 0.7071067811865476))


def _layernorm(x, g, b, eps=1e-5):
    mu = jnp.mean(x, axis=-1, keepdims=True)
    d = x - mu
    var = jnp.mean(d * d, axis=-1, keepdims=True)
    return d * lax.rsqrt(var + eps) * g + b


def _softmax_rows(s):
    s = s - jnp.max(s, axis=-1, keepdims=True)
    p = jnp.exp(s)
    # EUP-routed reciprocal for the denominator (VALU stays free)
    return p * pl.reciprocal(jnp.sum(p, axis=-1, keepdims=True), approx=True)


def _l2_normalize_rows(x, eps=1e-12):
    n = jnp.sqrt(jnp.sum(x * x, axis=-1, keepdims=True))
    return x / jnp.maximum(n, eps)


def _block_diag_mask(rows, group, *, causal, valid_len):
    """Additive attention mask over a (rows, rows) score matrix, generated in-kernel."""
    r = lax.broadcasted_iota(jnp.int32, (rows, rows), 0)
    c = lax.broadcasted_iota(jnp.int32, (rows, rows), 1)
    ok = _div_c(r, group) == _div_c(c, group)                 # block-diag over batches
    if valid_len is not None:
        ok = ok & (_mod_c(c, group) < valid_len)              # key padding
    if causal:
        ok = ok & (_mod_c(c, group) <= _mod_c(r, group))      # causal
    return jnp.where(ok, 0.0, NEG_INF).astype(F32)


# ------------------------------- transformer block stack -------------------------------
def _transformer_layers(x, attn_mask, head_masks, blk_refs, layer_off, n_layers):
    w4_ref, wfc_ref, wpr_ref, vecd_ref, bfc_ref = blk_refs
    for li in range(n_layers):                                # statically unrolled
        l = layer_off + li
        v0 = 9 * l
        ln1_g = vecd_ref[v0 + 0:v0 + 1, :]; ln1_b = vecd_ref[v0 + 1:v0 + 2, :]
        b_q   = vecd_ref[v0 + 2:v0 + 3, :]; b_k   = vecd_ref[v0 + 3:v0 + 4, :]
        b_v   = vecd_ref[v0 + 4:v0 + 5, :]; b_o   = vecd_ref[v0 + 5:v0 + 6, :]
        ln2_g = vecd_ref[v0 + 6:v0 + 7, :]; ln2_b = vecd_ref[v0 + 7:v0 + 8, :]
        b_pr  = vecd_ref[v0 + 8:v0 + 9, :]

        # attention (pre-LN); 1/sqrt(dh) already folded into Wq / b_q at pack time
        h = _layernorm(x, ln1_g, ln1_b)
        q = _mm(h, w4_ref[4 * l + 0]) + b_q                   # (R, D) values in vregs
        k = _mm(h, w4_ref[4 * l + 1]) + b_k
        v = _mm(h, w4_ref[4 * l + 2]) + b_v
        acc = None
        for m in head_masks:                                  # full-lane masks, no dh slices
            s = lax.dot_general(q * m, k, (((1,), (1,)), ((), ())),
                                preferred_element_type=F32)   # q_h @ k_h^T  (R, R)
            p = _softmax_rows(s + attn_mask)
            o = jnp.dot(p, v * m, preferred_element_type=F32)  # head-h cols only
            acc = o if acc is None else acc + o
        x = x + _mm(acc, w4_ref[4 * l + 3]) + b_o             # single W_o merge

        # MLP
        h = _layernorm(x, ln2_g, ln2_b)
        h = _gelu_exact(_mm(h, wfc_ref[l]) + bfc_ref[l])
        x = x + _mm(h, wpr_ref[l]) + b_pr
    return x


# --------------------------------- fused two-tower kernel ------------------------------
def _clip_towers_kernel(patches_ref, convw_ref, xboth_ref, ln_ref,
                        w4_ref, wfc_ref, wpr_ref, vecd_ref, bfc_ref,
                        proj_ref, tsel_ref, o_ref,
                        *, width, heads, v_layers, t_layers,
                        batch, v_seq_pad, v_seq_real, t_seq, out_rows):
    dh = width // heads
    Rv = batch * v_seq_pad
    Rt = batch * t_seq
    blk_refs = (w4_ref, wfc_ref, wpr_ref, vecd_ref, bfc_ref)

    # per-head (1, width) lane masks, generated once, shared by both towers
    lane = lax.broadcasted_iota(jnp.int32, (1, width), 1)
    head_masks = [(_div_c(lane, dh) == h).astype(F32) for h in range(heads)]

    # ------------------------------ vision tower ------------------------------
    # patch embedding: patch rows are pre-placed (zero elsewhere), so the conv-as-matmul
    # drops embeddings straight into the token slab — no scatter matmul.
    x = xboth_ref[0:Rv, :] + _mm(patches_ref[...], convw_ref[...])
    # patch_dropout is identity in eval mode -> skipped
    x = _layernorm(x, ln_ref[0:1, :], ln_ref[1:2, :])                 # ln_pre
    mask_v = _block_diag_mask(Rv, v_seq_pad, causal=False, valid_len=v_seq_real)
    x = _transformer_layers(x, mask_v, head_masks, blk_refs, 0, v_layers)
    x = _layernorm(x, ln_ref[2:3, :], ln_ref[3:4, :])                 # ln_post

    # token-0 ('tok') pooling via in-kernel one-hot selector
    pr = lax.broadcasted_iota(jnp.int32, (batch, Rv), 0)
    pc = lax.broadcasted_iota(jnp.int32, (batch, Rv), 1)
    sel_v = (pc == pr * v_seq_pad).astype(F32)
    pooled = jnp.dot(sel_v, x, preferred_element_type=F32)
    img = _l2_normalize_rows(_mm(pooled, proj_ref[0]))                # (B, 128), cols>=EMBED are 0

    # ------------------------------ text tower --------------------------------
    x = xboth_ref[Rv:Rv + Rt, :]
    mask_t = _block_diag_mask(Rt, t_seq, causal=True, valid_len=None)
    x = _transformer_layers(x, mask_t, head_masks, blk_refs, v_layers, t_layers)
    x = _layernorm(x, ln_ref[4:5, :], ln_ref[5:6, :])                 # ln_final
    pooled = jnp.dot(tsel_ref[...], x, preferred_element_type=F32)    # EOT-token pooling
    txt = _l2_normalize_rows(_mm(pooled, proj_ref[1]))                # (B, 128)

    feats = jnp.concatenate([img, txt], axis=0)                        # (2B, 128) lane-dense
    pad_rows = out_rows - 2 * batch
    if pad_rows:
        feats = jnp.concatenate([feats, jnp.zeros((pad_rows, OUT_LANES), F32)], axis=0)
    o_ref[...] = feats.astype(o_ref.dtype)


# ----------------------------------- parameter packing ---------------------------------
def _pack_blocks(blocks, width, heads):
    """Coalesce per-layer block params into a few slabs (bf16 matmul weights)."""
    dh = width // heads
    scale = 1.0 / math.sqrt(dh)
    w4, wfc, wpr, vecd, bfc = [], [], [], [], []
    for blk in blocks:
        wq = blk["w_qkv"][:, :width] * scale                  # fold attention scale into q
        wk = blk["w_qkv"][:, width:2 * width]
        wv = blk["w_qkv"][:, 2 * width:]
        bq = blk["b_qkv"][:width] * scale
        bk = blk["b_qkv"][width:2 * width]
        bv = blk["b_qkv"][2 * width:]
        w4 += [wq, wk, wv, blk["w_o"]]
        wfc.append(blk["w_fc"])
        wpr.append(blk["w_proj"])
        vecd += [blk["ln1_g"], blk["ln1_b"], bq, bk, bv, blk["b_o"],
                 blk["ln2_g"], blk["ln2_b"], blk["b_proj"]]
        bfc.append(blk["b_fc"][None, :])
    return (jnp.stack(w4).astype(BF16),                       # (4L, D, D)   q,k,v,o
            jnp.stack(wfc).astype(BF16),                      # (L, D, 4D)
            jnp.stack(wpr).astype(BF16),                      # (L, 4D, D)
            jnp.stack(vecd).astype(F32),                      # (9L, D)      LN + biases
            jnp.stack(bfc).astype(F32))                       # (L, 1, 4D)


# -------------------------------------- wrapper -----------------------------------------
def clip_wrapper_forward(images, texts, tasks, params):
    # TODO(synk): the None-image / None-text branches of the original forward are not
    #             supported by the fused single-kernel path (both towers always run).
    vp, tp = params["visual"], params["text"]
    B, C, H, W = images.shape
    P = PATCH
    gh, gw = H // P, W // P
    n_patches = gh * gw
    D = WIDTH
    cpp = C * P * P
    out_rows = max(8, -(-2 * B // 8) * 8)

    # ---- vision glue: im2col + token slab with positions / cls / task embeds baked in ----
    patches = (images.reshape(B, C, gh, P, gw, P)
                     .transpose(0, 2, 4, 1, 3, 5)
                     .reshape(B, n_patches, cpp)).astype(F32)
    conv_w = vp["conv1_w"].reshape(D, cpp).T.astype(F32)

    task_embeds = jnp.stack([params["task_embeds"][e][tasks]
                             for e in range(NUM_EMBEDS)], axis=1).astype(F32)   # (B, NE, D)
    cls_tok = jnp.broadcast_to((vp["class_embedding"] + vp["pos_embedding"][0]
                                ).reshape(1, 1, D), (B, 1, D)).astype(F32)
    pos_patch = jnp.broadcast_to(vp["pos_embedding"][1:][None],
                                 (B, n_patches, D)).astype(F32)

    if METHOD == "first":
        pieces, patch_start = [task_embeds, cls_tok, pos_patch], 1 + NUM_EMBEDS
    elif METHOD == "second":
        pieces, patch_start = [cls_tok, task_embeds, pos_patch], 1 + NUM_EMBEDS
    elif METHOD == "third":
        pieces, patch_start = [cls_tok, pos_patch, task_embeds], 1
    else:
        raise ValueError(f"unknown method {METHOD!r}")

    seq_real = 1 + NUM_EMBEDS + n_patches                     # 7 real tokens
    seq_pad = -(-seq_real // 8) * 8                           # sublane-align -> 8
    if seq_pad > seq_real:
        pieces.append(jnp.zeros((B, seq_pad - seq_real, D), F32))
    x_init_v = jnp.concatenate(pieces, axis=1).reshape(B * seq_pad, D)

    # patch rows pre-placed in a zero-padded slab -> no scatter matmul in the kernel
    patches_slab = jnp.concatenate(
        [jnp.zeros((B, patch_start, cpp), F32), patches,
         jnp.zeros((B, seq_pad - patch_start - n_patches, cpp), F32)], axis=1
    ).reshape(B * seq_pad, cpp)

    # ---- text glue: token embedding gather + positional add, EOT one-hot selector --------
    S = texts.shape[1]
    x0_t = (tp["token_emb"][texts] + tp["pos_emb"][None]).reshape(B * S, D).astype(F32)
    eot = jnp.argmax(texts, axis=-1)                          # EOT token has the max id
    tsel = (jnp.arange(B * S)[None, :] ==
            (jnp.arange(B) * S + eot)[:, None]).astype(F32)   # (B, B*S)

    # ---- coalesced parameter slabs (one DMA each) -----------------------------------------
    x_both = jnp.concatenate([x_init_v, x0_t], axis=0)        # (Rv + Rt, D)
    ln6 = jnp.stack([vp["ln_pre_g"], vp["ln_pre_b"], vp["ln_post_g"], vp["ln_post_b"],
                     tp["ln_final_g"], tp["ln_final_b"]], axis=0).astype(F32)
    w4, wfc, wpr, vecd, bfc = _pack_blocks(list(vp["blocks"]) + list(tp["blocks"]), D, HEADS)

    def _pad_proj(w):
        return jnp.pad(w.astype(F32), ((0, 0), (0, OUT_LANES - w.shape[1])))
    proj_both = jnp.stack([_pad_proj(vp["proj"]), _pad_proj(tp["text_proj"])],
                          axis=0).astype(BF16)                # (2, D, 128)

    args = [patches_slab.astype(BF16), conv_w.astype(BF16), x_both, ln6,
            w4, wfc, wpr, vecd, bfc, proj_both, tsel]

    out = pl.pallas_call(
        functools.partial(_clip_towers_kernel, width=D, heads=HEADS,
                          v_layers=len(vp["blocks"]), t_layers=len(tp["blocks"]),
                          batch=B, v_seq_pad=seq_pad, v_seq_real=seq_real,
                          t_seq=S, out_rows=out_rows),
        out_shape=jax.ShapeDtypeStruct((out_rows, OUT_LANES), F32),
        grid=(1,),
        in_specs=[_fullspec(a.shape) for a in args],
        out_specs=_fullspec((out_rows, OUT_LANES)),
        compiler_params=pltpu.CompilerParams(dimension_semantics=("arbitrary",)),
    )(*args)

    image_features = out[0:B, :vp["proj"].shape[1]]
    text_features = out[B:2 * B, :tp["text_proj"].shape[1]]
    # output_dict=False, logit_bias=None in this synthetic config
    return image_features, text_features, jnp.exp(params["logit_scale"])


# ------------------------------------- param init -------------------------------------
def _normal(key, shape, scale=0.02):
    return scale * jax.random.normal(key, shape, dtype=F32)


def _init_block(key, width):
    ks = jax.random.split(key, 6)
    return {
        "ln1_g": jnp.ones((width,), F32), "ln1_b": jnp.zeros((width,), F32),
        "w_qkv": _normal(ks[0], (width, 3 * width)), "b_qkv": jnp.zeros((3 * width,), F32),
        "w_o":   _normal(ks[1], (width, width)),     "b_o":   jnp.zeros((width,), F32),
        "ln2_g": jnp.ones((width,), F32), "ln2_b": jnp.zeros((width,), F32),
        "w_fc":  _normal(ks[2], (width, 4 * width)), "b_fc":  jnp.zeros((4 * width,), F32),
        "w_proj": _normal(ks[3], (4 * width, width)), "b_proj": jnp.zeros((width,), F32),
    }


def init_params(key):
    n_patches = (IMG_SIZE // PATCH) ** 2
    keys = jax.random.split(key, 16)
    visual = {
        "conv1_w": _normal(keys[0], (WIDTH, IN_CH, PATCH, PATCH)),
        "class_embedding": _normal(keys[1], (WIDTH,)),
        "pos_embedding": _normal(keys[2], (1 + n_patches, WIDTH)),
        "ln_pre_g": jnp.ones((WIDTH,), F32), "ln_pre_b": jnp.zeros((WIDTH,), F32),
        "blocks": [_init_block(k, WIDTH) for k in jax.random.split(keys[3], V_LAYERS)],
        "ln_post_g": jnp.ones((WIDTH,), F32), "ln_post_b": jnp.zeros((WIDTH,), F32),
        "proj": _normal(keys[4], (WIDTH, EMBED_DIM)),
    }
    text = {
        "token_emb": _normal(keys[5], (VOCAB, WIDTH)),
        "pos_emb": _normal(keys[6], (CONTEXT, WIDTH)),
        "blocks": [_init_block(k, WIDTH) for k in jax.random.split(keys[7], T_LAYERS)],
        "ln_final_g": jnp.ones((WIDTH,), F32), "ln_final_b": jnp.zeros((WIDTH,), F32),
        "text_proj": _normal(keys[8], (WIDTH, EMBED_DIM)),
    }
    task_embeds = [_normal(k, (NUM_TASKS, CLIP_DIM)) for k in jax.random.split(keys[9], NUM_EMBEDS)]
    return {
        "visual": visual,
        "text": text,
        "task_embeds": task_embeds,
        "logit_scale": jnp.asarray(math.log(1.0 / 0.07), F32),
    }


# ----------------------------------------- main -----------------------------------------
if __name__ == "__main__":
    root = jax.random.PRNGKey(0)
    k_img, k_txt, k_params = jax.random.split(root, 3)

    images = jax.random.normal(k_img, (BATCH, IN_CH, IMG_SIZE, IMG_SIZE), dtype=F32)  # NCHW
    texts = jax.random.randint(k_txt, (BATCH, CONTEXT), 1, VOCAB - 1, dtype=jnp.int32)
    texts = texts.at[:, -1].set(VOCAB - 1)      # EOT token has the max id
    tasks = jnp.array([0, 2], dtype=jnp.int32)

    params = init_params(k_params)

    forward = jax.jit(clip_wrapper_forward)
    img_feats, txt_feats, logit_scale = forward(images, texts, tasks, params)
    jax.block_until_ready((img_feats, txt_feats, logit_scale))

    assert img_feats.shape == (BATCH, EMBED_DIM)
    assert txt_feats.shape == (BATCH, EMBED_DIM)
    # normalized features should have unit norm
    assert bool(jnp.allclose(jnp.linalg.norm(img_feats, axis=-1), 1.0, atol=1e-4))
    assert bool(jnp.allclose(jnp.linalg.norm(txt_feats, axis=-1), 1.0, atol=1e-4))

    print("KERNEL_OK")
</pallas_src>

<mosaic_0001>
module attributes {stable_mosaic.version = 11 : i64} {
  func.func @_clip_towers_kernel(%arg0: i32, %arg1: memref<16x192xbf16, #tpu.memory_space<vmem>>, %arg2: memref<192x32xbf16, #tpu.memory_space<vmem>>, %arg3: memref<32x32xf32, #tpu.memory_space<vmem>>, %arg4: memref<6x32xf32, #tpu.memory_space<vmem>>, %arg5: memref<16x32x32xbf16, #tpu.memory_space<vmem>>, %arg6: memref<4x32x128xbf16, #tpu.memory_space<vmem>>, %arg7: memref<4x128x32xbf16, #tpu.memory_space<vmem>>, %arg8: memref<36x32xf32, #tpu.memory_space<vmem>>, %arg9: memref<4x1x128xf32, #tpu.memory_space<vmem>>, %arg10: memref<2x32x128xbf16, #tpu.memory_space<vmem>>, %arg11: memref<2x16xf32, #tpu.memory_space<vmem>>, %arg12: memref<8x128xf32, #tpu.memory_space<vmem>>) attributes {dimension_semantics = [#tpu.dimension_semantics<arbitrary>], iteration_bounds = array<i64: 1>, scalar_prefetch = 0 : i64, scratch_operands = 0 : i64, tpu.core_type = #tpu.core_type<tc>, window_params = [{pipeline_mode = #tpu.pipeline_mode<synchronous>, transform_indices = @transform_0, window_bounds = array<i64: 16, 192>}, {pipeline_mode = #tpu.pipeline_mode<synchronous>, transform_indices = @transform_1, window_bounds = array<i64: 192, 32>}, {pipeline_mode = #tpu.pipeline_mode<synchronous>, transform_indices = @transform_2, window_bounds = array<i64: 32, 32>}, {pipeline_mode = #tpu.pipeline_mode<synchronous>, transform_indices = @transform_3, window_bounds = array<i64: 6, 32>}, {pipeline_mode = #tpu.pipeline_mode<synchronous>, transform_indices = @transform_4, window_bounds = array<i64: 16, 32, 32>}, {pipeline_mode = #tpu.pipeline_mode<synchronous>, transform_indices = @transform_5, window_bounds = array<i64: 4, 32, 128>}, {pipeline_mode = #tpu.pipeline_mode<synchronous>, transform_indices = @transform_6, window_bounds = array<i64: 4, 128, 32>}, {pipeline_mode = #tpu.pipeline_mode<synchronous>, transform_indices = @transform_7, window_bounds = array<i64: 36, 32>}, {pipeline_mode = #tpu.pipeline_mode<synchronous>, transform_indices = @transform_8, window_bounds = array<i64: 4, 1, 128>}, {pipeline_mode = #tpu.pipeline_mode<synchronous>, transform_indices = @transform_9, window_bounds = array<i64: 2, 32, 128>}, {pipeline_mode = #tpu.pipeline_mode<synchronous>, transform_indices = @transform_10, window_bounds = array<i64: 2, 16>}, {pipeline_mode = #tpu.pipeline_mode<synchronous>, transform_indices = @transform_11, window_bounds = array<i64: 8, 128>}]} {
    %0 = tpu.iota {dimensions = array<i32: 1>} : vector<1x32xi32>
    %c3_i32 = arith.constant 3 : i32
    %1 = vector.broadcast %c3_i32 : i32 to vector<1x32xi32>
    %2 = arith.shrsi %0, %1 : vector<1x32xi32>
    %c0_i32 = arith.constant 0 : i32
    %3 = vector.broadcast %c0_i32 : i32 to vector<1x32xi32>
    %4 = arith.cmpi eq, %2, %3 : vector<1x32xi32>
    %5 = arith.extui %4 : vector<1x32xi1> to vector<1x32xi32>
    %6 = arith.sitofp %5 : vector<1x32xi32> to vector<1x32xf32>
    %c3_i32_0 = arith.constant 3 : i32
    %7 = vector.broadcast %c3_i32_0 : i32 to vector<1x32xi32>
    %8 = arith.shrsi %0, %7 : vector<1x32xi32>
    %c1_i32 = arith.constant 1 : i32
    %9 = vector.broadcast %c1_i32 : i32 to vector<1x32xi32>
    %10 = arith.cmpi eq, %8, %9 : vector<1x32xi32>
    %11 = arith.extui %10 : vector<1x32xi1> to vector<1x32xi32>
    %12 = arith.sitofp %11 : vector<1x32xi32> to vector<1x32xf32>
    %c3_i32_1 = arith.constant 3 : i32
    %13 = vector.broadcast %c3_i32_1 : i32 to vector<1x32xi32>
    %14 = arith.shrsi %0, %13 : vector<1x32xi32>
    %c2_i32 = arith.constant 2 : i32
    %15 = vector.broadcast %c2_i32 : i32 to vector<1x32xi32>
    %16 = arith.cmpi eq, %14, %15 : vector<1x32xi32>
    %17 = arith.extui %16 : vector<1x32xi1> to vector<1x32xi32>
    %18 = arith.sitofp %17 : vector<1x32xi32> to vector<1x32xf32>
    %c3_i32_2 = arith.constant 3 : i32
    %19 = vector.broadcast %c3_i32_2 : i32 to vector<1x32xi32>
    %20 = arith.shrsi %0, %19 : vector<1x32xi32>
    %c3_i32_3 = arith.constant 3 : i32
    %21 = vector.broadcast %c3_i32_3 : i32 to vector<1x32xi32>
    %22 = arith.cmpi eq, %20, %21 : vector<1x32xi32>
    %23 = arith.extui %22 : vector<1x32xi1> to vector<1x32xi32>
    %24 = arith.sitofp %23 : vector<1x32xi32> to vector<1x32xf32>
    %c0 = arith.constant 0 : index
    %c0_4 = arith.constant 0 : index
    %25 = vector.load %arg3[%c0, %c0_4] : memref<32x32xf32, #tpu.memory_space<vmem>>, vector<16x32xf32>
    %c0_5 = arith.constant 0 : index
    %c0_6 = arith.constant 0 : index
    %26 = vector.load %arg1[%c0_5, %c0_6] : memref<16x192xbf16, #tpu.memory_space<vmem>>, vector<16x192xbf16>
    %c0_7 = arith.constant 0 : index
    %c0_8 = arith.constant 0 : index
    %27 = vector.load %arg2[%c0_7, %c0_8] : memref<192x32xbf16, #tpu.memory_space<vmem>>, vector<192x32xbf16>
    %cst = arith.constant dense<0.000000e+00> : vector<16x32xf32>
    %28 = tpu.matmul %26, %27, %cst {dimension_numbers = #tpu.dot_dimension_numbers<[1], [0], [0], [1], [0, 0, 1, 1], [], []>} : vector<16x192xbf16>, vector<192x32xbf16>, vector<16x32xf32> -> vector<16x32xf32>
    %29 = arith.addf %25, %28 : vector<16x32xf32>
    %c0_9 = arith.constant 0 : index
    %c0_10 = arith.constant 0 : index
    %30 = vector.load %arg4[%c0_9, %c0_10] : memref<6x32xf32, #tpu.memory_space<vmem>>, vector<1x32xf32>
    %c1 = arith.constant 1 : index
    %c0_11 = arith.constant 0 : index
    %31 = vector.load %arg4[%c1, %c0_11] : memref<6x32xf32, #tpu.memory_space<vmem>>, vector<1x32xf32>
    %cst_12 = arith.constant dense<0.000000e+00> : vector<16xf32>
    %32 = vector.multi_reduction <add>, %29, %cst_12 [1] : vector<16x32xf32> to vector<16xf32>
    %33 = vector.shape_cast %32 : vector<16xf32> to vector<16x1xf32>
    %cst_13 = arith.constant 3.200000e+01 : f32
    %34 = vector.broadcast %cst_13 : f32 to vector<16x1xf32>
    %35 = arith.divf %33, %34 : vector<16x1xf32>
    %36 = vector.broadcast %35 : vector<16x1xf32> to vector<16x32xf32>
    %37 = arith.subf %29, %36 : vector<16x32xf32>
    %38 = arith.mulf %37, %37 : vector<16x32xf32>
    %cst_14 = arith.constant dense<0.000000e+00> : vector<16xf32>
    %39 = vector.multi_reduction <add>, %38, %cst_14 [1] : vector<16x32xf32> to vector<16xf32>
    %40 = vector.shape_cast %39 : vector<16xf32> to vector<16x1xf32>
    %cst_15 = arith.constant 3.200000e+01 : f32
    %41 = vector.broadcast %cst_15 : f32 to vector<16x1xf32>
    %42 = arith.divf %40, %41 : vector<16x1xf32>
    %cst_16 = arith.constant 9.99999974E-6 : f32
    %43 = vector.broadcast %cst_16 : f32 to vector<16x1xf32>
    %44 = arith.addf %42, %43 : vector<16x1xf32>
    %45 = math.rsqrt %44 : vector<16x1xf32>
    %46 = vector.broadcast %45 : vector<16x1xf32> to vector<16x32xf32>
    %47 = arith.mulf %37, %46 : vector<16x32xf32>
    %48 = vector.broadcast %30 : vector<1x32xf32> to vector<16x32xf32>
    %49 = arith.mulf %47, %48 : vector<16x32xf32>
    %50 = vector.broadcast %31 : vector<1x32xf32> to vector<16x32xf32>
    %51 = arith.addf %49, %50 : vector<16x32xf32>
    %52 = tpu.iota {dimensions = array<i32: 0>} : vector<16x16xi32>
    %53 = tpu.iota {dimensions = array<i32: 1>} : vector<16x16xi32>
    %c3_i32_17 = arith.constant 3 : i32
    %54 = vector.broadcast %c3_i32_17 : i32 to vector<16x16xi32>
    %55 = arith.shrsi %52, %54 : vector<16x16xi32>
    %c3_i32_18 = arith.constant 3 : i32
    %56 = vector.broadcast %c3_i32_18 : i32 to vector<16x16xi32>
    %57 = arith.shrsi %53, %56 : vector<16x16xi32>
    %58 = arith.cmpi eq, %55, %57 : vector<16x16xi32>
    %c7_i32 = arith.constant 7 : i32
    %59 = vector.broadcast %c7_i32 : i32 to vector<16x16xi32>
    %60 = arith.andi %53, %59 : vector<16x16xi32>
    %c7_i32_19 = arith.constant 7 : i32
    %61 = vector.broadcast %c7_i32_19 : i32 to vector<16x16xi32>
    %62 = arith.cmpi slt, %60, %61 : vector<16x16xi32>
    %63 = arith.andi %58, %62 : vector<16x16xi1>
    %cst_20 = arith.constant 0.000000e+00 : f32
    %cst_21 = arith.constant -1.000000e+30 : f32
    %64 = vector.broadcast %cst_20 : f32 to vector<16x16xf32>
    %65 = vector.broadcast %cst_21 : f32 to vector<16x16xf32>
    %66 = arith.select %63, %64, %65 : vector<16x16xi1>, vector<16x16xf32>
    %c0_22 = arith.constant 0 : index
    %c0_23 = arith.constant 0 : index
    %67 = vector.load %arg8[%c0_22, %c0_23] : memref<36x32xf32, #tpu.memory_space<vmem>>, vector<1x32xf32>
    %c1_24 = arith.constant 1 : index
    %c0_25 = arith.constant 0 : index
    %68 = vector.load %arg8[%c1_24, %c0_25] : memref<36x32xf32, #tpu.memory_space<vmem>>, vector<1x32xf32>
    %c2 = arith.constant 2 : index
    %c0_26 = arith.constant 0 : index
    %69 = vector.load %arg8[%c2, %c0_26] : memref<36x32xf32, #tpu.memory_space<vmem>>, vector<1x32xf32>
    %c3 = arith.constant 3 : index
    %c0_27 = arith.constant 0 : index
    %70 = vector.load %arg8[%c3, %c0_27] : memref<36x32xf32, #tpu.memory_space<vmem>>, vector<1x32xf32>
    %c4 = arith.constant 4 : index
    %c0_28 = arith.constant 0 : index
    %71 = vector.load %arg8[%c4, %c0_28] : memref<36x32xf32, #tpu.memory_space<vmem>>, vector<1x32xf32>
    %c5 = arith.constant 5 : index
    %c0_29 = arith.constant 0 : index
    %72 = vector.load %arg8[%c5, %c0_29] : memref<36x32xf32, #tpu.memory_space<vmem>>, vector<1x32xf32>
    %c6 = arith.constant 6 : index
    %c0_30 = arith.constant 0 : index
    %73 = vector.load %arg8[%c6, %c0_30] : memref<36x32xf32, #tpu.memory_space<vmem>>, vector<1x32xf32>
    %c7 = arith.constant 7 : index
    %c0_31 = arith.constant 0 : index
    %74 = vector.load %arg8[%c7, %c0_31] : memref<36x32xf32, #tpu.memory_space<vmem>>, vector<1x32xf32>
    %c8 = arith.constant 8 : index
    %c0_32 = arith.constant 0 : index
    %75 = vector.load %arg8[%c8, %c0_32] : memref<36x32xf32, #tpu.memory_space<vmem>>, vector<1x32xf32>
    %cst_33 = arith.constant dense<0.000000e+00> : vector<16xf32>
    %76 = vector.multi_reduction <add>, %51, %cst_33 [1] : vector<16x32xf32> to vector<16xf32>
    %77 = vector.shape_cast %76 : vector<16xf32> to vector<16x1xf32>
    %cst_34 = arith.constant 3.200000e+01 : f32
    %78 = vector.broadcast %cst_34 : f32 to vector<16x1xf32>
    %79 = arith.divf %77, %78 : vector<16x1xf32>
    %80 = vector.broadcast %79 : vector<16x1xf32> to vector<16x32xf32>
    %81 = arith.subf %51, %80 : vector<16x32xf32>
    %82 = arith.mulf %81, %81 : vector<16x32xf32>
    %cst_35 = arith.constant dense<0.000000e+00> : vector<16xf32>
    %83 = vector.multi_reduction <add>, %82, %cst_35 [1] : vector<16x32xf32> to vector<16xf32>
    %84 = vector.shape_cast %83 : vector<16xf32> to vector<16x1xf32>
    %cst_36 = arith.constant 3.200000e+01 : f32
    %85 = vector.broadcast %cst_36 : f32 to vector<16x1xf32>
    %86 = arith.divf %84, %85 : vector<16x1xf32>
    %cst_37 = arith.constant 9.99999974E-6 : f32
    %87 = vector.broadcast %cst_37 : f32 to vector<16x1xf32>
    %88 = arith.addf %86, %87 : vector<16x1xf32>
    %89 = math.rsqrt %88 : vector<16x1xf32>
    %90 = vector.broadcast %89 : vector<16x1xf32> to vector<16x32xf32>
    %91 = arith.mulf %81, %90 : vector<16x32xf32>
    %92 = vector.broadcast %67 : vector<1x32xf32> to vector<16x32xf32>
    %93 = arith.mulf %91, %92 : vector<16x32xf32>
    %94 = vector.broadcast %68 : vector<1x32xf32> to vector<16x32xf32>
    %95 = arith.addf %93, %94 : vector<16x32xf32>
    %c0_38 = arith.constant 0 : index
    %c0_39 = arith.constant 0 : index
    %c0_40 = arith.constant 0 : index
    %96 = vector.load %arg5[%c0_38, %c0_39, %c0_40] : memref<16x32x32xbf16, #tpu.memory_space<vmem>>, vector<1x32x32xbf16>
    %97 = vector.shape_cast %96 : vector<1x32x32xbf16> to vector<32x32xbf16>
    %98 = arith.truncf %95 : vector<16x32xf32> to vector<16x32xbf16>
    %cst_41 = arith.constant dense<0.000000e+00> : vector<16x32xf32>
    %99 = tpu.matmul %98, %97, %cst_41 {dimension_numbers = #tpu.dot_dimension_numbers<[1], [0], [0], [1], [0, 0, 1, 1], [], []>} : vector<16x32xbf16>, vector<32x32xbf16>, vector<16x32xf32> -> vector<16x32xf32>
    %100 = vector.broadcast %69 : vector<1x32xf32> to vector<16x32xf32>
    %101 = arith.addf %99, %100 : vector<16x32xf32>
    %c1_42 = arith.constant 1 : index
    %c0_43 = arith.constant 0 : index
    %c0_44 = arith.constant 0 : index
    %102 = vector.load %arg5[%c1_42, %c0_43, %c0_44] : memref<16x32x32xbf16, #tpu.memory_space<vmem>>, vector<1x32x32xbf16>
    %103 = vector.shape_cast %102 : vector<1x32x32xbf16> to vector<32x32xbf16>
    %104 = arith.truncf %95 : vector<16x32xf32> to vector<16x32xbf16>
    %cst_45 = arith.constant dense<0.000000e+00> : vector<16x32xf32>
    %105 = tpu.matmul %104, %103, %cst_45 {dimension_numbers = #tpu.dot_dimension_numbers<[1], [0], [0], [1], [0, 0, 1, 1], [], []>} : vector<16x32xbf16>, vector<32x32xbf16>, vector<16x32xf32> -> vector<16x32xf32>
    %106 = vector.broadcast %70 : vector<1x32xf32> to vector<16x32xf32>
    %107 = arith.addf %105, %106 : vector<16x32xf32>
    %c2_46 = arith.constant 2 : index
    %c0_47 = arith.constant 0 : index
    %c0_48 = arith.constant 0 : index
    %108 = vector.load %arg5[%c2_46, %c0_47, %c0_48] : memref<16x32x32xbf16, #tpu.memory_space<vmem>>, vector<1x32x32xbf16>
    %109 = vector.shape_cast %108 : vector<1x32x32xbf16> to vector<32x32xbf16>
    %110 = arith.truncf %95 : vector<16x32xf32> to vector<16x32xbf16>
    %cst_49 = arith.constant dense<0.000000e+00> : vector<16x32xf32>
    %111 = tpu.matmul %110, %109, %cst_49 {dimension_numbers = #tpu.dot_dimension_numbers<[1], [0], [0], [1], [0, 0, 1, 1], [], []>} : vector<16x32xbf16>, vector<32x32xbf16>, vector<16x32xf32> -> vector<16x32xf32>
    %112 = vector.broadcast %71 : vector<1x32xf32> to vector<16x32xf32>
    %113 = arith.addf %111, %112 : vector<16x32xf32>
    %114 = vector.broadcast %6 : vector<1x32xf32> to vector<16x32xf32>
    %115 = arith.mulf %101, %114 : vector<16x32xf32>
    %cst_50 = arith.constant dense<0.000000e+00> : vector<16x16xf32>
    %116 = tpu.matmul %115, %107, %cst_50 {dimension_numbers = #tpu.dot_dimension_numbers<[1], [1], [0], [0], [0, 0, 1, 0], [], []>} : vector<16x32xf32>, vector<16x32xf32>, vector<16x16xf32> -> vector<16x16xf32>
    %117 = arith.addf %116, %66 : vector<16x16xf32>
    %cst_51 = arith.constant dense<0xFF800000> : vector<16xf32>
    %118 = vector.multi_reduction <maximumf>, %117, %cst_51 [1] : vector<16x16xf32> to vector<16xf32>
    %119 = vector.shape_cast %118 : vector<16xf32> to vector<16x1xf32>
    %120 = vector.broadcast %119 : vector<16x1xf32> to vector<16x16xf32>
    %121 = arith.subf %117, %120 : vector<16x16xf32>
    %122 = math.exp %121 : vector<16x16xf32>
    %cst_52 = arith.constant dense<0.000000e+00> : vector<16xf32>
    %123 = vector.multi_reduction <add>, %122, %cst_52 [1] : vector<16x16xf32> to vector<16xf32>
    %124 = vector.shape_cast %123 : vector<16xf32> to vector<16x1xf32>
    %125 = tpu.reciprocal %124 {approx = true} : vector<16x1xf32> -> vector<16x1xf32>
    %126 = vector.broadcast %125 : vector<16x1xf32> to vector<16x16xf32>
    %127 = arith.mulf %122, %126 : vector<16x16xf32>
    %128 = vector.broadcast %6 : vector<1x32xf32> to vector<16x32xf32>
    %129 = arith.mulf %113, %128 : vector<16x32xf32>
    %cst_53 = arith.constant dense<0.000000e+00> : vector<16x32xf32>
    %130 = tpu.matmul %127, %129, %cst_53 {dimension_numbers = #tpu.dot_dimension_numbers<[1], [0], [0], [1], [0, 0, 1, 1], [], []>} : vector<16x16xf32>, vector<16x32xf32>, vector<16x32xf32> -> vector<16x32xf32>
    %131 = vector.broadcast %12 : vector<1x32xf32> to vector<16x32xf32>
    %132 = arith.mulf %101, %131 : vector<16x32xf32>
    %cst_54 = arith.constant dense<0.000000e+00> : vector<16x16xf32>
    %133 = tpu.matmul %132, %107, %cst_54 {dimension_numbers = #tpu.dot_dimension_numbers<[1], [1], [0], [0], [0, 0, 1, 0], [], []>} : vector<16x32xf32>, vector<16x32xf32>, vector<16x16xf32> -> vector<16x16xf32>
    %134 = arith.addf %133, %66 : vector<16x16xf32>
    %cst_55 = arith.constant dense<0xFF800000> : vector<16xf32>
    %135 = vector.multi_reduction <maximumf>, %134, %cst_55 [1] : vector<16x16xf32> to vector<16xf32>
    %136 = vector.shape_cast %135 : vector<16xf32> to vector<16x1xf32>
    %137 = vector.broadcast %136 : vector<16x1xf32> to vector<16x16xf32>
    %138 = arith.subf %134, %137 : vector<16x16xf32>
    %139 = math.exp %138 : vector<16x16xf32>
    %cst_56 = arith.constant dense<0.000000e+00> : vector<16xf32>
    %140 = vector.multi_reduction <add>, %139, %cst_56 [1] : vector<16x16xf32> to vector<16xf32>
    %141 = vector.shape_cast %140 : vector<16xf32> to vector<16x1xf32>
    %142 = tpu.reciprocal %141 {approx = true} : vector<16x1xf32> -> vector<16x1xf32>
    %143 = vector.broadcast %142 : vector<16x1xf32> to vector<16x16xf32>
    %144 = arith.mulf %139, %143 : vector<16x16xf32>
    %145 = vector.broadcast %12 : vector<1x32xf32> to vector<16x32xf32>
    %146 = arith.mulf %113, %145 : vector<16x32xf32>
    %cst_57 = arith.constant dense<0.000000e+00> : vector<16x32xf32>
    %147 = tpu.matmul %144, %146, %cst_57 {dimension_numbers = #tpu.dot_dimension_numbers<[1], [0], [0], [1], [0, 0, 1, 1], [], []>} : vector<16x16xf32>, vector<16x32xf32>, vector<16x32xf32> -> vector<16x32xf32>
    %148 = arith.addf %130, %147 : vector<16x32xf32>
    %149 = vector.broadcast %18 : vector<1x32xf32> to vector<16x32xf32>
    %150 = arith.mulf %101, %149 : vector<16x32xf32>
    %cst_58 = arith.constant dense<0.000000e+00> : vector<16x16xf32>
    %151 = tpu.matmul %150, %107, %cst_58 {dimension_numbers = #tpu.dot_dimension_numbers<[1], [1], [0], [0], [0, 0, 1, 0], [], []>} : vector<16x32xf32>, vector<16x32xf32>, vector<16x16xf32> -> vector<16x16xf32>
    %152 = arith.addf %151, %66 : vector<16x16xf32>
    %cst_59 = arith.constant dense<0xFF800000> : vector<16xf32>
    %153 = vector.multi_reduction <maximumf>, %152, %cst_59 [1] : vector<16x16xf32> to vector<16xf32>
    %154 = vector.shape_cast %153 : vector<16xf32> to vector<16x1xf32>
    %155 = vector.broadcast %154 : vector<16x1xf32> to vector<16x16xf32>
    %156 = arith.subf %152, %155 : vector<16x16xf32>
    %157 = math.exp %156 : vector<16x16xf32>
    %cst_60 = arith.constant dense<0.000000e+00> : vector<16xf32>
    %158 = vector.multi_reduction <add>, %157, %cst_60 [1] : vector<16x16xf32> to vector<16xf32>
    %159 = vector.shape_cast %158 : vector<16xf32> to vector<16x1xf32>
    %160 = tpu.reciprocal %159 {approx = true} : vector<16x1xf32> -> vector<16x1xf32>
    %161 = vector.broadcast %160 : vector<16x1xf32> to vector<16x16xf32>
    %162 = arith.mulf %157, %161 : vector<16x16xf32>
    %163 = vector.broadcast %18 : vector<1x32xf32> to vector<16x32xf32>
    %164 = arith.mulf %113, %163 : vector<16x32xf32>
    %cst_61 = arith.constant dense<0.000000e+00> : vector<16x32xf32>
    %165 = tpu.matmul %162, %164, %cst_61 {dimension_numbers = #tpu.dot_dimension_numbers<[1], [0], [0], [1], [0, 0, 1, 1], [], []>} : vector<16x16xf32>, vector<16x32xf32>, vector<16x32xf32> -> vector<16x32xf32>
    %166 = arith.addf %148, %165 : vector<16x32xf32>
    %167 = vector.broadcast %24 : vector<1x32xf32> to vector<16x32xf32>
    %168 = arith.mulf %101, %167 : vector<16x32xf32>
    %cst_62 = arith.constant dense<0.000000e+00> : vector<16x16xf32>
    %169 = tpu.matmul %168, %107, %cst_62 {dimension_numbers = #tpu.dot_dimension_numbers<[1], [1], [0], [0], [0, 0, 1, 0], [], []>} : vector<16x32xf32>, vector<16x32xf32>, vector<16x16xf32> -> vector<16x16xf32>
    %170 = arith.addf %169, %66 : vector<16x16xf32>
    %cst_63 = arith.constant dense<0xFF800000> : vector<16xf32>
    %171 = vector.multi_reduction <maximumf>, %170, %cst_63 [1] : vector<16x16xf32> to vector<16xf32>
    %172 = vector.shape_cast %171 : vector<16xf32> to vector<16x1xf32>
    %173 = vector.broadcast %172 : vector<16x1xf32> to vector<16x16xf32>
    %174 = arith.subf %170, %173 : vector<16x16xf32>
    %175 = math.exp %174 : vector<16x16xf32>
    %cst_64 = arith.constant dense<0.000000e+00> : vector<16xf32>
    %176 = vector.multi_reduction <add>, %175, %cst_64 [1] : vector<16x16xf32> to vector<16xf32>
    %177 = vector.shape_cast %176 : vector<16xf32> to vector<16x1xf32>
    %178 = tpu.reciprocal %177 {approx = true} : vector<16x1xf32> -> vector<16x1xf32>
    %179 = vector.broadcast %178 : vector<16x1xf32> to vector<16x16xf32>
    %180 = arith.mulf %175, %179 : vector<16x16xf32>
    %181 = vector.broadcast %24 : vector<1x32xf32> to vector<16x32xf32>
    %182 = arith.mulf %113, %181 : vector<16x32xf32>
    %cst_65 = arith.constant dense<0.000000e+00> : vector<16x32xf32>
    %183 = tpu.matmul %180, %182, %cst_65 {dimension_numbers = #tpu.dot_dimension_numbers<[1], [0], [0], [1], [0, 0, 1, 1], [], []>} : vector<16x16xf32>, vector<16x32xf32>, vector<16x32xf32> -> vector<16x32xf32>
    %184 = arith.addf %166, %183 : vector<16x32xf32>
    %c3_66 = arith.constant 3 : index
    %c0_67 = arith.constant 0 : index
    %c0_68 = arith.constant 0 : index
    %185 = vector.load %arg5[%c3_66, %c0_67, %c0_68] : memref<16x32x32xbf16, #tpu.memory_space<vmem>>, vector<1x32x32xbf16>
    %186 = vector.shape_cast %185 : vector<1x32x32xbf16> to vector<32x32xbf16>
    %187 = arith.truncf %184 : vector<16x32xf32> to vector<16x32xbf16>
    %cst_69 = arith.constant dense<0.000000e+00> : vector<16x32xf32>
    %188 = tpu.matmul %187, %186, %cst_69 {dimension_numbers = #tpu.dot_dimension_numbers<[1], [0], [0], [1], [0, 0, 1, 1], [], []>} : vector<16x32xbf16>, vector<32x32xbf16>, vector<16x32xf32> -> vector<16x32xf32>
    %189 = arith.addf %51, %188 : vector<16x32xf32>
    %190 = vector.broadcast %72 : vector<1x32xf32> to vector<16x32xf32>
    %191 = arith.addf %189, %190 : vector<16x32xf32>
    %cst_70 = arith.constant dense<0.000000e+00> : vector<16xf32>
    %192 = vector.multi_reduction <add>, %191, %cst_70 [1] : vector<16x32xf32> to vector<16xf32>
    %193 = vector.shape_cast %192 : vector<16xf32> to vector<16x1xf32>
    %cst_71 = arith.constant 3.200000e+01 : f32
    %194 = vector.broadcast %cst_71 : f32 to vector<16x1xf32>
    %195 = arith.divf %193, %194 : vector<16x1xf32>
    %196 = vector.broadcast %195 : vector<16x1xf32> to vector<16x32xf32>
    %197 = arith.subf %191, %196 : vector<16x32xf32>
    %198 = arith.mulf %197, %197 : vector<16x32xf32>
    %cst_72 = arith.constant dense<0.000000e+00> : vector<16xf32>
    %199 = vector.multi_reduction <add>, %198, %cst_72 [1] : vector<16x32xf32> to vector<16xf32>
    %200 = vector.shape_cast %199 : vector<16xf32> to vector<16x1xf32>
    %cst_73 = arith.constant 3.200000e+01 : f32
    %201 = vector.broadcast %cst_73 : f32 to vector<16x1xf32>
    %202 = arith.divf %200, %201 : vector<16x1xf32>
    %cst_74 = arith.constant 9.99999974E-6 : f32
    %203 = vector.broadcast %cst_74 : f32 to vector<16x1xf32>
    %204 = arith.addf %202, %203 : vector<16x1xf32>
    %205 = math.rsqrt %204 : vector<16x1xf32>
    %206 = vector.broadcast %205 : vector<16x1xf32> to vector<16x32xf32>
    %207 = arith.mulf %197, %206 : vector<16x32xf32>
    %208 = vector.broadcast %73 : vector<1x32xf32> to vector<16x32xf32>
    %209 = arith.mulf %207, %208 : vector<16x32xf32>
    %210 = vector.broadcast %74 : vector<1x32xf32> to vector<16x32xf32>
    %211 = arith.addf %209, %210 : vector<16x32xf32>
    %c0_75 = arith.constant 0 : index
    %c0_76 = arith.constant 0 : index
    %c0_77 = arith.constant 0 : index
    %212 = vector.load %arg6[%c0_75, %c0_76, %c0_77] : memref<4x32x128xbf16, #tpu.memory_space<vmem>>, vector<1x32x128xbf16>
    %213 = vector.shape_cast %212 : vector<1x32x128xbf16> to vector<32x128xbf16>
    %214 = arith.truncf %211 : vector<16x32xf32> to vector<16x32xbf16>
    %cst_78 = arith.constant dense<0.000000e+00> : vector<16x128xf32>
    %215 = tpu.matmul %214, %213, %cst_78 {dimension_numbers = #tpu.dot_dimension_numbers<[1], [0], [0], [1], [0, 0, 1, 1], [], []>} : vector<16x32xbf16>, vector<32x128xbf16>, vector<16x128xf32> -> vector<16x128xf32>
    %c0_79 = arith.constant 0 : index
    %c0_80 = arith.constant 0 : index
    %c0_81 = arith.constant 0 : index
    %216 = vector.load %arg9[%c0_79, %c0_80, %c0_81] : memref<4x1x128xf32, #tpu.memory_space<vmem>>, vector<1x1x128xf32>
    %217 = vector.shape_cast %216 : vector<1x1x128xf32> to vector<1x128xf32>
    %218 = vector.broadcast %217 : vector<1x128xf32> to vector<16x128xf32>
    %219 = arith.addf %215, %218 : vector<16x128xf32>
    %cst_82 = arith.constant 5.000000e-01 : f32
    %220 = vector.broadcast %cst_82 : f32 to vector<16x128xf32>
    %221 = arith.mulf %220, %219 : vector<16x128xf32>
    %cst_83 = arith.constant 0.707106769 : f32
    %222 = vector.broadcast %cst_83 : f32 to vector<16x128xf32>
    %223 = arith.mulf %219, %222 : vector<16x128xf32>
    %224 = math.erf %223 : vector<16x128xf32>
    %cst_84 = arith.constant 1.000000e+00 : f32
    %225 = vector.broadcast %cst_84 : f32 to vector<16x128xf32>
    %226 = arith.addf %225, %224 : vector<16x128xf32>
    %227 = arith.mulf %221, %226 : vector<16x128xf32>
    %c0_85 = arith.constant 0 : index
    %c0_86 = arith.constant 0 : index
    %c0_87 = arith.constant 0 : index
    %228 = vector.load %arg7[%c0_85, %c0_86, %c0_87] : memref<4x128x32xbf16, #tpu.memory_space<vmem>>, vector<1x128x32xbf16>
    %229 = vector.shape_cast %228 : vector<1x128x32xbf16> to vector<128x32xbf16>
    %230 = arith.truncf %227 : vector<16x128xf32> to vector<16x128xbf16>
    %cst_88 = arith.constant dense<0.000000e+00> : vector<16x32xf32>
    %231 = tpu.matmul %230, %229, %cst_88 {dimension_numbers = #tpu.dot_dimension_numbers<[1], [0], [0], [1], [0, 0, 1, 1], [], []>} : vector<16x128xbf16>, vector<128x32xbf16>, vector<16x32xf32> -> vector<16x32xf32>
    %232 = arith.addf %191, %231 : vector<16x32xf32>
    %233 = vector.broadcast %75 : vector<1x32xf32> to vector<16x32xf32>
    %234 = arith.addf %232, %233 : vector<16x32xf32>
    %c9 = arith.constant 9 : index
    %c0_89 = arith.constant 0 : index
    %235 = vector.load %arg8[%c9, %c0_89] : memref<36x32xf32, #tpu.memory_space<vmem>>, vector<1x32xf32>
    %c10 = arith.constant 10 : index
    %c0_90 = arith.constant 0 : index
    %236 = vector.load %arg8[%c10, %c0_90] : memref<36x32xf32, #tpu.memory_space<vmem>>, vector<1x32xf32>
    %c11 = arith.constant 11 : index
    %c0_91 = arith.constant 0 : index
    %237 = vector.load %arg8[%c11, %c0_91] : memref<36x32xf32, #tpu.memory_space<vmem>>, vector<1x32xf32>
    %c12 = arith.constant 12 : index
    %c0_92 = arith.constant 0 : index
    %238 = vector.load %arg8[%c12, %c0_92] : memref<36x32xf32, #tpu.memory_space<vmem>>, vector<1x32xf32>
    %c13 = arith.constant 13 : index
    %c0_93 = arith.constant 0 : index
    %239 = vector.load %arg8[%c13, %c0_93] : memref<36x32xf32, #tpu.memory_space<vmem>>, vector<1x32xf32>
    %c14 = arith.constant 14 : index
    %c0_94 = arith.constant 0 : index
    %240 = vector.load %arg8[%c14, %c0_94] : memref<36x32xf32, #tpu.memory_space<vmem>>, vector<1x32xf32>
    %c15 = arith.constant 15 : index
    %c0_95 = arith.constant 0 : index
    %241 = vector.load %arg8[%c15, %c0_95] : memref<36x32xf32, #tpu.memory_space<vmem>>, vector<1x32xf32>
    %c16 = arith.constant 16 : index
    %c0_96 = arith.constant 0 : index
    %242 = vector.load %arg8[%c16, %c0_96] : memref<36x32xf32, #tpu.memory_space<vmem>>, vector<1x32xf32>
    %c17 = arith.constant 17 : index
    %c0_97 = arith.constant 0 : index
    %243 = vector.load %arg8[%c17, %c0_97] : memref<36x32xf32, #tpu.memory_space<vmem>>, vector<1x32xf32>
    %cst_98 = arith.constant dense<0.000000e+00> : vector<16xf32>
    %244 = vector.multi_reduction <add>, %234, %cst_98 [1] : vector<16x32xf32> to vector<16xf32>
    %245 = vector.shape_cast %244 : vector<16xf32> to vector<16x1xf32>
    %cst_99 = arith.constant 3.200000e+01 : f32
    %246 = vector.broadcast %cst_99 : f32 to vector<16x1xf32>
    %247 = arith.divf %245, %246 : vector<16x1xf32>
    %248 = vector.broadcast %247 : vector<16x1xf32> to vector<16x32xf32>
    %249 = arith.subf %234, %248 : vector<16x32xf32>
    %250 = arith.mulf %249, %249 : vector<16x32xf32>
    %cst_100 = arith.constant dense<0.000000e+00> : vector<16xf32>
    %251 = vector.multi_reduction <add>, %250, %cst_100 [1] : vector<16x32xf32> to vector<16xf32>
    %252 = vector.shape_cast %251 : vector<16xf32> to vector<16x1xf32>
    %cst_101 = arith.constant 3.200000e+01 : f32
    %253 = vector.broadcast %cst_101 : f32 to vector<16x1xf32>
    %254 = arith.divf %252, %253 : vector<16x1xf32>
    %cst_102 = arith.constant 9.99999974E-6 : f32
    %255 = vector.broadcast %cst_102 : f32 to vector<16x1xf32>
    %256 = arith.addf %254, %255 : vector<16x1xf32>
    %257 = math.rsqrt %256 : vector<16x1xf32>
    %258 = vector.broadcast %257 : vector<16x1xf32> to vector<16x32xf32>
    %259 = arith.mulf %249, %258 : vector<16x32xf32>
    %260 = vector.broadcast %235 : vector<1x32xf32> to vector<16x32xf32>
    %261 = arith.mulf %259, %260 : vector<16x32xf32>
    %262 = vector.broadcast %236 : vector<1x32xf32> to vector<16x32xf32>
    %263 = arith.addf %261, %262 : vector<16x32xf32>
    %c4_103 = arith.constant 4 : index
    %c0_104 = arith.constant 0 : index
    %c0_105 = arith.constant 0 : index
    %264 = vector.load %arg5[%c4_103, %c0_104, %c0_105] : memref<16x32x32xbf16, #tpu.memory_space<vmem>>, vector<1x32x32xbf16>
    %265 = vector.shape_cast %264 : vector<1x32x32xbf16> to vector<32x32xbf16>
    %266 = arith.truncf %263 : vector<16x32xf32> to vector<16x32xbf16>
    %cst_106 = arith.constant dense<0.000000e+00> : vector<16x32xf32>
    %267 = tpu.matmul %266, %265, %cst_106 {dimension_numbers = #tpu.dot_dimension_numbers<[1], [0], [0], [1], [0, 0, 1, 1], [], []>} : vector<16x32xbf16>, vector<32x32xbf16>, vector<16x32xf32> -> vector<16x32xf32>
    %268 = vector.broadcast %237 : vector<1x32xf32> to vector<16x32xf32>
    %269 = arith.addf %267, %268 : vector<16x32xf32>
    %c5_107 = arith.constant 5 : index
    %c0_108 = arith.constant 0 : index
    %c0_109 = arith.constant 0 : index
    %270 = vector.load %arg5[%c5_107, %c0_108, %c0_109] : memref<16x32x32xbf16, #tpu.memory_space<vmem>>, vector<1x32x32xbf16>
    %271 = vector.shape_cast %270 : vector<1x32x32xbf16> to vector<32x32xbf16>
    %272 = arith.truncf %263 : vector<16x32xf32> to vector<16x32xbf16>
    %cst_110 = arith.constant dense<0.000000e+00> : vector<16x32xf32>
    %273 = tpu.matmul %272, %271, %cst_110 {dimension_numbers = #tpu.dot_dimension_numbers<[1], [0], [0], [1], [0, 0, 1, 1], [], []>} : vector<16x32xbf16>, vector<32x32xbf16>, vector<16x32xf32> -> vector<16x32xf32>
    %274 = vector.broadcast %238 : vector<1x32xf32> to vector<16x32xf32>
    %275 = arith.addf %273, %274 : vector<16x32xf32>
    %c6_111 = arith.constant 6 : index
    %c0_112 = arith.constant 0 : index
    %c0_113 = arith.constant 0 : index
    %276 = vector.load %arg5[%c6_111, %c0_112, %c0_113] : memref<16x32x32xbf16, #tpu.memory_space<vmem>>, vector<1x32x32xbf16>
    %277 = vector.shape_cast %276 : vector<1x32x32xbf16> to vector<32x32xbf16>
    %278 = arith.truncf %263 : vector<16x32xf32> to vector<16x32xbf16>
    %cst_114 = arith.constant dense<0.000000e+00> : vector<16x32xf32>
    %279 = tpu.matmul %278, %277, %cst_114 {dimension_numbers = #tpu.dot_dimension_numbers<[1], [0], [0], [1], [0, 0, 1, 1], [], []>} : vector<16x32xbf16>, vector<32x32xbf16>, vector<16x32xf32> -> vector<16x32xf32>
    %280 = vector.broadcast %239 : vector<1x32xf32> to vector<16x32xf32>
    %281 = arith.addf %279, %280 : vector<16x32xf32>
    %282 = vector.broadcast %6 : vector<1x32xf32> to vector<16x32xf32>
    %283 = arith.mulf %269, %282 : vector<16x32xf32>
    %cst_115 = arith.constant dense<0.000000e+00> : vector<16x16xf32>
    %284 = tpu.matmul %283, %275, %cst_115 {dimension_numbers = #tpu.dot_dimension_numbers<[1], [1], [0], [0], [0, 0, 1, 0], [], []>} : vector<16x32xf32>, vector<16x32xf32>, vector<16x16xf32> -> vector<16x16xf32>
    %285 = arith.addf %284, %66 : vector<16x16xf32>
    %cst_116 = arith.constant dense<0xFF800000> : vector<16xf32>
    %286 = vector.multi_reduction <maximumf>, %285, %cst_116 [1] : vector<16x16xf32> to vector<16xf32>
    %287 = vector.shape_cast %286 : vector<16xf32> to vector<16x1xf32>
    %288 = vector.broadcast %287 : vector<16x1xf32> to vector<16x16xf32>
    %289 = arith.subf %285, %288 : vector<16x16xf32>
    %290 = math.exp %289 : vector<16x16xf32>
    %cst_117 = arith.constant dense<0.000000e+00> : vector<16xf32>
    %291 = vector.multi_reduction <add>, %290, %cst_117 [1] : vector<16x16xf32> to vector<16xf32>
    %292 = vector.shape_cast %291 : vector<16xf32> to vector<16x1xf32>
    %293 = tpu.reciprocal %292 {approx = true} : vector<16x1xf32> -> vector<16x1xf32>
    %294 = vector.broadcast %293 : vector<16x1xf32> to vector<16x16xf32>
    %295 = arith.mulf %290, %294 : vector<16x16xf32>
    %296 = vector.broadcast %6 : vector<1x32xf32> to vector<16x32xf32>
    %297 = arith.mulf %281, %296 : vector<16x32xf32>
    %cst_118 = arith.constant dense<0.000000e+00> : vector<16x32xf32>
    %298 = tpu.matmul %295, %297, %cst_118 {dimension_numbers = #tpu.dot_dimension_numbers<[1], [0], [0], [1], [0, 0, 1, 1], [], []>} : vector<16x16xf32>, vector<16x32xf32>, vector<16x32xf32> -> vector<16x32xf32>
    %299 = vector.broadcast %12 : vector<1x32xf32> to vector<16x32xf32>
    %300 = arith.mulf %269, %299 : vector<16x32xf32>
    %cst_119 = arith.constant dense<0.000000e+00> : vector<16x16xf32>
    %301 = tpu.matmul %300, %275, %cst_119 {dimension_numbers = #tpu.dot_dimension_numbers<[1], [1], [0], [0], [0, 0, 1, 0], [], []>} : vector<16x32xf32>, vector<16x32xf32>, vector<16x16xf32> -> vector<16x16xf32>
    %302 = arith.addf %301, %66 : vector<16x16xf32>
    %cst_120 = arith.constant dense<0xFF800000> : vector<16xf32>
    %303 = vector.multi_reduction <maximumf>, %302, %cst_120 [1] : vector<16x16xf32> to vector<16xf32>
    %304 = vector.shape_cast %303 : vector<16xf32> to vector<16x1xf32>
    %305 = vector.broadcast %304 : vector<16x1xf32> to vector<16x16xf32>
    %306 = arith.subf %302, %305 : vector<16x16xf32>
    %307 = math.exp %306 : vector<16x16xf32>
    %cst_121 = arith.constant dense<0.000000e+00> : vector<16xf32>
    %308 = vector.multi_reduction <add>, %307, %cst_121 [1] : vector<16x16xf32> to vector<16xf32>
    %309 = vector.shape_cast %308 : vector<16xf32> to vector<16x1xf32>
    %310 = tpu.reciprocal %309 {approx = true} : vector<16x1xf32> -> vector<16x1xf32>
    %311 = vector.broadcast %310 : vector<16x1xf32> to vector<16x16xf32>
    %312 = arith.mulf %307, %311 : vector<16x16xf32>
    %313 = vector.broadcast %12 : vector<1x32xf32> to vector<16x32xf32>
    %314 = arith.mulf %281, %313 : vector<16x32xf32>
    %cst_122 = arith.constant dense<0.000000e+00> : vector<16x32xf32>
    %315 = tpu.matmul %312, %314, %cst_122 {dimension_numbers = #tpu.dot_dimension_numbers<[1], [0], [0], [1], [0, 0, 1, 1], [], []>} : vector<16x16xf32>, vector<16x32xf32>, vector<16x32xf32> -> vector<16x32xf32>
    %316 = arith.addf %298, %315 : vector<16x32xf32>
    %317 = vector.broadcast %18 : vector<1x32xf32> to vector<16x32xf32>
    %318 = arith.mulf %269, %317 : vector<16x32xf32>
    %cst_123 = arith.constant dense<0.000000e+00> : vector<16x16xf32>
    %319 = tpu.matmul %318, %275, %cst_123 {dimension_numbers = #tpu.dot_dimension_numbers<[1], [1], [0], [0], [0, 0, 1, 0], [], []>} : vector<16x32xf32>, vector<16x32xf32>, vector<16x16xf32> -> vector<16x16xf32>
    %320 = arith.addf %319, %66 : vector<16x16xf32>
    %cst_124 = arith.constant dense<0xFF800000> : vector<16xf32>
    %321 = vector.multi_reduction <maximumf>, %320, %cst_124 [1] : vector<16x16xf32> to vector<16xf32>
    %322 = vector.shape_cast %321 : vector<16xf32> to vector<16x1xf32>
    %323 = vector.broadcast %322 : vector<16x1xf32> to vector<16x16xf32>
    %324 = arith.subf %320, %323 : vector<16x16xf32>
    %325 = math.exp %324 : vector<16x16xf32>
    %cst_125 = arith.constant dense<0.000000e+00> : vector<16xf32>
    %326 = vector.multi_reduction <add>, %325, %cst_125 [1] : vector<16x16xf32> to vector<16xf32>
    %327 = vector.shape_cast %326 : vector<16xf32> to vector<16x1xf32>
    %328 = tpu.reciprocal %327 {approx = true} : vector<16x1xf32> -> vector<16x1xf32>
    %329 = vector.broadcast %328 : vector<16x1xf32> to vector<16x16xf32>
    %330 = arith.mulf %325, %329 : vector<16x16xf32>
    %331 = vector.broadcast %18 : vector<1x32xf32> to vector<16x32xf32>
    %332 = arith.mulf %281, %331 : vector<16x32xf32>
    %cst_126 = arith.constant dense<0.000000e+00> : vector<16x32xf32>
    %333 = tpu.matmul %330, %332, %cst_126 {dimension_numbers = #tpu.dot_dimension_numbers<[1], [0], [0], [1], [0, 0, 1, 1], [], []>} : vector<16x16xf32>, vector<16x32xf32>, vector<16x32xf32> -> vector<16x32xf32>
    %334 = arith.addf %316, %333 : vector<16x32xf32>
    %335 = vector.broadcast %24 : vector<1x32xf32> to vector<16x32xf32>
    %336 = arith.mulf %269, %335 : vector<16x32xf32>
    %cst_127 = arith.constant dense<0.000000e+00> : vector<16x16xf32>
    %337 = tpu.matmul %336, %275, %cst_127 {dimension_numbers = #tpu.dot_dimension_numbers<[1], [1], [0], [0], [0, 0, 1, 0], [], []>} : vector<16x32xf32>, vector<16x32xf32>, vector<16x16xf32> -> vector<16x16xf32>
    %338 = arith.addf %337, %66 : vector<16x16xf32>
    %cst_128 = arith.constant dense<0xFF800000> : vector<16xf32>
    %339 = vector.multi_reduction <maximumf>, %338, %cst_128 [1] : vector<16x16xf32> to vector<16xf32>
    %340 = vector.shape_cast %339 : vector<16xf32> to vector<16x1xf32>
    %341 = vector.broadcast %340 : vector<16x1xf32> to vector<16x16xf32>
    %342 = arith.subf %338, %341 : vector<16x16xf32>
    %343 = math.exp %342 : vector<16x16xf32>
    %cst_129 = arith.constant dense<0.000000e+00> : vector<16xf32>
    %344 = vector.multi_reduction <add>, %343, %cst_129 [1] : vector<16x16xf32> to vector<16xf32>
    %345 = vector.shape_cast %344 : vector<16xf32> to vector<16x1xf32>
    %346 = tpu.reciprocal %345 {approx = true} : vector<16x1xf32> -> vector<16x1xf32>
    %347 = vector.broadcast %346 : vector<16x1xf32> to vector<16x16xf32>
    %348 = arith.mulf %343, %347 : vector<16x16xf32>
    %349 = vector.broadcast %24 : vector<1x32xf32> to vector<16x32xf32>
    %350 = arith.mulf %281, %349 : vector<16x32xf32>
    %cst_130 = arith.constant dense<0.000000e+00> : vector<16x32xf32>
    %351 = tpu.matmul %348, %350, %cst_130 {dimension_numbers = #tpu.dot_dimension_numbers<[1], [0], [0], [1], [0, 0, 1, 1], [], []>} : vector<16x16xf32>, vector<16x32xf32>, vector<16x32xf32> -> vector<16x32xf32>
    %352 = arith.addf %334, %351 : vector<16x32xf32>
    %c7_131 = arith.constant 7 : index
    %c0_132 = arith.constant 0 : index
    %c0_133 = arith.constant 0 : index
    %353 = vector.load %arg5[%c7_131, %c0_132, %c0_133] : memref<16x32x32xbf16, #tpu.memory_space<vmem>>, vector<1x32x32xbf16>
    %354 = vector.shape_cast %353 : vector<1x32x32xbf16> to vector<32x32xbf16>
    %355 = arith.truncf %352 : vector<16x32xf32> to vector<16x32xbf16>
    %cst_134 = arith.constant dense<0.000000e+00> : vector<16x32xf32>
    %356 = tpu.matmul %355, %354, %cst_134 {dimension_numbers = #tpu.dot_dimension_numbers<[1], [0], [0], [1], [0, 0, 1, 1], [], []>} : vector<16x32xbf16>, vector<32x32xbf16>, vector<16x32xf32> -> vector<16x32xf32>
    %357 = arith.addf %234, %356 : vector<16x32xf32>
    %358 = vector.broadcast %240 : vector<1x32xf32> to vector<16x32xf32>
    %359 = arith.addf %357, %358 : vector<16x32xf32>
    %cst_135 = arith.constant dense<0.000000e+00> : vector<16xf32>
    %360 = vector.multi_reduction <add>, %359, %cst_135 [1] : vector<16x32xf32> to vector<16xf32>
    %361 = vector.shape_cast %360 : vector<16xf32> to vector<16x1xf32>
    %cst_136 = arith.constant 3.200000e+01 : f32
    %362 = vector.broadcast %cst_136 : f32 to vector<16x1xf32>
    %363 = arith.divf %361, %362 : vector<16x1xf32>
    %364 = vector.broadcast %363 : vector<16x1xf32> to vector<16x32xf32>
    %365 = arith.subf %359, %364 : vector<16x32xf32>
    %366 = arith.mulf %365, %365 : vector<16x32xf32>
    %cst_137 = arith.constant dense<0.000000e+00> : vector<16xf32>
    %367 = vector.multi_reduction <add>, %366, %cst_137 [1] : vector<16x32xf32> to vector<16xf32>
    %368 = vector.shape_cast %367 : vector<16xf32> to vector<16x1xf32>
    %cst_138 = arith.constant 3.200000e+01 : f32
    %369 = vector.broadcast %cst_138 : f32 to vector<16x1xf32>
    %370 = arith.divf %368, %369 : vector<16x1xf32>
    %cst_139 = arith.constant 9.99999974E-6 : f32
    %371 = vector.broadcast %cst_139 : f32 to vector<16x1xf32>
    %372 = arith.addf %370, %371 : vector<16x1xf32>
    %373 = math.rsqrt %372 : vector<16x1xf32>
    %374 = vector.broadcast %373 : vector<16x1xf32> to vector<16x32xf32>
    %375 = arith.mulf %365, %374 : vector<16x32xf32>
    %376 = vector.broadcast %241 : vector<1x32xf32> to vector<16x32xf32>
    %377 = arith.mulf %375, %376 : vector<16x32xf32>
    %378 = vector.broadcast %242 : vector<1x32xf32> to vector<16x32xf32>
    %379 = arith.addf %377, %378 : vector<16x32xf32>
    %c1_140 = arith.constant 1 : index
    %c0_141 = arith.constant 0 : index
    %c0_142 = arith.constant 0 : index
    %380 = vector.load %arg6[%c1_140, %c0_141, %c0_142] : memref<4x32x128xbf16, #tpu.memory_space<vmem>>, vector<1x32x128xbf16>
    %381 = vector.shape_cast %380 : vector<1x32x128xbf16> to vector<32x128xbf16>
    %382 = arith.truncf %379 : vector<16x32xf32> to vector<16x32xbf16>
    %cst_143 = arith.constant dense<0.000000e+00> : vector<16x128xf32>
    %383 = tpu.matmul %382, %381, %cst_143 {dimension_numbers = #tpu.dot_dimension_numbers<[1], [0], [0], [1], [0, 0, 1, 1], [], []>} : vector<16x32xbf16>, vector<32x128xbf16>, vector<16x128xf32> -> vector<16x128xf32>
    %c1_144 = arith.constant 1 : index
    %c0_145 = arith.constant 0 : index
    %c0_146 = arith.constant 0 : index
    %384 = vector.load %arg9[%c1_144, %c0_145, %c0_146] : memref<4x1x128xf32, #tpu.memory_space<vmem>>, vector<1x1x128xf32>
    %385 = vector.shape_cast %384 : vector<1x1x128xf32> to vector<1x128xf32>
    %386 = vector.broadcast %385 : vector<1x128xf32> to vector<16x128xf32>
    %387 = arith.addf %383, %386 : vector<16x128xf32>
    %cst_147 = arith.constant 5.000000e-01 : f32
    %388 = vector.broadcast %cst_147 : f32 to vector<16x128xf32>
    %389 = arith.mulf %388, %387 : vector<16x128xf32>
    %cst_148 = arith.constant 0.707106769 : f32
    %390 = vector.broadcast %cst_148 : f32 to vector<16x128xf32>
    %391 = arith.mulf %387, %390 : vector<16x128xf32>
    %392 = math.erf %391 : vector<16x128xf32>
    %cst_149 = arith.constant 1.000000e+00 : f32
    %393 = vector.broadcast %cst_149 : f32 to vector<16x128xf32>
    %394 = arith.addf %393, %392 : vector<16x128xf32>
    %395 = arith.mulf %389, %394 : vector<16x128xf32>
    %c1_150 = arith.constant 1 : index
    %c0_151 = arith.constant 0 : index
    %c0_152 = arith.constant 0 : index
    %396 = vector.load %arg7[%c1_150, %c0_151, %c0_152] : memref<4x128x32xbf16, #tpu.memory_space<vmem>>, vector<1x128x32xbf16>
    %397 = vector.shape_cast %396 : vector<1x128x32xbf16> to vector<128x32xbf16>
    %398 = arith.truncf %395 : vector<16x128xf32> to vector<16x128xbf16>
    %cst_153 = arith.constant dense<0.000000e+00> : vector<16x32xf32>
    %399 = tpu.matmul %398, %397, %cst_153 {dimension_numbers = #tpu.dot_dimension_numbers<[1], [0], [0], [1], [0, 0, 1, 1], [], []>} : vector<16x128xbf16>, vector<128x32xbf16>, vector<16x32xf32> -> vector<16x32xf32>
    %400 = arith.addf %359, %399 : vector<16x32xf32>
    %401 = vector.broadcast %243 : vector<1x32xf32> to vector<16x32xf32>
    %402 = arith.addf %400, %401 : vector<16x32xf32>
    %c2_154 = arith.constant 2 : index
    %c0_155 = arith.constant 0 : index
    %403 = vector.load %arg4[%c2_154, %c0_155] : memref<6x32xf32, #tpu.memory_space<vmem>>, vector<1x32xf32>
    %c3_156 = arith.constant 3 : index
    %c0_157 = arith.constant 0 : index
    %404 = vector.load %arg4[%c3_156, %c0_157] : memref<6x32xf32, #tpu.memory_space<vmem>>, vector<1x32xf32>
    %cst_158 = arith.constant dense<0.000000e+00> : vector<16xf32>
    %405 = vector.multi_reduction <add>, %402, %cst_158 [1] : vector<16x32xf32> to vector<16xf32>
    %406 = vector.shape_cast %405 : vector<16xf32> to vector<16x1xf32>
    %cst_159 = arith.constant 3.200000e+01 : f32
    %407 = vector.broadcast %cst_159 : f32 to vector<16x1xf32>
    %408 = arith.divf %406, %407 : vector<16x1xf32>
    %409 = vector.broadcast %408 : vector<16x1xf32> to vector<16x32xf32>
    %410 = arith.subf %402, %409 : vector<16x32xf32>
    %411 = arith.mulf %410, %410 : vector<16x32xf32>
    %cst_160 = arith.constant dense<0.000000e+00> : vector<16xf32>
    %412 = vector.multi_reduction <add>, %411, %cst_160 [1] : vector<16x32xf32> to vector<16xf32>
    %413 = vector.shape_cast %412 : vector<16xf32> to vector<16x1xf32>
    %cst_161 = arith.constant 3.200000e+01 : f32
    %414 = vector.broadcast %cst_161 : f32 to vector<16x1xf32>
    %415 = arith.divf %413, %414 : vector<16x1xf32>
    %cst_162 = arith.constant 9.99999974E-6 : f32
    %416 = vector.broadcast %cst_162 : f32 to vector<16x1xf32>
    %417 = arith.addf %415, %416 : vector<16x1xf32>
    %418 = math.rsqrt %417 : vector<16x1xf32>
    %419 = vector.broadcast %418 : vector<16x1xf32> to vector<16x32xf32>
    %420 = arith.mulf %410, %419 : vector<16x32xf32>
    %421 = vector.broadcast %403 : vector<1x32xf32> to vector<16x32xf32>
    %422 = arith.mulf %420, %421 : vector<16x32xf32>
    %423 = vector.broadcast %404 : vector<1x32xf32> to vector<16x32xf32>
    %424 = arith.addf %422, %423 : vector<16x32xf32>
    %425 = tpu.iota {dimensions = array<i32: 0>} : vector<2x16xi32>
    %426 = tpu.iota {dimensions = array<i32: 1>} : vector<2x16xi32>
    %c8_i32 = arith.constant 8 : i32
    %427 = vector.broadcast %c8_i32 : i32 to vector<2x16xi32>
    %428 = arith.muli %425, %427 : vector<2x16xi32>
    %429 = arith.cmpi eq, %426, %428 : vector<2x16xi32>
    %430 = arith.extui %429 : vector<2x16xi1> to vector<2x16xi32>
    %431 = arith.sitofp %430 : vector<2x16xi32> to vector<2x16xf32>
    %cst_163 = arith.constant dense<0.000000e+00> : vector<2x32xf32>
    %432 = tpu.matmul %431, %424, %cst_163 {dimension_numbers = #tpu.dot_dimension_numbers<[1], [0], [0], [1], [0, 0, 1, 1], [], []>} : vector<2x16xf32>, vector<16x32xf32>, vector<2x32xf32> -> vector<2x32xf32>
    %c0_164 = arith.constant 0 : index
    %c0_165 = arith.constant 0 : index
    %c0_166 = arith.constant 0 : index
    %433 = vector.load %arg10[%c0_164, %c0_165, %c0_166] : memref<2x32x128xbf16, #tpu.memory_space<vmem>>, vector<1x32x128xbf16>
    %434 = vector.shape_cast %433 : vector<1x32x128xbf16> to vector<32x128xbf16>
    %435 = arith.truncf %432 : vector<2x32xf32> to vector<2x32xbf16>
    %cst_167 = arith.constant dense<0.000000e+00> : vector<2x128xf32>
    %436 = tpu.matmul %435, %434, %cst_167 {dimension_numbers = #tpu.dot_dimension_numbers<[1], [0], [0], [1], [0, 0, 1, 1], [], []>} : vector<2x32xbf16>, vector<32x128xbf16>, vector<2x128xf32> -> vector<2x128xf32>
    %437 = arith.mulf %436, %436 : vector<2x128xf32>
    %cst_168 = arith.constant dense<0.000000e+00> : vector<2xf32>
    %438 = vector.multi_reduction <add>, %437, %cst_168 [1] : vector<2x128xf32> to vector<2xf32>
    %439 = vector.shape_cast %438 : vector<2xf32> to vector<2x1xf32>
    %440 = math.sqrt %439 : vector<2x1xf32>
    %cst_169 = arith.constant 9.99999996E-13 : f32
    %441 = vector.broadcast %cst_169 : f32 to vector<2x1xf32>
    %442 = arith.maximumf %440, %441 : vector<2x1xf32>
    %443 = vector.broadcast %442 : vector<2x1xf32> to vector<2x128xf32>
    %444 = arith.divf %436, %443 : vector<2x128xf32>
    %c16_170 = arith.constant 16 : index
    %c0_171 = arith.constant 0 : index
    %445 = vector.load %arg3[%c16_170, %c0_171] : memref<32x32xf32, #tpu.memory_space<vmem>>, vector<16x32xf32>
    %446 = tpu.iota {dimensions = array<i32: 0>} : vector<16x16xi32>
    %447 = tpu.iota {dimensions = array<i32: 1>} : vector<16x16xi32>
    %c3_i32_172 = arith.constant 3 : i32
    %448 = vector.broadcast %c3_i32_172 : i32 to vector<16x16xi32>
    %449 = arith.shrsi %446, %448 : vector<16x16xi32>
    %c3_i32_173 = arith.constant 3 : i32
    %450 = vector.broadcast %c3_i32_173 : i32 to vector<16x16xi32>
    %451 = arith.shrsi %447, %450 : vector<16x16xi32>
    %452 = arith.cmpi eq, %449, %451 : vector<16x16xi32>
    %c7_i32_174 = arith.constant 7 : i32
    %453 = vector.broadcast %c7_i32_174 : i32 to vector<16x16xi32>
    %454 = arith.andi %447, %453 : vector<16x16xi32>
    %c7_i32_175 = arith.constant 7 : i32
    %455 = vector.broadcast %c7_i32_175 : i32 to vector<16x16xi32>
    %456 = arith.andi %446, %455 : vector<16x16xi32>
    %457 = arith.cmpi sle, %454, %456 : vector<16x16xi32>
    %458 = arith.andi %452, %457 : vector<16x16xi1>
    %cst_176 = arith.constant 0.000000e+00 : f32
    %cst_177 = arith.constant -1.000000e+30 : f32
    %459 = vector.broadcast %cst_176 : f32 to vector<16x16xf32>
    %460 = vector.broadcast %cst_177 : f32 to vector<16x16xf32>
    %461 = arith.select %458, %459, %460 : vector<16x16xi1>, vector<16x16xf32>
    %c18 = arith.constant 18 : index
    %c0_178 = arith.constant 0 : index
    %462 = vector.load %arg8[%c18, %c0_178] : memref<36x32xf32, #tpu.memory_space<vmem>>, vector<1x32xf32>
    %c19 = arith.constant 19 : index
    %c0_179 = arith.constant 0 : index
    %463 = vector.load %arg8[%c19, %c0_179] : memref<36x32xf32, #tpu.memory_space<vmem>>, vector<1x32xf32>
    %c20 = arith.constant 20 : index
    %c0_180 = arith.constant 0 : index
    %464 = vector.load %arg8[%c20, %c0_180] : memref<36x32xf32, #tpu.memory_space<vmem>>, vector<1x32xf32>
    %c21 = arith.constant 21 : index
    %c0_181 = arith.constant 0 : index
    %465 = vector.load %arg8[%c21, %c0_181] : memref<36x32xf32, #tpu.memory_space<vmem>>, vector<1x32xf32>
    %c22 = arith.constant 22 : index
    %c0_182 = arith.constant 0 : index
    %466 = vector.load %arg8[%c22, %c0_182] : memref<36x32xf32, #tpu.memory_space<vmem>>, vector<1x32xf32>
    %c23 = arith.constant 23 : index
    %c0_183 = arith.constant 0 : index
    %467 = vector.load %arg8[%c23, %c0_183] : memref<36x32xf32, #tpu.memory_space<vmem>>, vector<1x32xf32>
    %c24 = arith.constant 24 : index
    %c0_184 = arith.constant 0 : index
    %468 = vector.load %arg8[%c24, %c0_184] : memref<36x32xf32, #tpu.memory_space<vmem>>, vector<1x32xf32>
    %c25 = arith.constant 25 : index
    %c0_185 = arith.constant 0 : index
    %469 = vector.load %arg8[%c25, %c0_185] : memref<36x32xf32, #tpu.memory_space<vmem>>, vector<1x32xf32>
    %c26 = arith.constant 26 : index
    %c0_186 = arith.constant 0 : index
    %470 = vector.load %arg8[%c26, %c0_186] : memref<36x32xf32, #tpu.memory_space<vmem>>, vector<1x32xf32>
    %cst_187 = arith.constant dense<0.000000e+00> : vector<16xf32>
    %471 = vector.multi_reduction <add>, %445, %cst_187 [1] : vector<16x32xf32> to vector<16xf32>
    %472 = vector.shape_cast %471 : vector<16xf32> to vector<16x1xf32>
    %cst_188 = arith.constant 3.200000e+01 : f32
    %473 = vector.broadcast %cst_188 : f32 to vector<16x1xf32>
    %474 = arith.divf %472, %473 : vector<16x1xf32>
    %475 = vector.broadcast %474 : vector<16x1xf32> to vector<16x32xf32>
    %476 = arith.subf %445, %475 : vector<16x32xf32>
    %477 = arith.mulf %476, %476 : vector<16x32xf32>
    %cst_189 = arith.constant dense<0.000000e+00> : vector<16xf32>
    %478 = vector.multi_reduction <add>, %477, %cst_189 [1] : vector<16x32xf32> to vector<16xf32>
    %479 = vector.shape_cast %478 : vector<16xf32> to vector<16x1xf32>
    %cst_190 = arith.constant 3.200000e+01 : f32
    %480 = vector.broadcast %cst_190 : f32 to vector<16x1xf32>
    %481 = arith.divf %479, %480 : vector<16x1xf32>
    %cst_191 = arith.constant 9.99999974E-6 : f32
    %482 = vector.broadcast %cst_191 : f32 to vector<16x1xf32>
    %483 = arith.addf %481, %482 : vector<16x1xf32>
    %484 = math.rsqrt %483 : vector<16x1xf32>
    %485 = vector.broadcast %484 : vector<16x1xf32> to vector<16x32xf32>
    %486 = arith.mulf %476, %485 : vector<16x32xf32>
    %487 = vector.broadcast %462 : vector<1x32xf32> to vector<16x32xf32>
    %488 = arith.mulf %486, %487 : vector<16x32xf32>
    %489 = vector.broadcast %463 : vector<1x32xf32> to vector<16x32xf32>
    %490 = arith.addf %488, %489 : vector<16x32xf32>
    %c8_192 = arith.constant 8 : index
    %c0_193 = arith.constant 0 : index
    %c0_194 = arith.constant 0 : index
    %491 = vector.load %arg5[%c8_192, %c0_193, %c0_194] : memref<16x32x32xbf16, #tpu.memory_space<vmem>>, vector<1x32x32xbf16>
    %492 = vector.shape_cast %491 : vector<1x32x32xbf16> to vector<32x32xbf16>
    %493 = arith.truncf %490 : vector<16x32xf32> to vector<16x32xbf16>
    %cst_195 = arith.constant dense<0.000000e+00> : vector<16x32xf32>
    %494 = tpu.matmul %493, %492, %cst_195 {dimension_numbers = #tpu.dot_dimension_numbers<[1], [0], [0], [1], [0, 0, 1, 1], [], []>} : vector<16x32xbf16>, vector<32x32xbf16>, vector<16x32xf32> -> vector<16x32xf32>
    %495 = vector.broadcast %464 : vector<1x32xf32> to vector<16x32xf32>
    %496 = arith.addf %494, %495 : vector<16x32xf32>
    %c9_196 = arith.constant 9 : index
    %c0_197 = arith.constant 0 : index
    %c0_198 = arith.constant 0 : index
    %497 = vector.load %arg5[%c9_196, %c0_197, %c0_198] : memref<16x32x32xbf16, #tpu.memory_space<vmem>>, vector<1x32x32xbf16>
    %498 = vector.shape_cast %497 : vector<1x32x32xbf16> to vector<32x32xbf16>
    %499 = arith.truncf %490 : vector<16x32xf32> to vector<16x32xbf16>
    %cst_199 = arith.constant dense<0.000000e+00> : vector<16x32xf32>
    %500 = tpu.matmul %499, %498, %cst_199 {dimension_numbers = #tpu.dot_dimension_numbers<[1], [0], [0], [1], [0, 0, 1, 1], [], []>} : vector<16x32xbf16>, vector<32x32xbf16>, vector<16x32xf32> -> vector<16x32xf32>
    %501 = vector.broadcast %465 : vector<1x32xf32> to vector<16x32xf32>
    %502 = arith.addf %500, %501 : vector<16x32xf32>
    %c10_200 = arith.constant 10 : index
    %c0_201 = arith.constant 0 : index
    %c0_202 = arith.constant 0 : index
    %503 = vector.load %arg5[%c10_200, %c0_201, %c0_202] : memref<16x32x32xbf16, #tpu.memory_space<vmem>>, vector<1x32x32xbf16>
    %504 = vector.shape_cast %503 : vector<1x32x32xbf16> to vector<32x32xbf16>
    %505 = arith.truncf %490 : vector<16x32xf32> to vector<16x32xbf16>
    %cst_203 = arith.constant dense<0.000000e+00> : vector<16x32xf32>
    %506 = tpu.matmul %505, %504, %cst_203 {dimension_numbers = #tpu.dot_dimension_numbers<[1], [0], [0], [1], [0, 0, 1, 1], [], []>} : vector<16x32xbf16>, vector<32x32xbf16>, vector<16x32xf32> -> vector<16x32xf32>
    %507 = vector.broadcast %466 : vector<1x32xf32> to vector<16x32xf32>
    %508 = arith.addf %506, %507 : vector<16x32xf32>
    %509 = vector.broadcast %6 : vector<1x32xf32> to vector<16x32xf32>
    %510 = arith.mulf %496, %509 : vector<16x32xf32>
    %cst_204 = arith.constant dense<0.000000e+00> : vector<16x16xf32>
    %511 = tpu.matmul %510, %502, %cst_204 {dimension_numbers = #tpu.dot_dimension_numbers<[1], [1], [0], [0], [0, 0, 1, 0], [], []>} : vector<16x32xf32>, vector<16x32xf32>, vector<16x16xf32> -> vector<16x16xf32>
    %512 = arith.addf %511, %461 : vector<16x16xf32>
    %cst_205 = arith.constant dense<0xFF800000> : vector<16xf32>
    %513 = vector.multi_reduction <maximumf>, %512, %cst_205 [1] : vector<16x16xf32> to vector<16xf32>
    %514 = vector.shape_cast %513 : vector<16xf32> to vector<16x1xf32>
    %515 = vector.broadcast %514 : vector<16x1xf32> to vector<16x16xf32>
    %516 = arith.subf %512, %515 : vector<16x16xf32>
    %517 = math.exp %516 : vector<16x16xf32>
    %cst_206 = arith.constant dense<0.000000e+00> : vector<16xf32>
    %518 = vector.multi_reduction <add>, %517, %cst_206 [1] : vector<16x16xf32> to vector<16xf32>
    %519 = vector.shape_cast %518 : vector<16xf32> to vector<16x1xf32>
    %520 = tpu.reciprocal %519 {approx = true} : vector<16x1xf32> -> vector<16x1xf32>
    %521 = vector.broadcast %520 : vector<16x1xf32> to vector<16x16xf32>
    %522 = arith.mulf %517, %521 : vector<16x16xf32>
    %523 = vector.broadcast %6 : vector<1x32xf32> to vector<16x32xf32>
    %524 = arith.mulf %508, %523 : vector<16x32xf32>
    %cst_207 = arith.constant dense<0.000000e+00> : vector<16x32xf32>
    %525 = tpu.matmul %522, %524, %cst_207 {dimension_numbers = #tpu.dot_dimension_numbers<[1], [0], [0], [1], [0, 0, 1, 1], [], []>} : vector<16x16xf32>, vector<16x32xf32>, vector<16x32xf32> -> vector<16x32xf32>
    %526 = vector.broadcast %12 : vector<1x32xf32> to vector<16x32xf32>
    %527 = arith.mulf %496, %526 : vector<16x32xf32>
    %cst_208 = arith.constant dense<0.000000e+00> : vector<16x16xf32>
    %528 = tpu.matmul %527, %502, %cst_208 {dimension_numbers = #tpu.dot_dimension_numbers<[1], [1], [0], [0], [0, 0, 1, 0], [], []>} : vector<16x32xf32>, vector<16x32xf32>, vector<16x16xf32> -> vector<16x16xf32>
    %529 = arith.addf %528, %461 : vector<16x16xf32>
    %cst_209 = arith.constant dense<0xFF800000> : vector<16xf32>
    %530 = vector.multi_reduction <maximumf>, %529, %cst_209 [1] : vector<16x16xf32> to vector<16xf32>
    %531 = vector.shape_cast %530 : vector<16xf32> to vector<16x1xf32>
    %532 = vector.broadcast %531 : vector<16x1xf32> to vector<16x16xf32>
    %533 = arith.subf %529, %532 : vector<16x16xf32>
    %534 = math.exp %533 : vector<16x16xf32>
    %cst_210 = arith.constant dense<0.000000e+00> : vector<16xf32>
    %535 = vector.multi_reduction <add>, %534, %cst_210 [1] : vector<16x16xf32> to vector<16xf32>
    %536 = vector.shape_cast %535 : vector<16xf32> to vector<16x1xf32>
    %537 = tpu.reciprocal %536 {approx = true} : vector<16x1xf32> -> vector<16x1xf32>
    %538 = vector.broadcast %537 : vector<16x1xf32> to vector<16x16xf32>
    %539 = arith.mulf %534, %538 : vector<16x16xf32>
    %540 = vector.broadcast %12 : vector<1x32xf32> to vector<16x32xf32>
    %541 = arith.mulf %508, %540 : vector<16x32xf32>
    %cst_211 = arith.constant dense<0.000000e+00> : vector<16x32xf32>
    %542 = tpu.matmul %539, %541, %cst_211 {dimension_numbers = #tpu.dot_dimension_numbers<[1], [0], [0], [1], [0, 0, 1, 1], [], []>} : vector<16x16xf32>, vector<16x32xf32>, vector<16x32xf32> -> vector<16x32xf32>
    %543 = arith.addf %525, %542 : vector<16x32xf32>
    %544 = vector.broadcast %18 : vector<1x32xf32> to vector<16x32xf32>
    %545 = arith.mulf %496, %544 : vector<16x32xf32>
    %cst_212 = arith.constant dense<0.000000e+00> : vector<16x16xf32>
    %546 = tpu.matmul %545, %502, %cst_212 {dimension_numbers = #tpu.dot_dimension_numbers<[1], [1], [0], [0], [0, 0, 1, 0], [], []>} : vector<16x32xf32>, vector<16x32xf32>, vector<16x16xf32> -> vector<16x16xf32>
    %547 = arith.addf %546, %461 : vector<16x16xf32>
    %cst_213 = arith.constant dense<0xFF800000> : vector<16xf32>
    %548 = vector.multi_reduction <maximumf>, %547, %cst_213 [1] : vector<16x16xf32> to vector<16xf32>
    %549 = vector.shape_cast %548 : vector<16xf32> to vector<16x1xf32>
    %550 = vector.broadcast %549 : vector<16x1xf32> to vector<16x16xf32>
    %551 = arith.subf %547, %550 : vector<16x16xf32>
    %552 = math.exp %551 : vector<16x16xf32>
    %cst_214 = arith.constant dense<0.000000e+00> : vector<16xf32>
    %553 = vector.multi_reduction <add>, %552, %cst_214 [1] : vector<16x16xf32> to vector<16xf32>
    %554 = vector.shape_cast %553 : vector<16xf32> to vector<16x1xf32>
    %555 = tpu.reciprocal %554 {approx = true} : vector<16x1xf32> -> vector<16x1xf32>
    %556 = vector.broadcast %555 : vector<16x1xf32> to vector<16x16xf32>
    %557 = arith.mulf %552, %556 : vector<16x16xf32>
    %558 = vector.broadcast %18 : vector<1x32xf32> to vector<16x32xf32>
    %559 = arith.mulf %508, %558 : vector<16x32xf32>
    %cst_215 = arith.constant dense<0.000000e+00> : vector<16x32xf32>
    %560 = tpu.matmul %557, %559, %cst_215 {dimension_numbers = #tpu.dot_dimension_numbers<[1], [0], [0], [1], [0, 0, 1, 1], [], []>} : vector<16x16xf32>, vector<16x32xf32>, vector<16x32xf32> -> vector<16x32xf32>
    %561 = arith.addf %543, %560 : vector<16x32xf32>
    %562 = vector.broadcast %24 : vector<1x32xf32> to vector<16x32xf32>
    %563 = arith.mulf %496, %562 : vector<16x32xf32>
    %cst_216 = arith.constant dense<0.000000e+00> : vector<16x16xf32>
    %564 = tpu.matmul %563, %502, %cst_216 {dimension_numbers = #tpu.dot_dimension_numbers<[1], [1], [0], [0], [0, 0, 1, 0], [], []>} : vector<16x32xf32>, vector<16x32xf32>, vector<16x16xf32> -> vector<16x16xf32>
    %565 = arith.addf %564, %461 : vector<16x16xf32>
    %cst_217 = arith.constant dense<0xFF800000> : vector<16xf32>
    %566 = vector.multi_reduction <maximumf>, %565, %cst_217 [1] : vector<16x16xf32> to vector<16xf32>
    %567 = vector.shape_cast %566 : vector<16xf32> to vector<16x1xf32>
    %568 = vector.broadcast %567 : vector<16x1xf32> to vector<16x16xf32>
    %569 = arith.subf %565, %568 : vector<16x16xf32>
    %570 = math.exp %569 : vector<16x16xf32>
    %cst_218 = arith.constant dense<0.000000e+00> : vector<16xf32>
    %571 = vector.multi_reduction <add>, %570, %cst_218 [1] : vector<16x16xf32> to vector<16xf32>
    %572 = vector.shape_cast %571 : vector<16xf32> to vector<16x1xf32>
    %573 = tpu.reciprocal %572 {approx = true} : vector<16x1xf32> -> vector<16x1xf32>
    %574 = vector.broadcast %573 : vector<16x1xf32> to vector<16x16xf32>
    %575 = arith.mulf %570, %574 : vector<16x16xf32>
    %576 = vector.broadcast %24 : vector<1x32xf32> to vector<16x32xf32>
    %577 = arith.mulf %508, %576 : vector<16x32xf32>
    %cst_219 = arith.constant dense<0.000000e+00> : vector<16x32xf32>
    %578 = tpu.matmul %575, %577, %cst_219 {dimension_numbers = #tpu.dot_dimension_numbers<[1], [0], [0], [1], [0, 0, 1, 1], [], []>} : vector<16x16xf32>, vector<16x32xf32>, vector<16x32xf32> -> vector<16x32xf32>
    %579 = arith.addf %561, %578 : vector<16x32xf32>
    %c11_220 = arith.constant 11 : index
    %c0_221 = arith.constant 0 : index
    %c0_222 = arith.constant 0 : index
    %580 = vector.load %arg5[%c11_220, %c0_221, %c0_222] : memref<16x32x32xbf16, #tpu.memory_space<vmem>>, vector<1x32x32xbf16>
    %581 = vector.shape_cast %580 : vector<1x32x32xbf16> to vector<32x32xbf16>
    %582 = arith.truncf %579 : vector<16x32xf32> to vector<16x32xbf16>
    %cst_223 = arith.constant dense<0.000000e+00> : vector<16x32xf32>
    %583 = tpu.matmul %582, %581, %cst_223 {dimension_numbers = #tpu.dot_dimension_numbers<[1], [0], [0], [1], [0, 0, 1, 1], [], []>} : vector<16x32xbf16>, vector<32x32xbf16>, vector<16x32xf32> -> vector<16x32xf32>
    %584 = arith.addf %445, %583 : vector<16x32xf32>
    %585 = vector.broadcast %467 : vector<1x32xf32> to vector<16x32xf32>
    %586 = arith.addf %584, %585 : vector<16x32xf32>
    %cst_224 = arith.constant dense<0.000000e+00> : vector<16xf32>
    %587 = vector.multi_reduction <add>, %586, %cst_224 [1] : vector<16x32xf32> to vector<16xf32>
    %588 = vector.shape_cast %587 : vector<16xf32> to vector<16x1xf32>
    %cst_225 = arith.constant 3.200000e+01 : f32
    %589 = vector.broadcast %cst_225 : f32 to vector<16x1xf32>
    %590 = arith.divf %588, %589 : vector<16x1xf32>
    %591 = vector.broadcast %590 : vector<16x1xf32> to vector<16x32xf32>
    %592 = arith.subf %586, %591 : vector<16x32xf32>
    %593 = arith.mulf %592, %592 : vector<16x32xf32>
    %cst_226 = arith.constant dense<0.000000e+00> : vector<16xf32>
    %594 = vector.multi_reduction <add>, %593, %cst_226 [1] : vector<16x32xf32> to vector<16xf32>
    %595 = vector.shape_cast %594 : vector<16xf32> to vector<16x1xf32>
    %cst_227 = arith.constant 3.200000e+01 : f32
    %596 = vector.broadcast %cst_227 : f32 to vector<16x1xf32>
    %597 = arith.divf %595, %596 : vector<16x1xf32>
    %cst_228 = arith.constant 9.99999974E-6 : f32
    %598 = vector.broadcast %cst_228 : f32 to vector<16x1xf32>
    %599 = arith.addf %597, %598 : vector<16x1xf32>
    %600 = math.rsqrt %599 : vector<16x1xf32>
    %601 = vector.broadcast %600 : vector<16x1xf32> to vector<16x32xf32>
    %602 = arith.mulf %592, %601 : vector<16x32xf32>
    %603 = vector.broadcast %468 : vector<1x32xf32> to vector<16x32xf32>
    %604 = arith.mulf %602, %603 : vector<16x32xf32>
    %605 = vector.broadcast %469 : vector<1x32xf32> to vector<16x32xf32>
    %606 = arith.addf %604, %605 : vector<16x32xf32>
    %c2_229 = arith.constant 2 : index
    %c0_230 = arith.constant 0 : index
    %c0_231 = arith.constant 0 : index
    %607 = vector.load %arg6[%c2_229, %c0_230, %c0_231] : memref<4x32x128xbf16, #tpu.memory_space<vmem>>, vector<1x32x128xbf16>
    %608 = vector.shape_cast %607 : vector<1x32x128xbf16> to vector<32x128xbf16>
    %609 = arith.truncf %606 : vector<16x32xf32> to vector<16x32xbf16>
    %cst_232 = arith.constant dense<0.000000e+00> : vector<16x128xf32>
    %610 = tpu.matmul %609, %608, %cst_232 {dimension_numbers = #tpu.dot_dimension_numbers<[1], [0], [0], [1], [0, 0, 1, 1], [], []>} : vector<16x32xbf16>, vector<32x128xbf16>, vector<16x128xf32> -> vector<16x128xf32>
    %c2_233 = arith.constant 2 : index
    %c0_234 = arith.constant 0 : index
    %c0_235 = arith.constant 0 : index
    %611 = vector.load %arg9[%c2_233, %c0_234, %c0_235] : memref<4x1x128xf32, #tpu.memory_space<vmem>>, vector<1x1x128xf32>
    %612 = vector.shape_cast %611 : vector<1x1x128xf32> to vector<1x128xf32>
    %613 = vector.broadcast %612 : vector<1x128xf32> to vector<16x128xf32>
    %614 = arith.addf %610, %613 : vector<16x128xf32>
    %cst_236 = arith.constant 5.000000e-01 : f32
    %615 = vector.broadcast %cst_236 : f32 to vector<16x128xf32>
    %616 = arith.mulf %615, %614 : vector<16x128xf32>
    %cst_237 = arith.constant 0.707106769 : f32
    %617 = vector.broadcast %cst_237 : f32 to vector<16x128xf32>
    %618 = arith.mulf %614, %617 : vector<16x128xf32>
    %619 = math.erf %618 : vector<16x128xf32>
    %cst_238 = arith.constant 1.000000e+00 : f32
    %620 = vector.broadcast %cst_238 : f32 to vector<16x128xf32>
    %621 = arith.addf %620, %619 : vector<16x128xf32>
    %622 = arith.mulf %616, %621 : vector<16x128xf32>
    %c2_239 = arith.constant 2 : index
    %c0_240 = arith.constant 0 : index
    %c0_241 = arith.constant 0 : index
    %623 = vector.load %arg7[%c2_239, %c0_240, %c0_241] : memref<4x128x32xbf16, #tpu.memory_space<vmem>>, vector<1x128x32xbf16>
    %624 = vector.shape_cast %623 : vector<1x128x32xbf16> to vector<128x32xbf16>
    %625 = arith.truncf %622 : vector<16x128xf32> to vector<16x128xbf16>
    %cst_242 = arith.constant dense<0.000000e+00> : vector<16x32xf32>
    %626 = tpu.matmul %625, %624, %cst_242 {dimension_numbers = #tpu.dot_dimension_numbers<[1], [0], [0], [1], [0, 0, 1, 1], [], []>} : vector<16x128xbf16>, vector<128x32xbf16>, vector<16x32xf32> -> vector<16x32xf32>
    %627 = arith.addf %586, %626 : vector<16x32xf32>
    %628 = vector.broadcast %470 : vector<1x32xf32> to vector<16x32xf32>
    %629 = arith.addf %627, %628 : vector<16x32xf32>
    %c27 = arith.constant 27 : index
    %c0_243 = arith.constant 0 : index
    %630 = vector.load %arg8[%c27, %c0_243] : memref<36x32xf32, #tpu.memory_space<vmem>>, vector<1x32xf32>
    %c28 = arith.constant 28 : index
    %c0_244 = arith.constant 0 : index
    %631 = vector.load %arg8[%c28, %c0_244] : memref<36x32xf32, #tpu.memory_space<vmem>>, vector<1x32xf32>
    %c29 = arith.constant 29 : index
    %c0_245 = arith.constant 0 : index
    %632 = vector.load %arg8[%c29, %c0_245] : memref<36x32xf32, #tpu.memory_space<vmem>>, vector<1x32xf32>
    %c30 = arith.constant 30 : index
    %c0_246 = arith.constant 0 : index
    %633 = vector.load %arg8[%c30, %c0_246] : memref<36x32xf32, #tpu.memory_space<vmem>>, vector<1x32xf32>
    %c31 = arith.constant 31 : index
    %c0_247 = arith.constant 0 : index
    %634 = vector.load %arg8[%c31, %c0_247] : memref<36x32xf32, #tpu.memory_space<vmem>>, vector<1x32xf32>
    %c32 = arith.constant 32 : index
    %c0_248 = arith.constant 0 : index
    %635 = vector.load %arg8[%c32, %c0_248] : memref<36x32xf32, #tpu.memory_space<vmem>>, vector<1x32xf32>
    %c33 = arith.constant 33 : index
    %c0_249 = arith.constant 0 : index
    %636 = vector.load %arg8[%c33, %c0_249] : memref<36x32xf32, #tpu.memory_space<vmem>>, vector<1x32xf32>
    %c34 = arith.constant 34 : index
    %c0_250 = arith.constant 0 : index
    %637 = vector.load %arg8[%c34, %c0_250] : memref<36x32xf32, #tpu.memory_space<vmem>>, vector<1x32xf32>
    %c35 = arith.constant 35 : index
    %c0_251 = arith.constant 0 : index
    %638 = vector.load %arg8[%c35, %c0_251] : memref<36x32xf32, #tpu.memory_space<vmem>>, vector<1x32xf32>
    %cst_252 = arith.constant dense<0.000000e+00> : vector<16xf32>
    %639 = vector.multi_reduction <add>, %629, %cst_252 [1] : vector<16x32xf32> to vector<16xf32>
    %640 = vector.shape_cast %639 : vector<16xf32> to vector<16x1xf32>
    %cst_253 = arith.constant 3.200000e+01 : f32
    %641 = vector.broadcast %cst_253 : f32 to vector<16x1xf32>
    %642 = arith.divf %640, %641 : vector<16x1xf32>
    %643 = vector.broadcast %642 : vector<16x1xf32> to vector<16x32xf32>
    %644 = arith.subf %629, %643 : vector<16x32xf32>
    %645 = arith.mulf %644, %644 : vector<16x32xf32>
    %cst_254 = arith.constant dense<0.000000e+00> : vector<16xf32>
    %646 = vector.multi_reduction <add>, %645, %cst_254 [1] : vector<16x32xf32> to vector<16xf32>
    %647 = vector.shape_cast %646 : vector<16xf32> to vector<16x1xf32>
    %cst_255 = arith.constant 3.200000e+01 : f32
    %648 = vector.broadcast %cst_255 : f32 to vector<16x1xf32>
    %649 = arith.divf %647, %648 : vector<16x1xf32>
    %cst_256 = arith.constant 9.99999974E-6 : f32
    %650 = vector.broadcast %cst_256 : f32 to vector<16x1xf32>
    %651 = arith.addf %649, %650 : vector<16x1xf32>
    %652 = math.rsqrt %651 : vector<16x1xf32>
    %653 = vector.broadcast %652 : vector<16x1xf32> to vector<16x32xf32>
    %654 = arith.mulf %644, %653 : vector<16x32xf32>
    %655 = vector.broadcast %630 : vector<1x32xf32> to vector<16x32xf32>
    %656 = arith.mulf %654, %655 : vector<16x32xf32>
    %657 = vector.broadcast %631 : vector<1x32xf32> to vector<16x32xf32>
    %658 = arith.addf %656, %657 : vector<16x32xf32>
    %c12_257 = arith.constant 12 : index
    %c0_258 = arith.constant 0 : index
    %c0_259 = arith.constant 0 : index
    %659 = vector.load %arg5[%c12_257, %c0_258, %c0_259] : memref<16x32x32xbf16, #tpu.memory_space<vmem>>, vector<1x32x32xbf16>
    %660 = vector.shape_cast %659 : vector<1x32x32xbf16> to vector<32x32xbf16>
    %661 = arith.truncf %658 : vector<16x32xf32> to vector<16x32xbf16>
    %cst_260 = arith.constant dense<0.000000e+00> : vector<16x32xf32>
    %662 = tpu.matmul %661, %660, %cst_260 {dimension_numbers = #tpu.dot_dimension_numbers<[1], [0], [0], [1], [0, 0, 1, 1], [], []>} : vector<16x32xbf16>, vector<32x32xbf16>, vector<16x32xf32> -> vector<16x32xf32>
    %663 = vector.broadcast %632 : vector<1x32xf32> to vector<16x32xf32>
    %664 = arith.addf %662, %663 : vector<16x32xf32>
    %c13_261 = arith.constant 13 : index
    %c0_262 = arith.constant 0 : index
    %c0_263 = arith.constant 0 : index
    %665 = vector.load %arg5[%c13_261, %c0_262, %c0_263] : memref<16x32x32xbf16, #tpu.memory_space<vmem>>, vector<1x32x32xbf16>
    %666 = vector.shape_cast %665 : vector<1x32x32xbf16> to vector<32x32xbf16>
    %667 = arith.truncf %658 : vector<16x32xf32> to vector<16x32xbf16>
    %cst_264 = arith.constant dense<0.000000e+00> : vector<16x32xf32>
    %668 = tpu.matmul %667, %666, %cst_264 {dimension_numbers = #tpu.dot_dimension_numbers<[1], [0], [0], [1], [0, 0, 1, 1], [], []>} : vector<16x32xbf16>, vector<32x32xbf16>, vector<16x32xf32> -> vector<16x32xf32>
    %669 = vector.broadcast %633 : vector<1x32xf32> to vector<16x32xf32>
    %670 = arith.addf %668, %669 : vector<16x32xf32>
    %c14_265 = arith.constant 14 : index
    %c0_266 = arith.constant 0 : index
    %c0_267 = arith.constant 0 : index
    %671 = vector.load %arg5[%c14_265, %c0_266, %c0_267] : memref<16x32x32xbf16, #tpu.memory_space<vmem>>, vector<1x32x32xbf16>
    %672 = vector.shape_cast %671 : vector<1x32x32xbf16> to vector<32x32xbf16>
    %673 = arith.truncf %658 : vector<16x32xf32> to vector<16x32xbf16>
    %cst_268 = arith.constant dense<0.000000e+00> : vector<16x32xf32>
    %674 = tpu.matmul %673, %672, %cst_268 {dimension_numbers = #tpu.dot_dimension_numbers<[1], [0], [0], [1], [0, 0, 1, 1], [], []>} : vector<16x32xbf16>, vector<32x32xbf16>, vector<16x32xf32> -> vector<16x32xf32>
    %675 = vector.broadcast %634 : vector<1x32xf32> to vector<16x32xf32>
    %676 = arith.addf %674, %675 : vector<16x32xf32>
    %677 = vector.broadcast %6 : vector<1x32xf32> to vector<16x32xf32>
    %678 = arith.mulf %664, %677 : vector<16x32xf32>
    %cst_269 = arith.constant dense<0.000000e+00> : vector<16x16xf32>
    %679 = tpu.matmul %678, %670, %cst_269 {dimension_numbers = #tpu.dot_dimension_numbers<[1], [1], [0], [0], [0, 0, 1, 0], [], []>} : vector<16x32xf32>, vector<16x32xf32>, vector<16x16xf32> -> vector<16x16xf32>
    %680 = arith.addf %679, %461 : vector<16x16xf32>
    %cst_270 = arith.constant dense<0xFF800000> : vector<16xf32>
    %681 = vector.multi_reduction <maximumf>, %680, %cst_270 [1] : vector<16x16xf32> to vector<16xf32>
    %682 = vector.shape_cast %681 : vector<16xf32> to vector<16x1xf32>
    %683 = vector.broadcast %682 : vector<16x1xf32> to vector<16x16xf32>
    %684 = arith.subf %680, %683 : vector<16x16xf32>
    %685 = math.exp %684 : vector<16x16xf32>
    %cst_271 = arith.constant dense<0.000000e+00> : vector<16xf32>
    %686 = vector.multi_reduction <add>, %685, %cst_271 [1] : vector<16x16xf32> to vector<16xf32>
    %687 = vector.shape_cast %686 : vector<16xf32> to vector<16x1xf32>
    %688 = tpu.reciprocal %687 {approx = true} : vector<16x1xf32> -> vector<16x1xf32>
    %689 = vector.broadcast %688 : vector<16x1xf32> to vector<16x16xf32>
    %690 = arith.mulf %685, %689 : vector<16x16xf32>
    %691 = vector.broadcast %6 : vector<1x32xf32> to vector<16x32xf32>
    %692 = arith.mulf %676, %691 : vector<16x32xf32>
    %cst_272 = arith.constant dense<0.000000e+00> : vector<16x32xf32>
    %693 = tpu.matmul %690, %692, %cst_272 {dimension_numbers = #tpu.dot_dimension_numbers<[1], [0], [0], [1], [0, 0, 1, 1], [], []>} : vector<16x16xf32>, vector<16x32xf32>, vector<16x32xf32> -> vector<16x32xf32>
    %694 = vector.broadcast %12 : vector<1x32xf32> to vector<16x32xf32>
    %695 = arith.mulf %664, %694 : vector<16x32xf32>
    %cst_273 = arith.constant dense<0.000000e+00> : vector<16x16xf32>
    %696 = tpu.matmul %695, %670, %cst_273 {dimension_numbers = #tpu.dot_dimension_numbers<[1], [1], [0], [0], [0, 0, 1, 0], [], []>} : vector<16x32xf32>, vector<16x32xf32>, vector<16x16xf32> -> vector<16x16xf32>
    %697 = arith.addf %696, %461 : vector<16x16xf32>
    %cst_274 = arith.constant dense<0xFF800000> : vector<16xf32>
    %698 = vector.multi_reduction <maximumf>, %697, %cst_274 [1] : vector<16x16xf32> to vector<16xf32>
    %699 = vector.shape_cast %698 : vector<16xf32> to vector<16x1xf32>
    %700 = vector.broadcast %699 : vector<16x1xf32> to vector<16x16xf32>
    %701 = arith.subf %697, %700 : vector<16x16xf32>
    %702 = math.exp %701 : vector<16x16xf32>
    %cst_275 = arith.constant dense<0.000000e+00> : vector<16xf32>
    %703 = vector.multi_reduction <add>, %702, %cst_275 [1] : vector<16x16xf32> to vector<16xf32>
    %704 = vector.shape_cast %703 : vector<16xf32> to vector<16x1xf32>
    %705 = tpu.reciprocal %704 {approx = true} : vector<16x1xf32> -> vector<16x1xf32>
    %706 = vector.broadcast %705 : vector<16x1xf32> to vector<16x16xf32>
    %707 = arith.mulf %702, %706 : vector<16x16xf32>
    %708 = vector.broadcast %12 : vector<1x32xf32> to vector<16x32xf32>
    %709 = arith.mulf %676, %708 : vector<16x32xf32>
    %cst_276 = arith.constant dense<0.000000e+00> : vector<16x32xf32>
    %710 = tpu.matmul %707, %709, %cst_276 {dimension_numbers = #tpu.dot_dimension_numbers<[1], [0], [0], [1], [0, 0, 1, 1], [], []>} : vector<16x16xf32>, vector<16x32xf32>, vector<16x32xf32> -> vector<16x32xf32>
    %711 = arith.addf %693, %710 : vector<16x32xf32>
    %712 = vector.broadcast %18 : vector<1x32xf32> to vector<16x32xf32>
    %713 = arith.mulf %664, %712 : vector<16x32xf32>
    %cst_277 = arith.constant dense<0.000000e+00> : vector<16x16xf32>
    %714 = tpu.matmul %713, %670, %cst_277 {dimension_numbers = #tpu.dot_dimension_numbers<[1], [1], [0], [0], [0, 0, 1, 0], [], []>} : vector<16x32xf32>, vector<16x32xf32>, vector<16x16xf32> -> vector<16x16xf32>
    %715 = arith.addf %714, %461 : vector<16x16xf32>
    %cst_278 = arith.constant dense<0xFF800000> : vector<16xf32>
    %716 = vector.multi_reduction <maximumf>, %715, %cst_278 [1] : vector<16x16xf32> to vector<16xf32>
    %717 = vector.shape_cast %716 : vector<16xf32> to vector<16x1xf32>
    %718 = vector.broadcast %717 : vector<16x1xf32> to vector<16x16xf32>
    %719 = arith.subf %715, %718 : vector<16x16xf32>
    %720 = math.exp %719 : vector<16x16xf32>
    %cst_279 = arith.constant dense<0.000000e+00> : vector<16xf32>
    %721 = vector.multi_reduction <add>, %720, %cst_279 [1] : vector<16x16xf32> to vector<16xf32>
    %722 = vector.shape_cast %721 : vector<16xf32> to vector<16x1xf32>
    %723 = tpu.reciprocal %722 {approx = true} : vector<16x1xf32> -> vector<16x1xf32>
    %724 = vector.broadcast %723 : vector<16x1xf32> to vector<16x16xf32>
    %725 = arith.mulf %720, %724 : vector<16x16xf32>
    %726 = vector.broadcast %18 : vector<1x32xf32> to vector<16x32xf32>
    %727 = arith.mulf %676, %726 : vector<16x32xf32>
    %cst_280 = arith.constant dense<0.000000e+00> : vector<16x32xf32>
    %728 = tpu.matmul %725, %727, %cst_280 {dimension_numbers = #tpu.dot_dimension_numbers<[1], [0], [0], [1], [0, 0, 1, 1], [], []>} : vector<16x16xf32>, vector<16x32xf32>, vector<16x32xf32> -> vector<16x32xf32>
    %729 = arith.addf %711, %728 : vector<16x32xf32>
    %730 = vector.broadcast %24 : vector<1x32xf32> to vector<16x32xf32>
    %731 = arith.mulf %664, %730 : vector<16x32xf32>
    %cst_281 = arith.constant dense<0.000000e+00> : vector<16x16xf32>
    %732 = tpu.matmul %731, %670, %cst_281 {dimension_numbers = #tpu.dot_dimension_numbers<[1], [1], [0], [0], [0, 0, 1, 0], [], []>} : vector<16x32xf32>, vector<16x32xf32>, vector<16x16xf32> -> vector<16x16xf32>
    %733 = arith.addf %732, %461 : vector<16x16xf32>
    %cst_282 = arith.constant dense<0xFF800000> : vector<16xf32>
    %734 = vector.multi_reduction <maximumf>, %733, %cst_282 [1] : vector<16x16xf32> to vector<16xf32>
    %735 = vector.shape_cast %734 : vector<16xf32> to vector<16x1xf32>
    %736 = vector.broadcast %735 : vector<16x1xf32> to vector<16x16xf32>
    %737 = arith.subf %733, %736 : vector<16x16xf32>
    %738 = math.exp %737 : vector<16x16xf32>
    %cst_283 = arith.constant dense<0.000000e+00> : vector<16xf32>
    %739 = vector.multi_reduction <add>, %738, %cst_283 [1] : vector<16x16xf32> to vector<16xf32>
    %740 = vector.shape_cast %739 : vector<16xf32> to vector<16x1xf32>
    %741 = tpu.reciprocal %740 {approx = true} : vector<16x1xf32> -> vector<16x1xf32>
    %742 = vector.broadcast %741 : vector<16x1xf32> to vector<16x16xf32>
    %743 = arith.mulf %738, %742 : vector<16x16xf32>
    %744 = vector.broadcast %24 : vector<1x32xf32> to vector<16x32xf32>
    %745 = arith.mulf %676, %744 : vector<16x32xf32>
    %cst_284 = arith.constant dense<0.000000e+00> : vector<16x32xf32>
    %746 = tpu.matmul %743, %745, %cst_284 {dimension_numbers = #tpu.dot_dimension_numbers<[1], [0], [0], [1], [0, 0, 1, 1], [], []>} : vector<16x16xf32>, vector<16x32xf32>, vector<16x32xf32> -> vector<16x32xf32>
    %747 = arith.addf %729, %746 : vector<16x32xf32>
    %c15_285 = arith.constant 15 : index
    %c0_286 = arith.constant 0 : index
    %c0_287 = arith.constant 0 : index
    %748 = vector.load %arg5[%c15_285, %c0_286, %c0_287] : memref<16x32x32xbf16, #tpu.memory_space<vmem>>, vector<1x32x32xbf16>
    %749 = vector.shape_cast %748 : vector<1x32x32xbf16> to vector<32x32xbf16>
    %750 = arith.truncf %747 : vector<16x32xf32> to vector<16x32xbf16>
    %cst_288 = arith.constant dense<0.000000e+00> : vector<16x32xf32>
    %751 = tpu.matmul %750, %749, %cst_288 {dimension_numbers = #tpu.dot_dimension_numbers<[1], [0], [0], [1], [0, 0, 1, 1], [], []>} : vector<16x32xbf16>, vector<32x32xbf16>, vector<16x32xf32> -> vector<16x32xf32>
    %752 = arith.addf %629, %751 : vector<16x32xf32>
    %753 = vector.broadcast %635 : vector<1x32xf32> to vector<16x32xf32>
    %754 = arith.addf %752, %753 : vector<16x32xf32>
    %cst_289 = arith.constant dense<0.000000e+00> : vector<16xf32>
    %755 = vector.multi_reduction <add>, %754, %cst_289 [1] : vector<16x32xf32> to vector<16xf32>
    %756 = vector.shape_cast %755 : vector<16xf32> to vector<16x1xf32>
    %cst_290 = arith.constant 3.200000e+01 : f32
    %757 = vector.broadcast %cst_290 : f32 to vector<16x1xf32>
    %758 = arith.divf %756, %757 : vector<16x1xf32>
    %759 = vector.broadcast %758 : vector<16x1xf32> to vector<16x32xf32>
    %760 = arith.subf %754, %759 : vector<16x32xf32>
    %761 = arith.mulf %760, %760 : vector<16x32xf32>
    %cst_291 = arith.constant dense<0.000000e+00> : vector<16xf32>
    %762 = vector.multi_reduction <add>, %761, %cst_291 [1] : vector<16x32xf32> to vector<16xf32>
    %763 = vector.shape_cast %762 : vector<16xf32> to vector<16x1xf32>
    %cst_292 = arith.constant 3.200000e+01 : f32
    %764 = vector.broadcast %cst_292 : f32 to vector<16x1xf32>
    %765 = arith.divf %763, %764 : vector<16x1xf32>
    %cst_293 = arith.constant 9.99999974E-6 : f32
    %766 = vector.broadcast %cst_293 : f32 to vector<16x1xf32>
    %767 = arith.addf %765, %766 : vector<16x1xf32>
    %768 = math.rsqrt %767 : vector<16x1xf32>
    %769 = vector.broadcast %768 : vector<16x1xf32> to vector<16x32xf32>
    %770 = arith.mulf %760, %769 : vector<16x32xf32>
    %771 = vector.broadcast %636 : vector<1x32xf32> to vector<16x32xf32>
    %772 = arith.mulf %770, %771 : vector<16x32xf32>
    %773 = vector.broadcast %637 : vector<1x32xf32> to vector<16x32xf32>
    %774 = arith.addf %772, %773 : vector<16x32xf32>
    %c3_294 = arith.constant 3 : index
    %c0_295 = arith.constant 0 : index
    %c0_296 = arith.constant 0 : index
    %775 = vector.load %arg6[%c3_294, %c0_295, %c0_296] : memref<4x32x128xbf16, #tpu.memory_space<vmem>>, vector<1x32x128xbf16>
    %776 = vector.shape_cast %775 : vector<1x32x128xbf16> to vector<32x128xbf16>
    %777 = arith.truncf %774 : vector<16x32xf32> to vector<16x32xbf16>
    %cst_297 = arith.constant dense<0.000000e+00> : vector<16x128xf32>
    %778 = tpu.matmul %777, %776, %cst_297 {dimension_numbers = #tpu.dot_dimension_numbers<[1], [0], [0], [1], [0, 0, 1, 1], [], []>} : vector<16x32xbf16>, vector<32x128xbf16>, vector<16x128xf32> -> vector<16x128xf32>
    %c3_298 = arith.constant 3 : index
    %c0_299 = arith.constant 0 : index
    %c0_300 = arith.constant 0 : index
    %779 = vector.load %arg9[%c3_298, %c0_299, %c0_300] : memref<4x1x128xf32, #tpu.memory_space<vmem>>, vector<1x1x128xf32>
    %780 = vector.shape_cast %779 : vector<1x1x128xf32> to vector<1x128xf32>
    %781 = vector.broadcast %780 : vector<1x128xf32> to vector<16x128xf32>
    %782 = arith.addf %778, %781 : vector<16x128xf32>
    %cst_301 = arith.constant 5.000000e-01 : f32
    %783 = vector.broadcast %cst_301 : f32 to vector<16x128xf32>
    %784 = arith.mulf %783, %782 : vector<16x128xf32>
    %cst_302 = arith.constant 0.707106769 : f32
    %785 = vector.broadcast %cst_302 : f32 to vector<16x128xf32>
    %786 = arith.mulf %782, %785 : vector<16x128xf32>
    %787 = math.erf %786 : vector<16x128xf32>
    %cst_303 = arith.constant 1.000000e+00 : f32
    %788 = vector.broadcast %cst_303 : f32 to vector<16x128xf32>
    %789 = arith.addf %788, %787 : vector<16x128xf32>
    %790 = arith.mulf %784, %789 : vector<16x128xf32>
    %c3_304 = arith.constant 3 : index
    %c0_305 = arith.constant 0 : index
    %c0_306 = arith.constant 0 : index
    %791 = vector.load %arg7[%c3_304, %c0_305, %c0_306] : memref<4x128x32xbf16, #tpu.memory_space<vmem>>, vector<1x128x32xbf16>
    %792 = vector.shape_cast %791 : vector<1x128x32xbf16> to vector<128x32xbf16>
    %793 = arith.truncf %790 : vector<16x128xf32> to vector<16x128xbf16>
    %cst_307 = arith.constant dense<0.000000e+00> : vector<16x32xf32>
    %794 = tpu.matmul %793, %792, %cst_307 {dimension_numbers = #tpu.dot_dimension_numbers<[1], [0], [0], [1], [0, 0, 1, 1], [], []>} : vector<16x128xbf16>, vector<128x32xbf16>, vector<16x32xf32> -> vector<16x32xf32>
    %795 = arith.addf %754, %794 : vector<16x32xf32>
    %796 = vector.broadcast %638 : vector<1x32xf32> to vector<16x32xf32>
    %797 = arith.addf %795, %796 : vector<16x32xf32>
    %c4_308 = arith.constant 4 : index
    %c0_309 = arith.constant 0 : index
    %798 = vector.load %arg4[%c4_308, %c0_309] : memref<6x32xf32, #tpu.memory_space<vmem>>, vector<1x32xf32>
    %c5_310 = arith.constant 5 : index
    %c0_311 = arith.constant 0 : index
    %799 = vector.load %arg4[%c5_310, %c0_311] : memref<6x32xf32, #tpu.memory_space<vmem>>, vector<1x32xf32>
    %cst_312 = arith.constant dense<0.000000e+00> : vector<16xf32>
    %800 = vector.multi_reduction <add>, %797, %cst_312 [1] : vector<16x32xf32> to vector<16xf32>
    %801 = vector.shape_cast %800 : vector<16xf32> to vector<16x1xf32>
    %cst_313 = arith.constant 3.200000e+01 : f32
    %802 = vector.broadcast %cst_313 : f32 to vector<16x1xf32>
    %803 = arith.divf %801, %802 : vector<16x1xf32>
    %804 = vector.broadcast %803 : vector<16x1xf32> to vector<16x32xf32>
    %805 = arith.subf %797, %804 : vector<16x32xf32>
    %806 = arith.mulf %805, %805 : vector<16x32xf32>
    %cst_314 = arith.constant dense<0.000000e+00> : vector<16xf32>
    %807 = vector.multi_reduction <add>, %806, %cst_314 [1] : vector<16x32xf32> to vector<16xf32>
    %808 = vector.shape_cast %807 : vector<16xf32> to vector<16x1xf32>
    %cst_315 = arith.constant 3.200000e+01 : f32
    %809 = vector.broadcast %cst_315 : f32 to vector<16x1xf32>
    %810 = arith.divf %808, %809 : vector<16x1xf32>
    %cst_316 = arith.constant 9.99999974E-6 : f32
    %811 = vector.broadcast %cst_316 : f32 to vector<16x1xf32>
    %812 = arith.addf %810, %811 : vector<16x1xf32>
    %813 = math.rsqrt %812 : vector<16x1xf32>
    %814 = vector.broadcast %813 : vector<16x1xf32> to vector<16x32xf32>
    %815 = arith.mulf %805, %814 : vector<16x32xf32>
    %816 = vector.broadcast %798 : vector<1x32xf32> to vector<16x32xf32>
    %817 = arith.mulf %815, %816 : vector<16x32xf32>
    %818 = vector.broadcast %799 : vector<1x32xf32> to vector<16x32xf32>
    %819 = arith.addf %817, %818 : vector<16x32xf32>
    %c0_317 = arith.constant 0 : index
    %c0_318 = arith.constant 0 : index
    %820 = vector.load %arg11[%c0_317, %c0_318] : memref<2x16xf32, #tpu.memory_space<vmem>>, vector<2x16xf32>
    %cst_319 = arith.constant dense<0.000000e+00> : vector<2x32xf32>
    %821 = tpu.matmul %820, %819, %cst_319 {dimension_numbers = #tpu.dot_dimension_numbers<[1], [0], [0], [1], [0, 0, 1, 1], [], []>} : vector<2x16xf32>, vector<16x32xf32>, vector<2x32xf32> -> vector<2x32xf32>
    %c1_320 = arith.constant 1 : index
    %c0_321 = arith.constant 0 : index
    %c0_322 = arith.constant 0 : index
    %822 = vector.load %arg10[%c1_320, %c0_321, %c0_322] : memref<2x32x128xbf16, #tpu.memory_space<vmem>>, vector<1x32x128xbf16>
    %823 = vector.shape_cast %822 : vector<1x32x128xbf16> to vector<32x128xbf16>
    %824 = arith.truncf %821 : vector<2x32xf32> to vector<2x32xbf16>
    %cst_323 = arith.constant dense<0.000000e+00> : vector<2x128xf32>
    %825 = tpu.matmul %824, %823, %cst_323 {dimension_numbers = #tpu.dot_dimension_numbers<[1], [0], [0], [1], [0, 0, 1, 1], [], []>} : vector<2x32xbf16>, vector<32x128xbf16>, vector<2x128xf32> -> vector<2x128xf32>
    %826 = arith.mulf %825, %825 : vector<2x128xf32>
    %cst_324 = arith.constant dense<0.000000e+00> : vector<2xf32>
    %827 = vector.multi_reduction <add>, %826, %cst_324 [1] : vector<2x128xf32> to vector<2xf32>
    %828 = vector.shape_cast %827 : vector<2xf32> to vector<2x1xf32>
    %829 = math.sqrt %828 : vector<2x1xf32>
    %cst_325 = arith.constant 9.99999996E-13 : f32
    %830 = vector.broadcast %cst_325 : f32 to vector<2x1xf32>
    %831 = arith.maximumf %829, %830 : vector<2x1xf32>
    %832 = vector.broadcast %831 : vector<2x1xf32> to vector<2x128xf32>
    %833 = arith.divf %825, %832 : vector<2x128xf32>
    %834 = tpu.concatenate %444, %833 in 0 : vector<2x128xf32>, vector<2x128xf32> -> vector<4x128xf32>
    %cst_326 = arith.constant 0.000000e+00 : f32
    %835 = vector.broadcast %cst_326 : f32 to vector<4x128xf32>
    %836 = tpu.concatenate %834, %835 in 0 : vector<4x128xf32>, vector<4x128xf32> -> vector<8x128xf32>
    %c0_327 = arith.constant 0 : index
    %c0_328 = arith.constant 0 : index
    %837 = vector.load %arg12[%c0_327, %c0_328] : memref<8x128xf32, #tpu.memory_space<vmem>>, vector<8x128xf32>
    tpu.vector_store %arg12[%c0_327, %c0_328], %836 {strides = array<i32>} : memref<8x128xf32, #tpu.memory_space<vmem>>, vector<8x128xf32>,
    return
  }
  func.func @transform_0(%arg0: i32) -> (i32, i32) {
    %c0_i32 = arith.constant 0 : i32
    %c0_i32_0 = arith.constant 0 : i32
    %c0_i32_1 = arith.constant 0 : i32
    return %c0_i32, %c0_i32_0 : i32, i32
  }
  func.func @transform_1(%arg0: i32) -> (i32, i32) {
    %c0_i32 = arith.constant 0 : i32
    %c0_i32_0 = arith.constant 0 : i32
    %c0_i32_1 = arith.constant 0 : i32
    return %c0_i32, %c0_i32_0 : i32, i32
  }
  func.func @transform_2(%arg0: i32) -> (i32, i32) {
    %c0_i32 = arith.constant 0 : i32
    %c0_i32_0 = arith.constant 0 : i32
    %c0_i32_1 = arith.constant 0 : i32
    return %c0_i32, %c0_i32_0 : i32, i32
  }
  func.func @transform_3(%arg0: i32) -> (i32, i32) {
    %c0_i32 = arith.constant 0 : i32
    %c0_i32_0 = arith.constant 0 : i32
    %c0_i32_1 = arith.constant 0 : i32
    return %c0_i32, %c0_i32_0 : i32, i32
  }
  func.func @transform_4(%arg0: i32) -> (i32, i32, i32) {
    %c0_i32 = arith.constant 0 : i32
    %c0_i32_0 = arith.constant 0 : i32
    %c0_i32_1 = arith.constant 0 : i32
    %c0_i32_2 = arith.constant 0 : i32
    return %c0_i32, %c0_i32_0, %c0_i32_1 : i32, i32, i32
  }
  func.func @transform_5(%arg0: i32) -> (i32, i32, i32) {
    %c0_i32 = arith.constant 0 : i32
    %c0_i32_0 = arith.constant 0 : i32
    %c0_i32_1 = arith.constant 0 : i32
    %c0_i32_2 = arith.constant 0 : i32
    return %c0_i32, %c0_i32_0, %c0_i32_1 : i32, i32, i32
  }
  func.func @transform_6(%arg0: i32) -> (i32, i32, i32) {
    %c0_i32 = arith.constant 0 : i32
    %c0_i32_0 = arith.constant 0 : i32
    %c0_i32_1 = arith.constant 0 : i32
    %c0_i32_2 = arith.constant 0 : i32
    return %c0_i32, %c0_i32_0, %c0_i32_1 : i32, i32, i32
  }
  func.func @transform_7(%arg0: i32) -> (i32, i32) {
    %c0_i32 = arith.constant 0 : i32
    %c0_i32_0 = arith.constant 0 : i32
    %c0_i32_1 = arith.constant 0 : i32
    return %c0_i32, %c0_i32_0 : i32, i32
  }
  func.func @transform_8(%arg0: i32) -> (i32, i32, i32) {
    %c0_i32 = arith.constant 0 : i32
    %c0_i32_0 = arith.constant 0 : i32
    %c0_i32_1 = arith.constant 0 : i32
    %c0_i32_2 = arith.constant 0 : i32
    return %c0_i32, %c0_i32_0, %c0_i32_1 : i32, i32, i32
  }
  func.func @transform_9(%arg0: i32) -> (i32, i32, i32) {
    %c0_i32 = arith.constant 0 : i32
    %c0_i32_0 = arith.constant 0 : i32
    %c0_i32_1 = arith.constant 0 : i32
    %c0_i32_2 = arith.constant 0 : i32
    return %c0_i32, %c0_i32_0, %c0_i32_1 : i32, i32, i32
  }
  func.func @transform_10(%arg0: i32) -> (i32, i32) {
    %c0_i32 = arith.constant 0 : i32
    %c0_i32_0 = arith.constant 0 : i32
    %c0_i32_1 = arith.constant 0 : i32
    return %c0_i32, %c0_i32_0 : i32, i32
  }
  func.func @transform_11(%arg0: i32) -> (i32, i32) {
    %c0_i32 = arith.constant 0 : i32
    %c0_i32_0 = arith.constant 0 : i32
    %c0_i32_1 = arith.constant 0 : i32
    return %c0_i32, %c0_i32_0 : i32, i32
  }
}

</mosaic_0001>

<bundles_post_ra>
// kernel: clip_wrapper_forward.1
= control target key start
LH: loop header
LB: loop body
LE: loop exit
PB: predicated region body
PF: predicated region fallthrough
CT: control target
= control target key end

     0   :  { %v7473_v0 = vmov 0   ;;  %vm163_vm0 = vcmask 523264   ;;  %vm212_vm1 = vcmask 261120   ;;  %v7474_v63 = vmov 0.0   ;;  %s8709_s1 = inlined_call_operand.vmem [shape: bf16[192,32], index: 1, kind: input, shape index: {}]   ;;  %s8710_s0 = inlined_call_operand.vmem [shape: bf16[16,192], index: 0, kind: input, shape index: {}]   ;;  %s8711_s2 = inlined_call_operand.vmem [shape: f32[32,32], index: 2, kind: input, shape index: {}]   ;;  %s8712_s3 = inlined_call_operand.vmem [shape: f32[6,32], index: 3, kind: input, shape index: {}]   ;;  %s8713_s4 = inlined_call_operand.vmem [shape: bf16[16,32,32], index: 4, kind: input, shape index: {}]   ;;  %s8714_s7 = inlined_call_operand.vmem [shape: f32[36,32], index: 7, kind: input, shape index: {}]   ;;  %s8715_s5 = inlined_call_operand.vmem [shape: bf16[4,32,128], index: 5, kind: input, shape index: {}]   ;;  %s8716_s6 = inlined_call_operand.vmem [shape: bf16[4,128,32], index: 6, kind: input, shape index: {}]   ;;  %s8717_s8 = inlined_call_operand.vmem [shape: f32[4,1,128], index: 8, kind: input, shape index: {}]   ;;  %s8718_s9 = inlined_call_operand.vmem [shape: bf16[2,32,128], index: 9, kind: input, shape index: {}]   ;;  %s8719_s10 = inlined_call_operand.vmem [shape: f32[2,16], index: 10, kind: input, shape index: {}]   ;;  %s8720_s11 = inlined_call_operand.vmem [shape: f32[8,128], index: 11, kind: output, shape index: {}]  }
   0x1   :  { %167 = vmatprep.subr.bf16.mxu0 %v7473_v0  ;;  %v7186_v1 = vld [vmem:[%s8709_s1] sm:$0xff]   ;;  %v7187_v2 = vld [vmem:[%s8709_s1 + $0x8] sm:$0xff]   ;;  %v7188_v3 = vld [vmem:[%s8709_s1 + $0x10] sm:$0xff]   ;;  %6497 = vmatprep.subr.bf16.mxu1 %v7474_v63  ;;  %vm7475_vm2 = vmmov 0   ;;  %vm590_vm13 = vcmask 130048  }
   0x2   :  { %168 = vmatpush1.bf16.msra.mxu0 %v7186_v1  ;;  %v7189_v4 = vld [vmem:[%s8709_s1 + $0x18] sm:$0xff]   ;;  %v7200_v5 = vld [vmem:[%s8710_s0 + $0x4] ss:$8 sps:$4 sm:$0xff]   ;;  %v7192_v8 = vld [vmem:[%s8709_s1 + $0x30] sm:$0xff]   ;;  %6501 = vmatprep.mubr.msk.bf16.mxu1 %vm7475_vm2, %v7474_v63 }
   0x3   :  { %169 = vmatprep.subr.bf16.mxu0 %v7473_v0  ;;  %v7190_v6 = vld [vmem:[%s8709_s1 + $0x20] sm:$0xff]   ;;  %5890 = vmatprep.mubr.msk.bf16.mxu0 %vm163_vm0, %v7200_v5  ;;  %v7191_v7 = vld [vmem:[%s8709_s1 + $0x28] sm:$0xff]   ;;  %v7193_v9 = vld [vmem:[%s8709_s1 + $0x38] sm:$0xff]  }
   0x4   :  { %v7194_v10 = vld [vmem:[%s8709_s1 + $0x40] sm:$0xff]   ;;  %v7195_v11 = vld [vmem:[%s8709_s1 + $0x48] sm:$0xff]   ;;  %v7196_v12 = vld [vmem:[%s8709_s1 + $0x50] sm:$0xff]  }
   0x5   :  { %v7197_v13 = vld [vmem:[%s8709_s1 + $0x58] sm:$0xff]   ;;  %v7198_v14 = vld [vmem:[%s8710_s0] ss:$8 sps:$4 sm:$0xff]   ;;  %vm7672_vm4 = vmpackc.low %vm212_vm1, %vm212_vm1 }
   0x6   :  { %170 = vmatpush1.bf16.msra.mxu0 %v7187_v2  ;;  %v54_v15 = vld [vmem:[%s8711_s2] sm:$0xff]  ;;  %v55_v17 = vld [vmem:[%s8711_s2 + $0x8] sm:$0xff] }
   0x7   :  { %171 = vmatprep.subr.bf16.mxu0 %v7473_v0  ;;  %v5891_v42 = vld [vmem:[%s8712_s3] ss:$0 sm:$0xff]  ;;  %v5892_v44 = vld [vmem:[%s8712_s3 + $0x1] ss:$0 sm:$0xff]  ;;  %v7202_v1 = vld [vmem:[%s8713_s4 + $0x8] sm:$0xff]  }
   0xa   :  { %172 = vmatpush1.bf16.msra.mxu0 %v7188_v3 }
   0xb   :  { %173 = vmatprep.subr.bf16.mxu0 %v7473_v0 }
   0xe   :  { %174 = vmatpush1.bf16.msra.mxu0 %v7189_v4 }
   0xf   :  { %175 = vmatprep.subr.bf16.mxu0 %v7473_v0 }
  0x12   :  { %176 = vmatpush1.bf16.msra.mxu0 %v7190_v6 }
  0x13   :  { %177 = vmatprep.subr.bf16.mxu0 %v7473_v0 }
  0x16   :  { %178 = vmatpush1.bf16.msra.mxu0 %v7191_v7 }
  0x17   :  { %179 = vmatprep.subr.bf16.mxu0 %v7473_v0 }
  0x1a   :  { %180 = vmatpush1.bf16.msra.mxu0 %v7192_v8 }
  0x1b   :  { %181 = vmatprep.subr.bf16.mxu0 %v7473_v0 }
  0x1e   :  { %182 = vmatpush1.bf16.msra.mxu0 %v7193_v9 }
  0x1f   :  { %183 = vmatprep.subr.bf16.mxu0 %v7473_v0 }
  0x22   :  { %184 = vmatpush1.bf16.msra.mxu0 %v7194_v10  ;;  %v5893_v10 = vld [vmem:[%s8714_s7] ss:$0 sm:$0xff] }
  0x23   :  { %185 = vmatprep.subr.bf16.mxu0 %v7473_v0 }
  0x26   :  { %186 = vmatpush1.bf16.msra.mxu0 %v7195_v11 }
  0x27   :  { %187 = vmatprep.subr.bf16.mxu0 %v7473_v0 }
  0x2a   :  { %188 = vmatpush1.bf16.msra.mxu0 %v7196_v12 }
  0x2b   :  { %189 = vmatprep.subr.bf16.mxu0 %v7473_v0  ;;  %v7201_v0 = vld [vmem:[%s8713_s4] sm:$0xff]  }
  0x2c   :  { %6498 = vmatpush3.bf16.msra.mxu1 %v7201_v0 }
  0x2d   :  { %6499 = vmatprep.subr.bf16.mxu1 %v7474_v63 }
  0x2e   :  { %190 = vmatpush1.bf16.msra.mxu0 %v7197_v13 }
  0x2f   :  { %6577 = vmatprep.subr.bf16.mxu0 %v7474_v63 }
  0x30   :  { %6500 = vmatpush3.bf16.msra.mxu1 %v7202_v1 }
  0x31   :  { %200 = vmatmul.mubr.bf16.vlgmr.msra.gmra.mrb[0].mxu0 %v7198_v14  ;;  %6505 = vmatprep.subr.bf16.mxu1 %v7474_v63  ;;  %v5894_v14 = vld [vmem:[%s8714_s7 + $0x1] ss:$0 sm:$0xff] }
  0x32   :  { %6581 = vmatprep.mubr.msk.bf16.mxu0 %vm7475_vm2, %v7474_v63 }
 0x104   :  { %v201_v16 = vpop.f32.mrb[0].mxu0 }
 0x105   :  { %v208_v18 = vadd.f32 %v201_v16, %v54_v15  ;;  %v203_v19 = vpop.f32.mrb[1].mxu0 }
 0x106   :  { %v204_v20 = vpop.f32.mrb[2].mxu0 }
 0x107   :  { %v209_v21 = vadd.f32 %v204_v20, %v55_v17  ;;  %v206_v22 = vpop.f32.mrb[3].mxu0  ;;  %v213_v23 = vsel %vm212_vm1, %v208_v18, 0.0  ;;  %v7204_v20 = vld [vmem:[%s8713_s4 + $0x18] sm:$0xff]  }
 0x108   :  { %214 = vadd.xlane.f32.xlu0 %v213_v23  ;;  %v7206_v22 = vld [vmem:[%s8713_s4 + $0x28] sm:$0xff]   ;;  %v39_v23 = vlaneseq }
 0x109   :  { %v216_v24 = vsel %vm212_vm1, %v209_v21, 0.0 }
 0x10c   :  { %217 = vadd.xlane.f32.xlu0 %v216_v24  ;;  %v7650_v24 = vand.u32 127, %v39_v23 }
 0x195   :  { %v215_v25 = vpop.xlane.xlu0 %214 }
 0x196   :  { %v220_v26 = vmul.f32 0.03125, %v215_v25  ;;  %v7653_v25 = vshra.s32 %v7650_v24, 3 }
 0x198   :  { %v222_v27 = vsub.f32 %v208_v18, %v220_v26  ;;  %v7203_v18 = vld [vmem:[%s8713_s4 + $0x10] sm:$0xff]   ;;  %vm42_vm3 = vcmp.eq.s32.totalorder %v7653_v25, 0  ;;  %v5895_v26 = vld [vmem:[%s8714_s7 + $0x2] ss:$0 sm:$0xff]  ;;  %vm45_vm5 = vcmp.eq.s32.totalorder %v7653_v25, 1  ;;  %vm48_vm6 = vcmp.eq.s32.totalorder %v7653_v25, 2 }
 0x199   :  { %v218_v28 = vpop.xlane.xlu0 %217  ;;  %vm51_vm7 = vcmp.eq.s32.totalorder %v7653_v25, 3 }
 0x19a   :  { %v221_v29 = vmul.f32 0.03125, %v218_v28  ;;  %v224_v30 = vmul.f32 %v222_v27, %v222_v27  ;;  %v7660_v28 = vsel %vm42_vm3, 1.0, %v7474_v63 }
 0x19c   :  { %v223_v31 = vsub.f32 %v209_v21, %v221_v29  ;;  %v226_v32 = vsel %vm212_vm1, %v224_v30, 0.0  ;;  %v7205_v21 = vld [vmem:[%s8713_s4 + $0x20] sm:$0xff]  }
 0x19d   :  { %227 = vadd.xlane.f32.xlu1 %v226_v32 }
 0x19e   :  { %v225_v33 = vmul.f32 %v223_v31, %v223_v31 }
 0x1a0   :  { %v229_v34 = vsel %vm212_vm1, %v225_v33, 0.0 }
 0x1a1   :  { %230 = vadd.xlane.f32.xlu1 %v229_v34  ;;  %v5903_v34 = vld [vmem:[%s8714_s7 + $0x3] ss:$0 sm:$0xff] }
 0x22a   :  { %v228_v35 = vpop.xlane.xlu1 %227 }
 0x22b   :  { %v232_v36 = vmul.f32 0.03125, %v228_v35 }
 0x22d   :  { %v234_v37 = vadd.f32 1e-05, %v232_v36 }
 0x22e   :  { %v231_v38 = vpop.xlane.xlu1 %230 }
 0x22f   :  { %7277 = vrsqrt.f32 %v234_v37  ;;  %v233_v39 = vmul.f32 0.03125, %v231_v38 }
 0x231   :  { %v235_v40 = vadd.f32 1e-05, %v233_v39 }
 0x233   :  { %7279 = vrsqrt.f32 %v235_v40 }
 0x239   :  { %v7278_v41 = vpop.eup %7277 }
 0x23a   :  { %v238_v43 = vmul.f32 %v7278_v41, %v222_v27 }
 0x23c   :  { %v244_v45 = vmul.f32 %v5891_v42, %v238_v43  ;;  %v5911_v43 = vld [vmem:[%s8714_s7 + $0x4] ss:$0 sm:$0xff] }
 0x23d   :  { %v7280_v46 = vpop.eup %7279 }
 0x23e   :  { %v7596_v47 = vadd.f32 %v5892_v44, %v244_v45  ;;  %v239_v48 = vmul.f32 %v7280_v46, %v223_v31 }
 0x240   :  { %v274_v49 = vsel %vm212_vm1, %v7596_v47, 0.0  ;;  %v245_v50 = vmul.f32 %v5891_v42, %v239_v48 }
 0x241   :  { %275 = vadd.xlane.f32.xlu0 %v274_v49  ;;  %v7696_v49 = vsel %vm45_vm5, 1.0, %v7474_v63 }
 0x242   :  { %v7600_v51 = vadd.f32 %v5892_v44, %v245_v50 }
 0x244   :  { %v277_v52 = vsel %vm212_vm1, %v7600_v51, 0.0 }
 0x245   :  { %278 = vadd.xlane.f32.xlu1 %v277_v52  ;;  %v7699_v52 = vsel %vm48_vm6, 1.0, %v7474_v63 }
 0x2ce   :  { %v276_v53 = vpop.xlane.xlu0 %275 }
 0x2cf   :  { %v280_v54 = vmul.f32 0.03125, %v276_v53  ;;  %v7702_v53 = vsel %vm51_vm7, 1.0, %v7474_v63 }
 0x2d1   :  { %v282_v55 = vsub.f32 %v7596_v47, %v280_v54 }
 0x2d2   :  { %v279_v56 = vpop.xlane.xlu1 %278 }
 0x2d3   :  { %v281_v57 = vmul.f32 0.03125, %v279_v56  ;;  %v284_v58 = vmul.f32 %v282_v55, %v282_v55 }
 0x2d5   :  { %v283_v59 = vsub.f32 %v7600_v51, %v281_v57  ;;  %v286_v60 = vsel %vm212_vm1, %v284_v58, 0.0 }
 0x2d6   :  { %287 = vadd.xlane.f32.xlu0 %v286_v60 }
 0x2d7   :  { %v285_v61 = vmul.f32 %v283_v59, %v283_v59 }
 0x2d9   :  { %v289_v62 = vsel %vm212_vm1, %v285_v61, 0.0 }
 0x2da   :  { %290 = vadd.xlane.f32.xlu1 %v289_v62 }
 0x363   :  { %v288_v2 = vpop.xlane.xlu0 %287 }
 0x364   :  { %v292_v3 = vmul.f32 0.03125, %v288_v2 }
 0x366   :  { %v294_v4 = vadd.f32 1e-05, %v292_v3 }
 0x367   :  { %v291_v5 = vpop.xlane.xlu1 %290 }
 0x368   :  { %7281 = vrsqrt.f32 %v294_v4  ;;  %v293_v6 = vmul.f32 0.03125, %v291_v5 }
 0x36a   :  { %v295_v7 = vadd.f32 1e-05, %v293_v6 }
 0x36c   :  { %7283 = vrsqrt.f32 %v295_v7 }
 0x372   :  { %v7282_v8 = vpop.eup %7281 }
 0x373   :  { %v298_v9 = vmul.f32 %v7282_v8, %v282_v55  ;;  %v7731_v8 = vshrl.u32 %v39_v23, 7 }
 0x375   :  { %v304_v13 = vmul.f32 %v5893_v10, %v298_v9  ;;  %v7734_v9 = vadd.s32 8, %v7731_v8 }
 0x376   :  { %v7284_v11 = vpop.eup %7283 }
 0x377   :  { %v299_v12 = vmul.f32 %v7284_v11, %v283_v59  ;;  %v310_v16 = vadd.f32 %v5894_v14, %v304_v13  ;;  %v7738_v11 = vand.u32 7, %v7650_v24 }
 0x379   :  { %v305_v15 = vmul.f32 %v5893_v10, %v299_v12  ;;  %v256_v10 = vshra.s32 %v7734_v9, 3  ;;  %v255_v12 = vshra.s32 %v7731_v8, 3  ;;  %vm260_vm9 = vcmp.lt.s32.totalorder %v7738_v11, 7 }
 0x37b   :  { %v311_v17 = vadd.f32 %v5894_v14, %v305_v15  ;;  %vm7742_vm8 = vcmp.eq.s32.totalorder %v256_v10, %v7653_v25  ;;  %vm7748_vm10 = vcmp.eq.s32.totalorder %v255_v12, %v7653_v25 }
 0x37c   :  { %vm262_vm11 = vmand %vm7742_vm8, %vm260_vm9 }
 0x37d   :  { %v316_v19 = vpack.c.bf16 %v311_v17, %v310_v16  ;;  %vm261_vm12 = vmand %vm7748_vm10, %vm260_vm9  ;;  %v7476_v17 = vmov -1e+30  }
 0x37f   :  { %6502 = vmatmul.mubr.msk.bf16.vlgmr.msra.gmra.mrb[0].mxu1 %vm212_vm1, %v316_v19 }
 0x380   :  { %6506 = vmatpush3.bf16.msra.mxu1 %v7203_v18  ;;  %6509 = vmatprep.mubr.msk.bf16.mxu1 %vm7475_vm2, %v7474_v63  ;;  %v7757_v18 = vsel %vm262_vm11, 0.0, %v7476_v17 }
 0x381   :  { %6507 = vmatprep.subr.bf16.mxu1 %v7474_v63 }
 0x384   :  { %6508 = vmatpush3.bf16.msra.mxu1 %v7204_v20  ;;  %v7760_v20 = vsel %vm261_vm12, 0.0, %v7476_v17 }
 0x385   :  { %6513 = vmatprep.subr.bf16.mxu1 %v7474_v63 }
 0x387   :  { %6510 = vmatmul.mubr.msk.bf16.vlgmr.msra.gmra.mrb[4].mxu1 %vm212_vm1, %v316_v19 }
 0x388   :  { %6514 = vmatpush3.bf16.msra.mxu1 %v7205_v21  ;;  %6517 = vmatprep.mubr.msk.bf16.mxu1 %vm7475_vm2, %v7474_v63 }
 0x389   :  { %6515 = vmatprep.subr.bf16.mxu1 %v7474_v63 }
 0x38c   :  { %6516 = vmatpush3.bf16.msra.mxu1 %v7206_v22 }
 0x38f   :  { %6518 = vmatmul.mubr.msk.bf16.vlgmr.msra.gmra.mrb[8].mxu1 %vm212_vm1, %v316_v19 }
 0x452   :  { %v370_v27 = vpop.f32.mrb[0].mxu1 }
 0x453   :  { %v7662_v29 = vadd.f32 %v5895_v26, %v370_v27  ;;  %v6503_v30 = vpop.f32.mrb[1].mxu1 }
 0x454   :  { %v373_v31 = vpop.f32.mrb[2].mxu1 }
 0x455   :  { %v6504_v32 = vpop.f32.mrb[3].mxu1  ;;  %v501_v33 = vmul.f32 %v7660_v28, %v7662_v29  ;;  %v7682_v44 = vadd.f32 %v5895_v26, %v373_v31  ;;  %v615_v2 = vmul.f32 %v7696_v49, %v7662_v29 }
 0x457   :  { %6525 = vmatprep.mubr.msk.f32.mxu1 %vm212_vm1, %v501_v33  ;;  %v502_v54 = vmul.f32 %v7660_v28, %v7682_v44  ;;  %v616_v7 = vmul.f32 %v7696_v49, %v7682_v44 }
 0x45a   :  { %v432_v35 = vpop.f32.mrb[4].mxu1 }
 0x45b   :  { %v6511_v36 = vpop.f32.mrb[5].mxu1  ;;  %v433_v38 = vadd.f32 %v5903_v34, %v432_v35 }
 0x45c   :  { %v435_v37 = vpop.f32.mrb[6].mxu1 }
 0x45d   :  { %v436_v39 = vadd.f32 %v5903_v34, %v435_v37  ;;  %v6512_v40 = vpop.f32.mrb[7].mxu1 }
 0x45f   :  { %v7676_v42 = vpack.c.bf16 %v436_v39, %v433_v38 }
 0x461   :  { %6993 = vmatprep.subr.msk.bf16.mxu1 %vm7672_vm4, %v7676_v42 }
 0x462   :  { %v494_v45 = vpop.f32.mrb[8].mxu1  ;;  %6996 = vmatpush3.bf16.xpose.msk.msra.mxu1 %vm7672_vm4, %v7676_v42 }
 0x463   :  { %v495_v46 = vadd.f32 %v5911_v43, %v494_v45  ;;  %v6519_v48 = vpop.f32.mrb[9].mxu1  ;;  %6999 = vmatprep.subr.msk.bf16.mxu1 %vm7672_vm4, %v7676_v42 }
 0x464   :  { %v497_v50 = vpop.f32.mrb[10].mxu1 }
 0x465   :  { %v498_v55 = vadd.f32 %v5911_v43, %v497_v50  ;;  %v6520_v56 = vpop.f32.mrb[11].mxu1  ;;  %v720_v57 = vmul.f32 %v7696_v49, %v495_v46  ;;  %v613_v58 = vmul.f32 %v7660_v28, %v495_v46  ;;  %v989_v59 = vmul.f32 %v7699_v52, %v495_v46 }
 0x466   :  { %v1179_v60 = vmul.f32 %v7702_v53, %v495_v46 }
 0x467   :  { %v721_v61 = vmul.f32 %v7696_v49, %v498_v55  ;;  %v614_v62 = vmul.f32 %v7660_v28, %v498_v55  ;;  %v990_v0 = vmul.f32 %v7699_v52, %v498_v55  ;;  %v1180_v1 = vmul.f32 %v7702_v53, %v498_v55 }
 0x469   :  { %6526 = vmatmul.mubr.msk.f32.vlgmr.msra.gmra.mrb[12].mxu1 %vm212_vm1, %v502_v54  ;;  %v7003_v3 = vpack.c.bf16 %v721_v61, %v720_v57  ;;  %v7717_v4 = vpack.c.bf16 %v614_v62, %v613_v58  ;;  %v7719_v5 = vpack.c.bf16 %v990_v0, %v989_v59  ;;  %v7721_v6 = vpack.c.bf16 %v1180_v1, %v1179_v60 }
 0x46a   :  { %7002 = vmatpush3.bf16.xpose.msk.msra.mxu1 %vm7672_vm4, %v7676_v42  ;;  %6532 = vmatprep.mubr.msk.f32.mxu1 %vm212_vm1, %v615_v2 }
 0x46b   :  { %7004 = vmatprep.subr.bf16.mxu1 %v7003_v3 }
 0x471   :  { %6533 = vmatmul.mubr.msk.f32.vlgmr.msra.gmra.mrb[14].mxu1 %vm212_vm1, %v616_v7 }
 0x472   :  { %7006 = vmatpush3.bf16.msra.mxu1 %v7003_v3 }
 0x473   :  { %7008 = vmatprep.subr.bf16.mxu1 %v7717_v4 }
 0x53c   :  { %v6527_v13 = vpop.f32.mrb[12].mxu1 }
 0x53d   :  { %v581_v14 = vpop.f32.mrb[13].mxu1  ;;  %v587_v25 = vadd.f32 %v6527_v13, %v7757_v18 }
 0x53e   :  { %v582_v27 = vadd.f32 %v581_v14, %v7760_v20 }
 0x53f   :  { %v594_v31 = vsel %vm590_vm13, %v587_v25, -inf }
 0x540   :  { %v591_v32 = vsel %vm590_vm13, %v582_v27, -inf }
 0x544   :  { %v6534_v19 = vpop.f32.mrb[14].mxu1 }
 0x545   :  { %v695_v21 = vadd.f32 %v6534_v19, %v7757_v18  ;;  %v689_v22 = vpop.f32.mrb[15].mxu1 }
 0x546   :  { %v690_v23 = vadd.f32 %v689_v22, %v7760_v20 }
 0x547   :  { %v701_v26 = vsel %vm590_vm13, %v695_v21, -inf }
 0x548   :  { %702 = vmax.xlane.f32.xlu1 %v701_v26  ;;  %v698_v30 = vsel %vm590_vm13, %v690_v23, -inf }
 0x549   :  { %699 = vmax.xlane.f32.xlu0 %v698_v30 }
 0x54c   :  { %595 = vmax.xlane.f32.xlu1 %v594_v31 }
 0x54d   :  { %592 = vmax.xlane.f32.xlu0 %v591_v32 }
 0x5d5   :  { %v703_v33 = vpop.xlane.xlu1 %702 }
 0x5d6   :  { %v705_v34 = vsub.f32 %v695_v21, %v703_v33  ;;  %v700_v35 = vpop.xlane.xlu0 %699  ;;  %v884_v21 = vmul.f32 %v7699_v52, %v7662_v29 }
 0x5d7   :  { %v704_v36 = vsub.f32 %v690_v23, %v700_v35 }
 0x5d8   :  { %v708_v37 = vmul.f32 1.442695, %v705_v34 }
 0x5d9   :  { %v706_v38 = vmul.f32 1.442695, %v704_v36  ;;  %v596_v39 = vpop.xlane.xlu1 %595 }
 0x5da   :  { %7285 = vpow2.f32 %v708_v37  ;;  %v598_v40 = vsub.f32 %v587_v25, %v596_v39  ;;  %v593_v43 = vpop.xlane.xlu0 %592 }
 0x5db   :  { %7287 = vpow2.f32 %v706_v38  ;;  %v597_v45 = vsub.f32 %v582_v27, %v593_v43 }
 0x5dc   :  { %v601_v46 = vmul.f32 1.442695, %v598_v40 }
 0x5dd   :  { %v599_v48 = vmul.f32 1.442695, %v597_v45 }
 0x5de   :  { %7289 = vpow2.f32 %v601_v46 }
 0x5df   :  { %7291 = vpow2.f32 %v599_v48 }
 0x5e4   :  { %v7286_v50 = vpop.eup %7285 }
 0x5e5   :  { %v7288_v54 = vpop.eup %7287  ;;  %v713_v55 = vsel %vm590_vm13, %v7286_v50, 0.0 }
 0x5e6   :  { %714 = vadd.xlane.f32.xlu1 %v713_v55  ;;  %v710_v56 = vsel %vm590_vm13, %v7288_v54, 0.0  ;;  %v1075_v55 = vmul.f32 %v7702_v53, %v7682_v44 }
 0x5e7   :  { %711 = vadd.xlane.f32.xlu0 %v710_v56 }
 0x5e8   :  { %v7290_v57 = vpop.eup %7289 }
 0x5e9   :  { %v7292_v58 = vpop.eup %7291  ;;  %v606_v59 = vsel %vm590_vm13, %v7290_v57, 0.0 }
 0x5ea   :  { %607 = vadd.xlane.f32.xlu1 %v606_v59  ;;  %v603_v60 = vsel %vm590_vm13, %v7292_v58, 0.0 }
 0x5eb   :  { %604 = vadd.xlane.f32.xlu0 %v603_v60 }
 0x673   :  { %v715_v61 = vpop.xlane.xlu1 %714 }
 0x674   :  { %7293 = vrcp.f32 %v715_v61  ;;  %v712_v62 = vpop.xlane.xlu0 %711 }
 0x675   :  { %7295 = vrcp.f32 %v712_v62 }
 0x677   :  { %v608_v1 = vpop.xlane.xlu1 %607 }
 0x678   :  { %v605_v0 = vpop.xlane.xlu0 %604 }
 0x679   :  { %7297 = vrcp.f32 %v605_v0 }
 0x67a   :  { %7299 = vrcp.f32 %v608_v1 }
 0x67e   :  { %v7294_v2 = vpop.eup %7293 }
 0x67f   :  { %v7296_v3 = vpop.eup %7295  ;;  %v719_v10 = vmul.f32 %v7294_v2, %v7286_v50 }
 0x680   :  { %v718_v7 = vmul.f32 %v7296_v3, %v7288_v54  ;;  %v1074_v54 = vmul.f32 %v7702_v53, %v7662_v29 }
 0x682   :  { %6539 = vmatprep.mubr.msk.f32.mxu1 %vm590_vm13, %v718_v7 }
 0x683   :  { %v7298_v12 = vpop.eup %7297  ;;  %6540 = vmatmul.mubr.msk.f32.vlgmr.msra.gmra.mrb[16].mxu1 %vm590_vm13, %v719_v10  ;;  %v7207_v10 = vld [vmem:[%s8713_s4 + $0x30] sm:$0xff]  }
 0x684   :  { %7010 = vmatpush3.bf16.msra.mxu1 %v7717_v4  ;;  %v611_v13 = vmul.f32 %v7298_v12, %v7292_v58  ;;  %v7300_v14 = vpop.eup %7299  ;;  %v885_v4 = vmul.f32 %v7699_v52, %v7682_v44  ;;  %6578 = vmatpush3.bf16.msra.mxu0 %v7207_v10 }
 0x685   :  { %7013 = vmatprep.subr.msk.bf16.mxu1 %vm7672_vm4, %v7676_v42  ;;  %v612_v19 = vmul.f32 %v7300_v14, %v7290_v57  ;;  %6579 = vmatprep.subr.bf16.mxu0 %v7474_v63 }
 0x686   :  { %6546 = vmatprep.mubr.msk.f32.mxu1 %vm590_vm13, %v611_v13 }
 0x68b   :  { %6547 = vmatmul.mubr.msk.f32.vlgmr.msra.gmra.mrb[16].mxu1 %vm590_vm13, %v612_v19 }
 0x68c   :  { %6553 = vmatprep.mubr.msk.f32.mxu1 %vm212_vm1, %v884_v21 }
 0x68d   :  { %7016 = vmatpush3.bf16.xpose.msk.msra.mxu1 %vm7672_vm4, %v7676_v42 }
 0x68e   :  { %7018 = vmatprep.subr.bf16.mxu1 %v7719_v5 }
 0x694   :  { %6554 = vmatmul.mubr.msk.f32.vlgmr.msra.gmra.mrb[18].mxu1 %vm212_vm1, %v885_v4 }
 0x695   :  { %7020 = vmatpush3.bf16.msra.mxu1 %v7719_v5 }
 0x696   :  { %7023 = vmatprep.subr.msk.bf16.mxu1 %vm7672_vm4, %v7676_v42 }
 0x767   :  { %v6555_v22 = vpop.f32.mrb[18].mxu1 }
 0x768   :  { %v964_v23 = vadd.f32 %v6555_v22, %v7757_v18  ;;  %v958_v25 = vpop.f32.mrb[19].mxu1  ;;  %v7208_v22 = vld [vmem:[%s8713_s4 + $0x38] sm:$0xff]  }
 0x769   :  { %v959_v26 = vadd.f32 %v958_v25, %v7760_v20  ;;  %6580 = vmatpush3.bf16.msra.mxu0 %v7208_v22  ;;  %v7216_v22 = vld [vmem:[%s8716_s6 + $0x28] sm:$0xff]  }
 0x76a   :  { %v970_v27 = vsel %vm590_vm13, %v964_v23, -inf  ;;  %6585 = vmatprep.subr.bf16.mxu0 %v7474_v63 }
 0x76b   :  { %971 = vmax.xlane.f32.xlu1 %v970_v27  ;;  %v967_v30 = vsel %vm590_vm13, %v959_v26, -inf  ;;  %v5946_v27 = vld [vmem:[%s8714_s7 + $0x5] ss:$0 sm:$0xff] }
 0x76c   :  { %968 = vmax.xlane.f32.xlu0 %v967_v30 }
 0x7f8   :  { %v972_v31 = vpop.xlane.xlu1 %971 }
 0x7f9   :  { %v974_v32 = vsub.f32 %v964_v23, %v972_v31  ;;  %v969_v33 = vpop.xlane.xlu0 %968 }
 0x7fa   :  { %v973_v5 = vsub.f32 %v959_v26, %v969_v33 }
 0x7fb   :  { %v977_v34 = vmul.f32 1.442695, %v974_v32 }
 0x7fc   :  { %v975_v35 = vmul.f32 1.442695, %v973_v5 }
 0x7fd   :  { %7301 = vpow2.f32 %v977_v34 }
 0x7fe   :  { %7303 = vpow2.f32 %v975_v35 }
 0x807   :  { %v7302_v36 = vpop.eup %7301 }
 0x808   :  { %v7304_v37 = vpop.eup %7303  ;;  %v982_v38 = vsel %vm590_vm13, %v7302_v36, 0.0 }
 0x809   :  { %983 = vadd.xlane.f32.xlu1 %v982_v38  ;;  %v979_v39 = vsel %vm590_vm13, %v7304_v37, 0.0 }
 0x80a   :  { %980 = vadd.xlane.f32.xlu0 %v979_v39 }
 0x896   :  { %v984_v40 = vpop.xlane.xlu1 %983 }
 0x897   :  { %7305 = vrcp.f32 %v984_v40  ;;  %v981_v43 = vpop.xlane.xlu0 %980 }
 0x898   :  { %7307 = vrcp.f32 %v981_v43 }
 0x8a1   :  { %v7306_v45 = vpop.eup %7305 }
 0x8a2   :  { %v7308_v46 = vpop.eup %7307  ;;  %v988_v50 = vmul.f32 %v7306_v45, %v7302_v36 }
 0x8a3   :  { %v987_v48 = vmul.f32 %v7308_v46, %v7304_v37 }
 0x8a5   :  { %6560 = vmatprep.mubr.msk.f32.mxu1 %vm590_vm13, %v987_v48 }
 0x8a6   :  { %6561 = vmatmul.mubr.msk.f32.vlgmr.msra.gmra.mrb[16].mxu1 %vm590_vm13, %v988_v50 }
 0x8a7   :  { %7026 = vmatpush3.bf16.xpose.msk.msra.mxu1 %vm7672_vm4, %v7676_v42  ;;  %6567 = vmatprep.mubr.msk.f32.mxu1 %vm212_vm1, %v1074_v54 }
 0x8a8   :  { %7028 = vmatprep.subr.bf16.mxu1 %v7721_v6 }
 0x8ae   :  { %6568 = vmatmul.mubr.msk.f32.vlgmr.msra.gmra.mrb[20].mxu1 %vm212_vm1, %v1075_v55  ;;  %v7209_v55 = vld [vmem:[%s8715_s5] sm:$0xff]  }
 0x8af   :  { %7030 = vmatpush3.bf16.msra.mxu1 %v7721_v6 }
 0x8b0   :  { %6593 = vmatprep.subr.bf16.mxu1 %v7474_v63 }
 0x981   :  { %v6569_v29 = vpop.f32.mrb[20].mxu1 }
 0x982   :  { %v1154_v56 = vadd.f32 %v6569_v29, %v7757_v18  ;;  %v1148_v57 = vpop.f32.mrb[21].mxu1  ;;  %v7210_v29 = vld [vmem:[%s8715_s5 + $0x8] sm:$0xff]  }
 0x983   :  { %v1149_v58 = vadd.f32 %v1148_v57, %v7760_v20  ;;  %v7212_v57 = vld [vmem:[%s8716_s6 + $0x8] sm:$0xff]  }
 0x984   :  { %v1160_v42 = vsel %vm590_vm13, %v1154_v56, -inf }
 0x985   :  { %1161 = vmax.xlane.f32.xlu1 %v1160_v42  ;;  %v1157_v59 = vsel %vm590_vm13, %v1149_v58, -inf }
 0x986   :  { %1158 = vmax.xlane.f32.xlu0 %v1157_v59 }
 0xa12   :  { %v1162_v60 = vpop.xlane.xlu1 %1161 }
 0xa13   :  { %v1164_v44 = vsub.f32 %v1154_v56, %v1162_v60  ;;  %v1159_v61 = vpop.xlane.xlu0 %1158  ;;  %v7211_v56 = vld [vmem:[%s8716_s6] sm:$0xff]  }
 0xa14   :  { %v1163_v62 = vsub.f32 %v1149_v58, %v1159_v61 }
 0xa15   :  { %v1167_v0 = vmul.f32 1.442695, %v1164_v44 }
 0xa16   :  { %v1165_v6 = vmul.f32 1.442695, %v1163_v62 }
 0xa17   :  { %7309 = vpow2.f32 %v1167_v0  ;;  %v5947_v0 = vld [vmem:[%s8714_s7 + $0x6] ss:$0 sm:$0xff] }
 0xa18   :  { %7311 = vpow2.f32 %v1165_v6 }
 0xa21   :  { %v7310_v1 = vpop.eup %7309 }
 0xa22   :  { %v7312_v2 = vpop.eup %7311  ;;  %v1172_v3 = vsel %vm590_vm13, %v7310_v1, 0.0 }
 0xa23   :  { %1173 = vadd.xlane.f32.xlu1 %v1172_v3  ;;  %v1169_v7 = vsel %vm590_vm13, %v7312_v2, 0.0 }
 0xa24   :  { %1170 = vadd.xlane.f32.xlu0 %v1169_v7  ;;  %v5948_v7 = vld [vmem:[%s8714_s7 + $0x7] ss:$0 sm:$0xff] }
 0xab0   :  { %v1174_v12 = vpop.xlane.xlu1 %1173 }
 0xab1   :  { %7313 = vrcp.f32 %v1174_v12  ;;  %v1171_v13 = vpop.xlane.xlu0 %1170 }
 0xab2   :  { %7315 = vrcp.f32 %v1171_v13 }
 0xabb   :  { %v7314_v14 = vpop.eup %7313 }
 0xabc   :  { %v7316_v19 = vpop.eup %7315  ;;  %v1178_v4 = vmul.f32 %v7314_v14, %v7310_v1 }
 0xabd   :  { %v1177_v21 = vmul.f32 %v7316_v19, %v7312_v2  ;;  %v7213_v19 = vld [vmem:[%s8716_s6 + $0x10] sm:$0xff]  }
 0xabf   :  { %6574 = vmatprep.mubr.msk.f32.mxu1 %vm590_vm13, %v1177_v21  ;;  %v7214_v21 = vld [vmem:[%s8716_s6 + $0x18] sm:$0xff]  }
 0xac0   :  { %6575 = vmatmul.mubr.msk.f32.vlgmr.msra.gmra.mrb[16].mxu1 %vm590_vm13, %v1178_v4  ;;  %v7215_v4 = vld [vmem:[%s8716_s6 + $0x20] sm:$0xff]  }
 0xac1   :  { %6609 = vmatprep.mubr.msk.bf16.mxu1 %vm7475_vm2, %v7474_v63  ;;  %6594 = vmatpush3.bf16.msra.mxu1 %v7211_v56 }
 0xac2   :  { %6595 = vmatprep.subr.bf16.mxu1 %v7474_v63 }
 0xac5   :  { %6596 = vmatpush3.bf16.msra.mxu1 %v7212_v57 }
 0xac6   :  { %6597 = vmatprep.subr.bf16.mxu1 %v7474_v63 }
 0xac9   :  { %6598 = vmatpush3.bf16.msra.mxu1 %v7213_v19 }
 0xaca   :  { %6599 = vmatprep.subr.bf16.mxu1 %v7474_v63 }
 0xacd   :  { %6600 = vmatpush3.bf16.msra.mxu1 %v7214_v21 }
 0xace   :  { %6601 = vmatprep.subr.bf16.mxu1 %v7474_v63 }
 0xad1   :  { %6602 = vmatpush3.bf16.msra.mxu1 %v7215_v4 }
 0xad2   :  { %6603 = vmatprep.subr.bf16.mxu1 %v7474_v63 }
 0xad5   :  { %6604 = vmatpush3.bf16.msra.mxu1 %v7216_v22 }
 0xad6   :  { %6605 = vmatprep.subr.bf16.mxu1 %v7474_v63 }
 0xb93   :  { %v6576_v23 = vpop.f32.mrb[16].mxu1 }
 0xb94   :  { %v1253_v25 = vpop.f32.mrb[17].mxu1 }
 0xb95   :  { %v1269_v26 = vpack.c.bf16 %v6576_v23, %v1253_v25  ;;  %v7217_v23 = vld [vmem:[%s8716_s6 + $0x30] sm:$0xff]   ;;  %v7218_v25 = vld [vmem:[%s8716_s6 + $0x38] sm:$0xff]  }
 0xb96   :  { %6606 = vmatpush3.bf16.msra.mxu1 %v7217_v23 }
 0xb97   :  { %6582 = vmatmul.mubr.msk.bf16.vlgmr.msra.gmra.mrb[4].mxu0 %vm212_vm1, %v1269_v26  ;;  %6607 = vmatprep.subr.bf16.mxu1 %v7474_v63  ;;  %v5949_v26 = vld [vmem:[%s8717_s8] ss:$0 sm:$0xff] }
 0xb98   :  { %6589 = vmatprep.mubr.msk.bf16.mxu0 %vm7475_vm2, %v7474_v63  ;;  %6586 = vmatpush3.bf16.msra.mxu0 %v7209_v55 }
 0xb99   :  { %6587 = vmatprep.subr.bf16.mxu0 %v7474_v63 }
 0xb9a   :  { %6608 = vmatpush3.bf16.msra.mxu1 %v7218_v25  ;;  %v5962_v25 = vld [vmem:[%s8714_s7 + $0x9] ss:$0 sm:$0xff] }
 0xb9c   :  { %6588 = vmatpush3.bf16.msra.mxu0 %v7210_v29 }
 0xb9d   :  { %6613 = vmatprep.subr.bf16.mxu0 %v7474_v63 }
 0xc6a   :  { %v1319_v30 = vpop.f32.mrb[4].mxu0 }
 0xc6b   :  { %v1326_v31 = vadd.f32 %v1319_v30, %v7596_v47  ;;  %v6583_v32 = vpop.f32.mrb[5].mxu0 }
 0xc6c   :  { %v1322_v33 = vpop.f32.mrb[6].mxu0 }
 0xc6d   :  { %v7841_v5 = vadd.f32 %v5946_v27, %v1326_v31  ;;  %v1327_v34 = vadd.f32 %v1322_v33, %v7600_v51  ;;  %v6584_v35 = vpop.f32.mrb[7].mxu0 }
 0xc6f   :  { %v7844_v36 = vadd.f32 %v5946_v27, %v1327_v34  ;;  %v1334_v37 = vsel %vm212_vm1, %v7841_v5, 0.0 }
 0xc70   :  { %1335 = vadd.xlane.f32.xlu0 %v1334_v37 }
 0xc71   :  { %v1337_v38 = vsel %vm212_vm1, %v7844_v36, 0.0 }
 0xc72   :  { %1338 = vadd.xlane.f32.xlu1 %v1337_v38 }
 0xcfd   :  { %v1336_v39 = vpop.xlane.xlu0 %1335 }
 0xcfe   :  { %v1340_v40 = vmul.f32 0.03125, %v1336_v39 }
 0xcff   :  { %v1339_v47 = vpop.xlane.xlu1 %1338 }
 0xd00   :  { %v1342_v43 = vsub.f32 %v7841_v5, %v1340_v40  ;;  %v1341_v45 = vmul.f32 0.03125, %v1339_v47 }
 0xd02   :  { %v1343_v46 = vsub.f32 %v7844_v36, %v1341_v45  ;;  %v1344_v51 = vmul.f32 %v1342_v43, %v1342_v43 }
 0xd04   :  { %v1346_v48 = vsel %vm212_vm1, %v1344_v51, 0.0  ;;  %v1345_v50 = vmul.f32 %v1343_v46, %v1343_v46 }
 0xd05   :  { %1347 = vadd.xlane.f32.xlu0 %v1346_v48 }
 0xd06   :  { %v1349_v54 = vsel %vm212_vm1, %v1345_v50, 0.0  ;;  %v5961_v50 = vld [vmem:[%s8714_s7 + $0x8] ss:$0 sm:$0xff] }
 0xd07   :  { %1350 = vadd.xlane.f32.xlu1 %v1349_v54 }
 0xd92   :  { %v1348_v58 = vpop.xlane.xlu0 %1347 }
 0xd93   :  { %v1352_v42 = vmul.f32 0.03125, %v1348_v58 }
 0xd94   :  { %v1351_v59 = vpop.xlane.xlu1 %1350 }
 0xd95   :  { %v1354_v60 = vadd.f32 1e-05, %v1352_v42  ;;  %v1353_v44 = vmul.f32 0.03125, %v1351_v59 }
 0xd97   :  { %7317 = vrsqrt.f32 %v1354_v60  ;;  %v1355_v61 = vadd.f32 1e-05, %v1353_v44 }
 0xd99   :  { %7319 = vrsqrt.f32 %v1355_v61 }
 0xda1   :  { %v7318_v62 = vpop.eup %7317 }
 0xda2   :  { %v1358_v6 = vmul.f32 %v7318_v62, %v1342_v43 }
 0xda3   :  { %v7320_v1 = vpop.eup %7319 }
 0xda4   :  { %v1364_v2 = vmul.f32 %v5947_v0, %v1358_v6  ;;  %v1359_v3 = vmul.f32 %v7320_v1, %v1343_v46 }
 0xda6   :  { %v1365_v10 = vmul.f32 %v5947_v0, %v1359_v3  ;;  %v1370_v12 = vadd.f32 %v5948_v7, %v1364_v2 }
 0xda8   :  { %v1371_v13 = vadd.f32 %v5948_v7, %v1365_v10  ;;  %v7219_v10 = vld [vmem:[%s8713_s4 + $0x40] sm:$0xff]  }
 0xdaa   :  { %v1376_v14 = vpack.c.bf16 %v1371_v13, %v1370_v12  ;;  %v7220_v12 = vld [vmem:[%s8713_s4 + $0x48] sm:$0xff]  }
 0xdac   :  { %6590 = vmatmul.mubr.msk.bf16.vlgmr.msra.gmra.mrb[8].mxu0 %vm212_vm1, %v1376_v14 }
 0xdad   :  { %6617 = vmatprep.mubr.msk.bf16.mxu0 %vm7475_vm2, %v7474_v63  ;;  %6614 = vmatpush3.bf16.msra.mxu0 %v7219_v10 }
 0xdae   :  { %6615 = vmatprep.subr.bf16.mxu0 %v7474_v63 }
 0xdb1   :  { %6616 = vmatpush3.bf16.msra.mxu0 %v7220_v12 }
 0xdb2   :  { %6621 = vmatprep.subr.bf16.mxu0 %v7474_v63 }
 0xe7f   :  { %v1433_v27 = vpop.f32.mrb[8].mxu0 }
 0xe80   :  { %v1434_v30 = vadd.f32 %v5949_v26, %v1433_v27  ;;  %v6591_v31 = vpop.f32.mrb[9].mxu0 }
 0xe81   :  { %v1436_v32 = vpop.f32.mrb[10].mxu0 }
 0xe82   :  { %v1442_v33 = vmul.f32 0.70710677, %v1434_v30  ;;  %v1437_v34 = vadd.f32 %v5949_v26, %v1436_v32  ;;  %v6592_v35 = vpop.f32.mrb[11].mxu0  ;;  %v1440_v47 = vmul.f32 0.5, %v1434_v30  ;;  %v5963_v32 = vld [vmem:[%s8714_s7 + $0xa] ss:$0 sm:$0xff] }
 0xe84   :  { %7321 = verf.f32 %v1442_v33  ;;  %v1443_v37 = vmul.f32 0.70710677, %v1437_v34  ;;  %v1441_v43 = vmul.f32 0.5, %v1437_v34 }
 0xe86   :  { %7323 = verf.f32 %v1443_v37  ;;  %v7221_v37 = vld [vmem:[%s8713_s4 + $0x50] sm:$0xff]  }
 0xe8e   :  { %v7322_v38 = vpop.eup %7321 }
 0xe8f   :  { %v1446_v39 = vadd.f32 1.0, %v7322_v38 }
 0xe90   :  { %v7324_v40 = vpop.eup %7323 }
 0xe91   :  { %v1447_v45 = vadd.f32 1.0, %v7324_v40  ;;  %v1448_v46 = vmul.f32 %v1446_v39, %v1440_v47  ;;  %v7222_v39 = vld [vmem:[%s8713_s4 + $0x58] sm:$0xff]   ;;  %v7223_v40 = vld [vmem:[%s8713_s4 + $0x60] sm:$0xff]   ;;  %v7224_v47 = vld [vmem:[%s8713_s4 + $0x68] sm:$0xff]  }
 0xe93   :  { %v1449_v51 = vmul.f32 %v1447_v45, %v1441_v43  ;;  %v5968_v43 = vld [vmem:[%s8714_s7 + $0xb] ss:$0 sm:$0xff] }
 0xe95   :  { %v1466_v48 = vpack.c.bf16 %v1449_v51, %v1448_v46 }
 0xe97   :  { %6610 = vmatmul.mubr.bf16.vlgmr.msra.gmra.mrb[24].mxu1 %v1466_v48 }
 0xf6a   :  { %v1549_v54 = vpop.f32.mrb[24].mxu1 }
 0xf6b   :  { %v1556_v55 = vadd.f32 %v1549_v54, %v7841_v5  ;;  %v6611_v29 = vpop.f32.mrb[25].mxu1 }
 0xf6c   :  { %v1552_v56 = vpop.f32.mrb[26].mxu1  ;;  %v5976_v29 = vld [vmem:[%s8714_s7 + $0xc] ss:$0 sm:$0xff] }
 0xf6d   :  { %v7909_v57 = vadd.f32 %v5961_v50, %v1556_v55  ;;  %v1557_v58 = vadd.f32 %v1552_v56, %v7844_v36  ;;  %v6612_v42 = vpop.f32.mrb[27].mxu1 }
 0xf6f   :  { %v7912_v59 = vadd.f32 %v5961_v50, %v1557_v58  ;;  %v1573_v60 = vsel %vm212_vm1, %v7909_v57, 0.0 }
 0xf70   :  { %1574 = vadd.xlane.f32.xlu0 %v1573_v60 }
 0xf71   :  { %v1576_v44 = vsel %vm212_vm1, %v7912_v59, 0.0 }
 0xf72   :  { %1577 = vadd.xlane.f32.xlu1 %v1576_v44 }
 0xffd   :  { %v1575_v61 = vpop.xlane.xlu0 %1574 }
 0xffe   :  { %v1579_v62 = vmul.f32 0.03125, %v1575_v61 }
 0xfff   :  { %v1578_v5 = vpop.xlane.xlu1 %1577 }
0x1000   :  { %v1581_v0 = vsub.f32 %v7909_v57, %v1579_v62  ;;  %v1580_v6 = vmul.f32 0.03125, %v1578_v5  ;;  %v5984_v5 = vld [vmem:[%s8714_s7 + $0xd] ss:$0 sm:$0xff] }
0x1002   :  { %v1582_v1 = vsub.f32 %v7912_v59, %v1580_v6  ;;  %v1583_v36 = vmul.f32 %v1581_v0, %v1581_v0 }
0x1004   :  { %v1585_v2 = vsel %vm212_vm1, %v1583_v36, 0.0  ;;  %v1584_v3 = vmul.f32 %v1582_v1, %v1582_v1 }
0x1005   :  { %1586 = vadd.xlane.f32.xlu0 %v1585_v2 }
0x1006   :  { %v1588_v7 = vsel %vm212_vm1, %v1584_v3, 0.0 }
0x1007   :  { %1589 = vadd.xlane.f32.xlu1 %v1588_v7 }
0x1092   :  { %v1587_v13 = vpop.xlane.xlu0 %1586 }
0x1093   :  { %v1591_v14 = vmul.f32 0.03125, %v1587_v13 }
0x1094   :  { %v1590_v19 = vpop.xlane.xlu1 %1589 }
0x1095   :  { %v1593_v21 = vadd.f32 1e-05, %v1591_v14  ;;  %v1592_v4 = vmul.f32 0.03125, %v1590_v19 }
0x1097   :  { %7325 = vrsqrt.f32 %v1593_v21  ;;  %v1594_v22 = vadd.f32 1e-05, %v1592_v4 }
0x1099   :  { %7327 = vrsqrt.f32 %v1594_v22 }
0x10a1   :  { %v7326_v23 = vpop.eup %7325 }
0x10a2   :  { %v1597_v26 = vmul.f32 %v7326_v23, %v1581_v0 }
0x10a3   :  { %v7328_v27 = vpop.eup %7327 }
0x10a4   :  { %v1603_v30 = vmul.f32 %v5962_v25, %v1597_v26  ;;  %v1598_v31 = vmul.f32 %v7328_v27, %v1582_v1 }
0x10a6   :  { %v1604_v33 = vmul.f32 %v5962_v25, %v1598_v31  ;;  %v1609_v34 = vadd.f32 %v5963_v32, %v1603_v30 }
0x10a8   :  { %v1610_v35 = vadd.f32 %v5963_v32, %v1604_v33 }
0x10aa   :  { %v1616_v38 = vpack.c.bf16 %v1610_v35, %v1609_v34 }
0x10ac   :  { %6618 = vmatmul.mubr.msk.bf16.vlgmr.msra.gmra.mrb[12].mxu0 %vm212_vm1, %v1616_v38 }
0x10ad   :  { %6622 = vmatpush3.bf16.msra.mxu0 %v7221_v37  ;;  %6625 = vmatprep.mubr.msk.bf16.mxu0 %vm7475_vm2, %v7474_v63 }
0x10ae   :  { %6623 = vmatprep.subr.bf16.mxu0 %v7474_v63 }
0x10b1   :  { %6624 = vmatpush3.bf16.msra.mxu0 %v7222_v39 }
0x10b2   :  { %6629 = vmatprep.subr.bf16.mxu0 %v7474_v63 }
0x10b4   :  { %6626 = vmatmul.mubr.msk.bf16.vlgmr.msra.gmra.mrb[16].mxu0 %vm212_vm1, %v1616_v38 }
0x10b5   :  { %6630 = vmatpush3.bf16.msra.mxu0 %v7223_v40  ;;  %6633 = vmatprep.mubr.msk.bf16.mxu0 %vm7475_vm2, %v7474_v63 }
0x10b6   :  { %6631 = vmatprep.subr.bf16.mxu0 %v7474_v63 }
0x10b9   :  { %6632 = vmatpush3.bf16.msra.mxu0 %v7224_v47 }
0x10bc   :  { %6634 = vmatmul.mubr.msk.bf16.vlgmr.msra.gmra.mrb[20].mxu0 %vm212_vm1, %v1616_v38 }
0x117f   :  { %v1670_v45 = vpop.f32.mrb[12].mxu0 }
0x1180   :  { %v1671_v46 = vadd.f32 %v5968_v43, %v1670_v45  ;;  %v6619_v51 = vpop.f32.mrb[13].mxu0 }
0x1181   :  { %v1673_v48 = vpop.f32.mrb[14].mxu0 }
0x1182   :  { %v6620_v50 = vpop.f32.mrb[15].mxu0  ;;  %v1801_v54 = vmul.f32 %v7660_v28, %v1671_v46  ;;  %v1914_v55 = vmul.f32 %v7696_v49, %v1671_v46  ;;  %v1674_v0 = vadd.f32 %v5968_v43, %v1673_v48  ;;  %v2183_v25 = vmul.f32 %v7699_v52, %v1671_v46 }
0x1183   :  { %v2373_v34 = vmul.f32 %v7702_v53, %v1671_v46 }
0x1184   :  { %6641 = vmatprep.mubr.msk.f32.mxu0 %vm212_vm1, %v1801_v54  ;;  %6648 = vmatprep.mubr.msk.f32.mxu1 %vm212_vm1, %v1914_v55  ;;  %v1802_v3 = vmul.f32 %v7660_v28, %v1674_v0  ;;  %v1915_v12 = vmul.f32 %v7696_v49, %v1674_v0  ;;  %v2184_v33 = vmul.f32 %v7699_v52, %v1674_v0 }
0x1185   :  { %v2374_v35 = vmul.f32 %v7702_v53, %v1674_v0 }
0x1187   :  { %v1732_v56 = vpop.f32.mrb[16].mxu0 }
0x1188   :  { %v6627_v58 = vpop.f32.mrb[17].mxu0  ;;  %v1733_v60 = vadd.f32 %v5976_v29, %v1732_v56 }
0x1189   :  { %v1735_v42 = vpop.f32.mrb[18].mxu0 }
0x118a   :  { %v1736_v44 = vadd.f32 %v5976_v29, %v1735_v42  ;;  %v6628_v61 = vpop.f32.mrb[19].mxu0 }
0x118c   :  { %v7031_v62 = vpack.c.bf16 %v1736_v44, %v1733_v60 }
0x118e   :  { %7033 = vmatprep.subr.msk.bf16.mxu0 %vm7672_vm4, %v7031_v62  ;;  %7039 = vmatprep.subr.msk.bf16.mxu1 %vm7672_vm4, %v7031_v62 }
0x118f   :  { %v1794_v6 = vpop.f32.mrb[20].mxu0  ;;  %7036 = vmatpush3.bf16.xpose.msk.msra.mxu0 %vm7672_vm4, %v7031_v62  ;;  %7042 = vmatpush3.bf16.xpose.msk.msra.mxu1 %vm7672_vm4, %v7031_v62 }
0x1190   :  { %v1795_v1 = vadd.f32 %v5984_v5, %v1794_v6  ;;  %v6635_v36 = vpop.f32.mrb[21].mxu0  ;;  %7053 = vmatprep.subr.msk.bf16.mxu1 %vm7672_vm4, %v7031_v62 }
0x1191   :  { %v1797_v2 = vpop.f32.mrb[22].mxu0 }
0x1192   :  { %v1798_v7 = vadd.f32 %v5984_v5, %v1797_v2  ;;  %v6636_v10 = vpop.f32.mrb[23].mxu0  ;;  %v2019_v13 = vmul.f32 %v7696_v49, %v1795_v1  ;;  %v1912_v14 = vmul.f32 %v7660_v28, %v1795_v1  ;;  %v2288_v19 = vmul.f32 %v7699_v52, %v1795_v1 }
0x1193   :  { %v2478_v26 = vmul.f32 %v7702_v53, %v1795_v1 }
0x1194   :  { %v2020_v21 = vmul.f32 %v7696_v49, %v1798_v7  ;;  %v1913_v4 = vmul.f32 %v7660_v28, %v1798_v7  ;;  %v2289_v22 = vmul.f32 %v7699_v52, %v1798_v7  ;;  %v2479_v23 = vmul.f32 %v7702_v53, %v1798_v7 }
0x1196   :  { %6642 = vmatmul.mubr.msk.f32.vlgmr.msra.gmra.mrb[24].mxu0 %vm212_vm1, %v1802_v3  ;;  %6649 = vmatmul.mubr.msk.f32.vlgmr.msra.gmra.mrb[22].mxu1 %vm212_vm1, %v1915_v12  ;;  %v7043_v27 = vpack.c.bf16 %v2020_v21, %v2019_v13  ;;  %v7994_v30 = vpack.c.bf16 %v1913_v4, %v1912_v14  ;;  %v7996_v31 = vpack.c.bf16 %v2289_v22, %v2288_v19 }
0x1197   :  { %7056 = vmatpush3.bf16.xpose.msk.msra.mxu1 %vm7672_vm4, %v7031_v62  ;;  %6669 = vmatprep.mubr.msk.f32.mxu1 %vm212_vm1, %v2183_v25  ;;  %v8001_v32 = vpack.c.bf16 %v2479_v23, %v2478_v26 }
0x1198   :  { %7044 = vmatprep.subr.bf16.mxu0 %v7043_v27  ;;  %7063 = vmatprep.subr.msk.bf16.mxu1 %vm7672_vm4, %v7031_v62 }
0x1199   :  { %7046 = vmatpush3.bf16.msra.mxu0 %v7043_v27 }
0x119a   :  { %7048 = vmatprep.subr.bf16.mxu0 %v7994_v30 }
0x119e   :  { %6670 = vmatmul.mubr.msk.f32.vlgmr.msra.gmra.mrb[28].mxu1 %vm212_vm1, %v2184_v33 }
0x119f   :  { %7066 = vmatpush3.bf16.xpose.msk.msra.mxu1 %vm7672_vm4, %v7031_v62  ;;  %6683 = vmatprep.mubr.msk.f32.mxu1 %vm212_vm1, %v2373_v34 }
0x11a0   :  { %6701 = vmatprep.subr.bf16.mxu1 %v7474_v63 }
0x11a6   :  { %6684 = vmatmul.mubr.msk.f32.vlgmr.msra.gmra.mrb[30].mxu1 %vm212_vm1, %v2374_v35 }
0x11a7   :  { %6705 = vmatprep.mubr.msk.bf16.mxu1 %vm7475_vm2, %v7474_v63 }
0x1269   :  { %v6643_v37 = vpop.f32.mrb[24].mxu0  ;;  %v6650_v38 = vpop.f32.mrb[22].mxu1 }
0x126a   :  { %v1994_v39 = vadd.f32 %v6650_v38, %v7757_v18  ;;  %v1881_v40 = vpop.f32.mrb[25].mxu0  ;;  %v1988_v47 = vpop.f32.mrb[23].mxu1  ;;  %v1887_v45 = vadd.f32 %v6643_v37, %v7757_v18 }
0x126b   :  { %v1989_v43 = vadd.f32 %v1988_v47, %v7760_v20  ;;  %v1882_v51 = vadd.f32 %v1881_v40, %v7760_v20 }
0x126c   :  { %v2000_v46 = vsel %vm590_vm13, %v1994_v39, -inf  ;;  %v1893_v50 = vsel %vm590_vm13, %v1887_v45, -inf }
0x126d   :  { %2001 = vmax.xlane.f32.xlu1 %v2000_v46  ;;  %v1997_v48 = vsel %vm590_vm13, %v1989_v43, -inf  ;;  %v1890_v55 = vsel %vm590_vm13, %v1882_v51, -inf }
0x126e   :  { %1998 = vmax.xlane.f32.xlu0 %v1997_v48 }
0x1271   :  { %v6671_v54 = vpop.f32.mrb[28].mxu1  ;;  %1894 = vmax.xlane.f32.xlu1 %v1893_v50 }
0x1272   :  { %v2263_v29 = vadd.f32 %v6671_v54, %v7757_v18  ;;  %v2257_v56 = vpop.f32.mrb[29].mxu1  ;;  %1891 = vmax.xlane.f32.xlu0 %v1890_v55 }
0x1273   :  { %v2258_v58 = vadd.f32 %v2257_v56, %v7760_v20 }
0x1274   :  { %v2269_v42 = vsel %vm590_vm13, %v2263_v29, -inf }
0x1275   :  { %2270 = vmax.xlane.f32.xlu1 %v2269_v42  ;;  %v2266_v60 = vsel %vm590_vm13, %v2258_v58, -inf }
0x1276   :  { %2267 = vmax.xlane.f32.xlu0 %v2266_v60 }
0x1279   :  { %v6685_v44 = vpop.f32.mrb[30].mxu1 }
0x127a   :  { %v2453_v61 = vadd.f32 %v6685_v44, %v7757_v18  ;;  %v2447_v62 = vpop.f32.mrb[31].mxu1 }
0x127b   :  { %v2448_v5 = vadd.f32 %v2447_v62, %v7760_v20 }
0x127c   :  { %v2459_v0 = vsel %vm590_vm13, %v2453_v61, -inf }
0x127d   :  { %2460 = vmax.xlane.f32.xlu1 %v2459_v0  ;;  %v2456_v6 = vsel %vm590_vm13, %v2448_v5, -inf }
0x127e   :  { %2457 = vmax.xlane.f32.xlu0 %v2456_v6 }
0x12fa   :  { %v2002_v1 = vpop.xlane.xlu1 %2001 }
0x12fb   :  { %v2004_v36 = vsub.f32 %v1994_v39, %v2002_v1  ;;  %v1999_v2 = vpop.xlane.xlu0 %1998 }
0x12fc   :  { %v2003_v3 = vsub.f32 %v1989_v43, %v1999_v2 }
0x12fd   :  { %v2007_v7 = vmul.f32 1.442695, %v2004_v36 }
0x12fe   :  { %v2005_v10 = vmul.f32 1.442695, %v2003_v3  ;;  %v1895_v12 = vpop.xlane.xlu1 %1894 }
0x12ff   :  { %7329 = vpow2.f32 %v2007_v7  ;;  %v1897_v13 = vsub.f32 %v1887_v45, %v1895_v12  ;;  %v1892_v14 = vpop.xlane.xlu0 %1891 }
0x1300   :  { %7331 = vpow2.f32 %v2005_v10  ;;  %v1896_v18 = vsub.f32 %v1882_v51, %v1892_v14 }
0x1301   :  { %v1900_v19 = vmul.f32 1.442695, %v1897_v13 }
0x1302   :  { %v1898_v20 = vmul.f32 1.442695, %v1896_v18  ;;  %v2271_v21 = vpop.xlane.xlu1 %2270 }
0x1303   :  { %7333 = vpow2.f32 %v1900_v19  ;;  %v2273_v4 = vsub.f32 %v2263_v29, %v2271_v21  ;;  %v2268_v22 = vpop.xlane.xlu0 %2267 }
0x1304   :  { %7335 = vpow2.f32 %v1898_v20  ;;  %v2272_v23 = vsub.f32 %v2258_v58, %v2268_v22 }
0x1305   :  { %v2276_v25 = vmul.f32 1.442695, %v2273_v4 }
0x1306   :  { %v2274_v26 = vmul.f32 1.442695, %v2272_v23 }
0x1307   :  { %7337 = vpow2.f32 %v2276_v25 }
0x1308   :  { %7339 = vpow2.f32 %v2274_v26 }
0x1309   :  { %v7330_v27 = vpop.eup %7329 }
0x130a   :  { %v7332_v33 = vpop.eup %7331  ;;  %v2461_v34 = vpop.xlane.xlu1 %2460  ;;  %v2012_v35 = vsel %vm590_vm13, %v7330_v27, 0.0 }
0x130b   :  { %v2463_v37 = vsub.f32 %v2453_v61, %v2461_v34  ;;  %2013 = vadd.xlane.f32.xlu1 %v2012_v35  ;;  %v2458_v38 = vpop.xlane.xlu0 %2457  ;;  %v2009_v39 = vsel %vm590_vm13, %v7332_v33, 0.0  ;;  %v6019_v34 = vld [vmem:[%s8714_s7 + $0xe] ss:$0 sm:$0xff] }
0x130c   :  { %v2462_v40 = vsub.f32 %v2448_v5, %v2458_v38  ;;  %2010 = vadd.xlane.f32.xlu0 %v2009_v39 }
0x130d   :  { %v7334_v47 = vpop.eup %7333  ;;  %v2466_v43 = vmul.f32 1.442695, %v2463_v37 }
0x130e   :  { %v7336_v45 = vpop.eup %7335  ;;  %v2464_v46 = vmul.f32 1.442695, %v2462_v40  ;;  %v1905_v51 = vsel %vm590_vm13, %v7334_v47, 0.0 }
0x130f   :  { %7341 = vpow2.f32 %v2466_v43  ;;  %1906 = vadd.xlane.f32.xlu1 %v1905_v51  ;;  %v1902_v48 = vsel %vm590_vm13, %v7336_v45, 0.0 }
0x1310   :  { %7343 = vpow2.f32 %v2464_v46  ;;  %1903 = vadd.xlane.f32.xlu0 %v1902_v48 }
0x1311   :  { %v7338_v50 = vpop.eup %7337 }
0x1312   :  { %v7340_v54 = vpop.eup %7339  ;;  %v2281_v55 = vsel %vm590_vm13, %v7338_v50, 0.0 }
0x1313   :  { %2282 = vadd.xlane.f32.xlu1 %v2281_v55  ;;  %v2278_v29 = vsel %vm590_vm13, %v7340_v54, 0.0 }
0x1314   :  { %2279 = vadd.xlane.f32.xlu0 %v2278_v29 }
0x1319   :  { %v7342_v56 = vpop.eup %7341 }
0x131a   :  { %v7344_v58 = vpop.eup %7343  ;;  %v2471_v42 = vsel %vm590_vm13, %v7342_v56, 0.0 }
0x131b   :  { %2472 = vadd.xlane.f32.xlu1 %v2471_v42  ;;  %v2468_v60 = vsel %vm590_vm13, %v7344_v58, 0.0 }
0x131c   :  { %2469 = vadd.xlane.f32.xlu0 %v2468_v60  ;;  %v7227_v60 = vld [vmem:[%s8715_s5 + $0x10] sm:$0xff]  }
0x131d   :  { %6702 = vmatpush3.bf16.msra.mxu1 %v7227_v60 }
0x131e   :  { %6703 = vmatprep.subr.bf16.mxu1 %v7474_v63 }
0x1398   :  { %v2014_v44 = vpop.xlane.xlu1 %2013 }
0x1399   :  { %7345 = vrcp.f32 %v2014_v44  ;;  %v2011_v61 = vpop.xlane.xlu0 %2010  ;;  %v7228_v44 = vld [vmem:[%s8715_s5 + $0x18] sm:$0xff]  }
0x139a   :  { %7347 = vrcp.f32 %v2011_v61  ;;  %6704 = vmatpush3.bf16.msra.mxu1 %v7228_v44  ;;  %v7229_v61 = vld [vmem:[%s8716_s6 + $0x40] sm:$0xff]  }
0x139c   :  { %v1907_v5 = vpop.xlane.xlu1 %1906 }
0x139d   :  { %v1904_v62 = vpop.xlane.xlu0 %1903 }
0x139e   :  { %7349 = vrcp.f32 %v1904_v62  ;;  %v7230_v62 = vld [vmem:[%s8716_s6 + $0x48] sm:$0xff]  }
0x139f   :  { %7351 = vrcp.f32 %v1907_v5 }
0x13a0   :  { %v2283_v3 = vpop.xlane.xlu1 %2282 }
0x13a1   :  { %v2280_v0 = vpop.xlane.xlu0 %2279 }
0x13a2   :  { %7353 = vrcp.f32 %v2280_v0 }
0x13a3   :  { %v7346_v6 = vpop.eup %7345  ;;  %7355 = vrcp.f32 %v2283_v3 }
0x13a4   :  { %v7348_v1 = vpop.eup %7347  ;;  %v2018_v2 = vmul.f32 %v7346_v6, %v7330_v27 }
0x13a5   :  { %v2017_v36 = vmul.f32 %v7348_v1, %v7332_v33 }
0x13a7   :  { %6655 = vmatprep.mubr.msk.f32.mxu0 %vm590_vm13, %v2017_v36 }
0x13a8   :  { %v7350_v7 = vpop.eup %7349  ;;  %6656 = vmatmul.mubr.msk.f32.vlgmr.msra.gmra.mrb[26].mxu0 %vm590_vm13, %v2018_v2  ;;  %v2473_v19 = vpop.xlane.xlu1 %2472 }
0x13a9   :  { %7050 = vmatpush3.bf16.msra.mxu0 %v7994_v30  ;;  %v2470_v10 = vpop.xlane.xlu0 %2469  ;;  %v1910_v12 = vmul.f32 %v7350_v7, %v7336_v45  ;;  %v7352_v13 = vpop.eup %7351  ;;  %v6020_v7 = vld [vmem:[%s8714_s7 + $0xf] ss:$0 sm:$0xff] }
0x13aa   :  { %7058 = vmatprep.subr.bf16.mxu0 %v7996_v31  ;;  %7357 = vrcp.f32 %v2470_v10  ;;  %v1911_v18 = vmul.f32 %v7352_v13, %v7334_v47 }
0x13ab   :  { %6662 = vmatprep.mubr.msk.f32.mxu0 %vm590_vm13, %v1910_v12  ;;  %7359 = vrcp.f32 %v2473_v19 }
0x13ac   :  { %v7354_v14 = vpop.eup %7353 }
0x13ad   :  { %v2286_v20 = vmul.f32 %v7354_v14, %v7340_v54  ;;  %v7356_v30 = vpop.eup %7355 }
0x13ae   :  { %v2287_v4 = vmul.f32 %v7356_v30, %v7338_v50 }
0x13b0   :  { %6663 = vmatmul.mubr.msk.f32.vlgmr.msra.gmra.mrb[26].mxu0 %vm590_vm13, %v1911_v18  ;;  %v6021_v18 = vld [vmem:[%s8714_s7 + $0x10] ss:$0 sm:$0xff] }
0x13b1   :  { %7060 = vmatpush3.bf16.msra.mxu0 %v7996_v31  ;;  %6676 = vmatprep.mubr.msk.f32.mxu0 %vm590_vm13, %v2286_v20  ;;  %v7225_v31 = vld [vmem:[%s8713_s4 + $0x70] sm:$0xff]  }
0x13b2   :  { %7068 = vmatprep.subr.bf16.mxu0 %v8001_v32 }
0x13b4   :  { %v7358_v21 = vpop.eup %7357 }
0x13b5   :  { %v2476_v22 = vmul.f32 %v7358_v21, %v7344_v58  ;;  %v7360_v23 = vpop.eup %7359 }
0x13b6   :  { %v2477_v25 = vmul.f32 %v7360_v23, %v7342_v56  ;;  %v7233_v23 = vld [vmem:[%s8716_s6 + $0x60] sm:$0xff]  }
0x13b8   :  { %6677 = vmatmul.mubr.msk.f32.vlgmr.msra.gmra.mrb[26].mxu0 %vm590_vm13, %v2287_v4  ;;  %v7231_v4 = vld [vmem:[%s8716_s6 + $0x50] sm:$0xff]  }
0x13b9   :  { %7070 = vmatpush3.bf16.msra.mxu0 %v8001_v32  ;;  %6690 = vmatprep.mubr.msk.f32.mxu0 %vm590_vm13, %v2476_v22  ;;  %v7226_v32 = vld [vmem:[%s8713_s4 + $0x78] sm:$0xff]  }
0x13ba   :  { %6693 = vmatprep.subr.bf16.mxu0 %v7474_v63  ;;  %v7232_v22 = vld [vmem:[%s8716_s6 + $0x58] sm:$0xff]  }
0x13c0   :  { %6691 = vmatmul.mubr.msk.f32.vlgmr.msra.gmra.mrb[26].mxu0 %vm590_vm13, %v2477_v25  ;;  %v7235_v25 = vld [vmem:[%s8716_s6 + $0x70] sm:$0xff]  }
0x13c1   :  { %6694 = vmatpush3.bf16.msra.mxu0 %v7225_v31  ;;  %6697 = vmatprep.mubr.msk.bf16.mxu0 %vm7475_vm2, %v7474_v63  ;;  %v7234_v31 = vld [vmem:[%s8716_s6 + $0x68] sm:$0xff]  }
0x13c2   :  { %6695 = vmatprep.subr.bf16.mxu0 %v7474_v63 }
0x13c5   :  { %6696 = vmatpush3.bf16.msra.mxu0 %v7226_v32  ;;  %v7236_v32 = vld [vmem:[%s8716_s6 + $0x78] sm:$0xff]  }
0x13c6   :  { %6709 = vmatprep.subr.bf16.mxu0 %v7474_v63 }
0x1493   :  { %v6692_v26 = vpop.f32.mrb[26].mxu0 }
0x1494   :  { %v2552_v27 = vpop.f32.mrb[27].mxu0 }
0x1495   :  { %v2568_v33 = vpack.c.bf16 %v6692_v26, %v2552_v27  ;;  %v6027_v26 = vld [vmem:[%s8717_s8 + $0x1] ss:$0 sm:$0xff] }
0x1497   :  { %6698 = vmatmul.mubr.msk.bf16.vlgmr.msra.gmra.mrb[28].mxu0 %vm212_vm1, %v2568_v33 }
0x1498   :  { %6725 = vmatprep.mubr.msk.bf16.mxu0 %vm7475_vm2, %v7474_v63  ;;  %6710 = vmatpush3.bf16.msra.mxu0 %v7229_v61 }
0x1499   :  { %6711 = vmatprep.subr.bf16.mxu0 %v7474_v63 }
0x149c   :  { %6712 = vmatpush3.bf16.msra.mxu0 %v7230_v62 }
0x149d   :  { %6713 = vmatprep.subr.bf16.mxu0 %v7474_v63 }
0x14a0   :  { %6714 = vmatpush3.bf16.msra.mxu0 %v7231_v4 }
0x14a1   :  { %6715 = vmatprep.subr.bf16.mxu0 %v7474_v63 }
0x14a4   :  { %6716 = vmatpush3.bf16.msra.mxu0 %v7232_v22 }
0x14a5   :  { %6717 = vmatprep.subr.bf16.mxu0 %v7474_v63 }
0x14a8   :  { %6718 = vmatpush3.bf16.msra.mxu0 %v7233_v23 }
0x14a9   :  { %6719 = vmatprep.subr.bf16.mxu0 %v7474_v63 }
0x14ac   :  { %6720 = vmatpush3.bf16.msra.mxu0 %v7234_v31 }
0x14ad   :  { %6721 = vmatprep.subr.bf16.mxu0 %v7474_v63 }
0x14b0   :  { %6722 = vmatpush3.bf16.msra.mxu0 %v7235_v25 }
0x14b1   :  { %6723 = vmatprep.subr.bf16.mxu0 %v7474_v63 }
0x14b4   :  { %6724 = vmatpush3.bf16.msra.mxu0 %v7236_v32 }
0x14b5   :  { %6760 = vmatprep.subr.bf16.mxu0 %v7474_v63 }
0x156a   :  { %v2618_v35 = vpop.f32.mrb[28].mxu0 }
0x156b   :  { %v2625_v37 = vadd.f32 %v2618_v35, %v7909_v57  ;;  %v6699_v38 = vpop.f32.mrb[29].mxu0 }
0x156c   :  { %v2621_v39 = vpop.f32.mrb[30].mxu0 }
0x156d   :  { %v8072_v40 = vadd.f32 %v6019_v34, %v2625_v37  ;;  %v2626_v47 = vadd.f32 %v2621_v39, %v7912_v59  ;;  %v6700_v43 = vpop.f32.mrb[31].mxu0 }
0x156f   :  { %v8075_v45 = vadd.f32 %v6019_v34, %v2626_v47  ;;  %v2633_v46 = vsel %vm212_vm1, %v8072_v40, 0.0 }
0x1570   :  { %2634 = vadd.xlane.f32.xlu0 %v2633_v46 }
0x1571   :  { %v2636_v51 = vsel %vm212_vm1, %v8075_v45, 0.0 }
0x1572   :  { %2637 = vadd.xlane.f32.xlu1 %v2636_v51 }
0x15fd   :  { %v2635_v48 = vpop.xlane.xlu0 %2634 }
0x15fe   :  { %v2639_v50 = vmul.f32 0.03125, %v2635_v48 }
0x15ff   :  { %v2638_v57 = vpop.xlane.xlu1 %2637 }
0x1600   :  { %v2641_v54 = vsub.f32 %v8072_v40, %v2639_v50  ;;  %v2640_v55 = vmul.f32 0.03125, %v2638_v57 }
0x1602   :  { %v2642_v29 = vsub.f32 %v8075_v45, %v2640_v55  ;;  %v2643_v59 = vmul.f32 %v2641_v54, %v2641_v54 }
0x1604   :  { %v2645_v56 = vsel %vm212_vm1, %v2643_v59, 0.0  ;;  %v2644_v58 = vmul.f32 %v2642_v29, %v2642_v29 }
0x1605   :  { %2646 = vadd.xlane.f32.xlu0 %v2645_v56  ;;  %v6055_v56 = vld [vmem:[%s8714_s7 + $0x11] ss:$0 sm:$0xff] }
0x1606   :  { %v2648_v42 = vsel %vm212_vm1, %v2644_v58, 0.0 }
0x1607   :  { %2649 = vadd.xlane.f32.xlu1 %v2648_v42 }
0x1692   :  { %v2647_v5 = vpop.xlane.xlu0 %2646 }
0x1693   :  { %v2651_v0 = vmul.f32 0.03125, %v2647_v5 }
0x1694   :  { %v2650_v6 = vpop.xlane.xlu1 %2649 }
0x1695   :  { %v2653_v1 = vadd.f32 1e-05, %v2651_v0  ;;  %v2652_v36 = vmul.f32 0.03125, %v2650_v6 }
0x1697   :  { %7361 = vrsqrt.f32 %v2653_v1  ;;  %v2654_v2 = vadd.f32 1e-05, %v2652_v36 }
0x1699   :  { %7363 = vrsqrt.f32 %v2654_v2 }
0x16a1   :  { %v7362_v3 = vpop.eup %7361 }
0x16a2   :  { %v2657_v10 = vmul.f32 %v7362_v3, %v2641_v54 }
0x16a3   :  { %v7364_v12 = vpop.eup %7363 }
0x16a4   :  { %v2663_v13 = vmul.f32 %v6020_v7, %v2657_v10  ;;  %v2658_v14 = vmul.f32 %v7364_v12, %v2642_v29 }
0x16a6   :  { %v2664_v19 = vmul.f32 %v6020_v7, %v2658_v14  ;;  %v2669_v20 = vadd.f32 %v6021_v18, %v2663_v13  ;;  %v8154_v14 = vld [vmem:[%s8711_s2 + $0x18] sm:$0xff] }
0x16a8   :  { %v2670_v30 = vadd.f32 %v6021_v18, %v2664_v19 }
0x16aa   :  { %v2676_v21 = vpack.c.bf16 %v2670_v30, %v2669_v20  ;;  %v3080_v20 = vsel %vm212_vm1, %v8154_v14, 0.0  ;;  %v7477_v30 = vmov 0.0|0.0  }
0x16ab   :  { %7071 = vmatprep.subr.bf16.mxu1 %v7477_v30 }
0x16ac   :  { %6706 = vmatmul.mubr.msk.bf16.vlgmr.msra.gmra.mrb[32].mxu1 %vm212_vm1, %v2676_v21 }
0x16ad   :  { %6733 = vmatprep.mubr.msk.f32.mxu1 %vm7475_vm2, %v7474_v63 }
0x177f   :  { %v2734_v27 = vpop.f32.mrb[32].mxu1 }
0x1780   :  { %v2735_v33 = vadd.f32 %v6027_v26, %v2734_v27  ;;  %v6707_v34 = vpop.f32.mrb[33].mxu1 }
0x1781   :  { %v2737_v35 = vpop.f32.mrb[34].mxu1 }
0x1782   :  { %v2743_v37 = vmul.f32 0.70710677, %v2735_v33  ;;  %v2738_v38 = vadd.f32 %v6027_v26, %v2737_v35  ;;  %v6708_v39 = vpop.f32.mrb[35].mxu1  ;;  %v2741_v48 = vmul.f32 0.5, %v2735_v33 }
0x1784   :  { %7365 = verf.f32 %v2743_v37  ;;  %v2744_v47 = vmul.f32 0.70710677, %v2738_v38  ;;  %v2742_v50 = vmul.f32 0.5, %v2738_v38 }
0x1786   :  { %7367 = verf.f32 %v2744_v47 }
0x178e   :  { %v7366_v43 = vpop.eup %7365 }
0x178f   :  { %v2747_v46 = vadd.f32 1.0, %v7366_v43 }
0x1790   :  { %v7368_v51 = vpop.eup %7367 }
0x1791   :  { %v2748_v57 = vadd.f32 1.0, %v7368_v51  ;;  %v2749_v54 = vmul.f32 %v2747_v46, %v2741_v48  ;;  %v6056_v46 = vld [vmem:[%s8712_s3 + $0x2] ss:$0 sm:$0xff] }
0x1793   :  { %v2750_v55 = vmul.f32 %v2748_v57, %v2742_v50 }
0x1795   :  { %v2768_v29 = vpack.c.bf16 %v2750_v55, %v2749_v54  ;;  %v6057_v54 = vld [vmem:[%s8712_s3 + $0x3] ss:$0 sm:$0xff]  ;;  %v2906_v55 = vmul.u32 8, %v7731_v8 }
0x1797   :  { %6726 = vmatmul.mubr.bf16.vlgmr.msra.gmra.mrb[32].mxu0 %v2768_v29  ;;  %vm2907_vm14 = vcmp.eq.s32.totalorder %v7650_v24, %v2906_v55  ;;  %v7238_v24 = vld [vmem:[%s8713_s4 + $0xa8] sm:$0xff]  }
0x1798   :  { %6764 = vmatprep.mubr.msk.bf16.mxu0 %vm7475_vm2, %v7474_v63 }
0x186a   :  { %v2851_v59 = vpop.f32.mrb[32].mxu0 }
0x186b   :  { %v2858_v58 = vadd.f32 %v2851_v59, %v8072_v40  ;;  %v6727_v42 = vpop.f32.mrb[33].mxu0 }
0x186c   :  { %v2854_v60 = vpop.f32.mrb[34].mxu0  ;;  %v6058_v42 = vsel %vm2907_vm14, 1.0, %v7474_v63 }
0x186d   :  { %v2859_v44 = vadd.f32 %v2854_v60, %v8075_v45  ;;  %v6728_v61 = vpop.f32.mrb[35].mxu0  ;;  %v2864_v62 = vadd.f32 %v6055_v56, %v2858_v58  ;;  %v8148_v45 = vld [vmem:[%s8711_s2 + $0x10] sm:$0xff]  ;;  %v7237_v60 = vld [vmem:[%s8713_s4 + $0xa0] sm:$0xff]  }
0x186e   :  { %v3077_v19 = vsel %vm212_vm1, %v8148_v45, 0.0  ;;  %6761 = vmatpush3.bf16.msra.mxu0 %v7237_v60  ;;  %v7240_v61 = vld [vmem:[%s8718_s9 + $0x8] sm:$0xff]  }
0x186f   :  { %v2868_v5 = vsel %vm212_vm1, %v2864_v62, 0.0  ;;  %v2865_v0 = vadd.f32 %v6055_v56, %v2859_v44  ;;  %6762 = vmatprep.subr.bf16.mxu0 %v7474_v63  ;;  %v7239_v44 = vld [vmem:[%s8718_s9] sm:$0xff]  }
0x1870   :  { %2869 = vadd.xlane.f32.xlu0 %v2868_v5 }
0x1871   :  { %v2871_v6 = vsel %vm212_vm1, %v2865_v0, 0.0 }
0x1872   :  { %2872 = vadd.xlane.f32.xlu1 %v2871_v6  ;;  %6763 = vmatpush3.bf16.msra.mxu0 %v7238_v24 }
0x18fd   :  { %v2870_v1 = vpop.xlane.xlu0 %2869 }
0x18fe   :  { %v2874_v36 = vmul.f32 0.03125, %v2870_v1 }
0x18ff   :  { %v2873_v2 = vpop.xlane.xlu1 %2872 }
0x1900   :  { %v2876_v3 = vsub.f32 %v2864_v62, %v2874_v36  ;;  %v2875_v7 = vmul.f32 0.03125, %v2873_v2 }
0x1902   :  { %v2877_v10 = vsub.f32 %v2865_v0, %v2875_v7  ;;  %v2878_v40 = vmul.f32 %v2876_v3, %v2876_v3 }
0x1904   :  { %v2880_v12 = vsel %vm212_vm1, %v2878_v40, 0.0  ;;  %v2879_v13 = vmul.f32 %v2877_v10, %v2877_v10 }
0x1905   :  { %2881 = vadd.xlane.f32.xlu0 %v2880_v12 }
0x1906   :  { %v2883_v18 = vsel %vm212_vm1, %v2879_v13, 0.0  ;;  %v6064_v13 = vld [vmem:[%s8714_s7 + $0x13] ss:$0 sm:$0xff] }
0x1907   :  { %2884 = vadd.xlane.f32.xlu1 %v2883_v18 }
0x1909   :  { %3078 = vadd.xlane.f32.xlu0 %v3077_v19 }
0x190b   :  { %3081 = vadd.xlane.f32.xlu1 %v3080_v20 }
0x1992   :  { %v2882_v21 = vpop.xlane.xlu0 %2881 }
0x1993   :  { %v2886_v4 = vmul.f32 0.03125, %v2882_v21 }
0x1994   :  { %v2885_v22 = vpop.xlane.xlu1 %2884 }
0x1995   :  { %v2888_v23 = vadd.f32 1e-05, %v2886_v4  ;;  %v2887_v31 = vmul.f32 0.03125, %v2885_v22  ;;  %v7241_v22 = vld [vmem:[%s8713_s4 + $0x80] sm:$0xff]  }
0x1996   :  { %v3079_v25 = vpop.xlane.xlu0 %3078 }
0x1997   :  { %7369 = vrsqrt.f32 %v2888_v23  ;;  %v2889_v32 = vadd.f32 1e-05, %v2887_v31  ;;  %v3083_v26 = vmul.f32 0.03125, %v3079_v25  ;;  %v7242_v25 = vld [vmem:[%s8713_s4 + $0x88] sm:$0xff]  }
0x1998   :  { %v3082_v27 = vpop.xlane.xlu1 %3081 }
0x1999   :  { %7371 = vrsqrt.f32 %v2889_v32  ;;  %v3085_v33 = vsub.f32 %v8148_v45, %v3083_v26  ;;  %v3084_v34 = vmul.f32 0.03125, %v3082_v27  ;;  %v7243_v32 = vld [vmem:[%s8713_s4 + $0x90] sm:$0xff]   ;;  %v7244_v26 = vld [vmem:[%s8713_s4 + $0x98] sm:$0xff]  }
0x199a   :  { %v6085_v27 = vld [vmem:[%s8714_s7 + $0x16] ss:$0 sm:$0xff] }
0x199b   :  { %v3086_v35 = vsub.f32 %v8154_v14, %v3084_v34  ;;  %v3087_v37 = vmul.f32 %v3085_v33, %v3085_v33 }
0x199d   :  { %v3089_v38 = vsel %vm212_vm1, %v3087_v37, 0.0  ;;  %v3088_v39 = vmul.f32 %v3086_v35, %v3086_v35 }
0x199e   :  { %3090 = vadd.xlane.f32.xlu0 %v3089_v38 }
0x199f   :  { %v3092_v47 = vsel %vm212_vm1, %v3088_v39, 0.0 }
0x19a0   :  { %3093 = vadd.xlane.f32.xlu1 %v3092_v47 }
0x19a1   :  { %v7370_v43 = vpop.eup %7369 }
0x19a2   :  { %v2892_v51 = vmul.f32 %v7370_v43, %v2876_v3  ;;  %v6063_v3 = vld [vmem:[%s8714_s7 + $0x12] ss:$0 sm:$0xff] }
0x19a3   :  { %v7372_v48 = vpop.eup %7371 }
0x19a4   :  { %v2893_v50 = vmul.f32 %v7372_v48, %v2877_v10  ;;  %v2898_v57 = vmul.f32 %v6056_v46, %v2892_v51 }
0x19a6   :  { %v2899_v29 = vmul.f32 %v6056_v46, %v2893_v50  ;;  %v2904_v59 = vadd.f32 %v6057_v54, %v2898_v57 }
0x19a8   :  { %v2905_v56 = vadd.f32 %v6057_v54, %v2899_v29 }
0x19aa   :  { %v7072_v58 = vpack.c.bf16 %v2905_v56, %v2904_v59 }
0x19ac   :  { %7073 = vmatpush3.bf16.msra.mxu1 %v7072_v58 }
0x19ad   :  { %6736 = vmatprep.subr.bf16.mxu1 %v7474_v63 }
0x19af   :  { %6734 = vmatmul.mubr.msk.f32.vlgmr.msra.gmra.mrb[36].mxu1 %vm590_vm13, %v6058_v42 }
0x19b0   :  { %6740 = vmatprep.mubr.msk.bf16.mxu1 %vm7475_vm2, %v7474_v63  ;;  %6737 = vmatpush3.bf16.msra.mxu1 %v7239_v44  ;;  %v6069_v44 = vld [vmem:[%s8714_s7 + $0x14] ss:$0 sm:$0xff] }
0x19b1   :  { %6738 = vmatprep.subr.bf16.mxu1 %v7474_v63 }
0x19b4   :  { %6739 = vmatpush3.bf16.msra.mxu1 %v7240_v61 }
0x19b5   :  { %6744 = vmatprep.subr.bf16.mxu1 %v7474_v63 }
0x1a2b   :  { %v3091_v62 = vpop.xlane.xlu0 %3090 }
0x1a2c   :  { %v3095_v5 = vmul.f32 0.03125, %v3091_v62 }
0x1a2d   :  { %v3094_v0 = vpop.xlane.xlu1 %3093 }
0x1a2e   :  { %v3097_v6 = vadd.f32 1e-05, %v3095_v5  ;;  %v3096_v1 = vmul.f32 0.03125, %v3094_v0 }
0x1a30   :  { %7373 = vrsqrt.f32 %v3097_v6  ;;  %v3098_v36 = vadd.f32 1e-05, %v3096_v1 }
0x1a32   :  { %7375 = vrsqrt.f32 %v3098_v36 }
0x1a3a   :  { %v7374_v2 = vpop.eup %7373 }
0x1a3b   :  { %v3101_v7 = vmul.f32 %v7374_v2, %v3085_v33  ;;  %v6077_v2 = vld [vmem:[%s8714_s7 + $0x15] ss:$0 sm:$0xff] }
0x1a3c   :  { %v7376_v10 = vpop.eup %7375 }
0x1a3d   :  { %v3107_v40 = vmul.f32 %v6063_v3, %v3101_v7  ;;  %v3102_v12 = vmul.f32 %v7376_v10, %v3086_v35 }
0x1a3f   :  { %v3108_v18 = vmul.f32 %v6063_v3, %v3102_v12  ;;  %v3113_v19 = vadd.f32 %v6064_v13, %v3107_v40 }
0x1a41   :  { %v3114_v20 = vadd.f32 %v6064_v13, %v3108_v18 }
0x1a43   :  { %v3120_v21 = vpack.c.bf16 %v3114_v20, %v3113_v19 }
0x1a45   :  { %6765 = vmatmul.mubr.msk.bf16.vlgmr.msra.gmra.mrb[36].mxu0 %vm212_vm1, %v3120_v21 }
0x1a82   :  { %v2979_v4 = vpop.f32.mrb[36].mxu1 }
0x1a83   :  { %v2987_v23 = vpack.c.bf16 %v2979_v4, %v2979_v4  ;;  %v6735_v31 = vpop.f32.mrb[37].mxu1 }
0x1a84   :  { %v3060_v31 = vand.u32 7, %v7731_v8 }
0x1a85   :  { %6741 = vmatmul.mubr.msk.bf16.vlgmr.msra.gmra.mrb[40].mxu1 %vm212_vm1, %v2987_v23  ;;  %v3061_v23 = vand.u32 7, %v7734_v9 }
0x1a86   :  { %6745 = vmatpush3.bf16.msra.mxu1 %v7241_v22  ;;  %6748 = vmatprep.mubr.msk.bf16.mxu1 %vm7475_vm2, %v7474_v63  ;;  %vm3062_vm0 = vcmp.le.s32.totalorder %v7738_v11, %v3060_v31 }
0x1a87   :  { %6746 = vmatprep.subr.bf16.mxu1 %v7474_v63  ;;  %vm3063_vm15 = vcmp.le.s32.totalorder %v7738_v11, %v3061_v23  ;;  %vm3064_vm5 = vmand %vm7748_vm10, %vm3062_vm0 }
0x1a88   :  { %vm3065_vm3 = vmand %vm7742_vm8, %vm3063_vm15  ;;  %vm5865_vm8 = vcmask 1043456  }
0x1a8a   :  { %6747 = vmatpush3.bf16.msra.mxu1 %v7242_v25  ;;  %v8303_v25 = vsel %vm3065_vm3, 0.0, %v7476_v17 }
0x1a8b   :  { %6752 = vmatprep.subr.bf16.mxu1 %v7474_v63 }
0x1a8d   :  { %6749 = vmatmul.mubr.msk.bf16.vlgmr.msra.gmra.mrb[44].mxu1 %vm212_vm1, %v3120_v21 }
0x1a8e   :  { %6753 = vmatpush3.bf16.msra.mxu1 %v7243_v32  ;;  %6756 = vmatprep.mubr.msk.bf16.mxu1 %vm7475_vm2, %v7474_v63  ;;  %v8306_v32 = vsel %vm3064_vm5, 0.0, %v7476_v17 }
0x1a8f   :  { %6754 = vmatprep.subr.bf16.mxu1 %v7474_v63 }
0x1a92   :  { %6755 = vmatpush3.bf16.msra.mxu1 %v7244_v26 }
0x1a95   :  { %6757 = vmatmul.mubr.msk.bf16.vlgmr.msra.gmra.mrb[48].mxu1 %vm212_vm1, %v3120_v21 }
0x1b18   :  { %v3298_v33 = vpop.f32.mrb[36].mxu0 }
0x1b19   :  { %v3299_v34 = vadd.f32 %v6085_v27, %v3298_v33  ;;  %v6766_v35 = vpop.f32.mrb[37].mxu0 }
0x1b1a   :  { %v3301_v37 = vpop.f32.mrb[38].mxu0 }
0x1b1b   :  { %v3302_v38 = vadd.f32 %v6085_v27, %v3301_v37  ;;  %v6767_v39 = vpop.f32.mrb[39].mxu0  ;;  %v3523_v47 = vmul.f32 %v7696_v49, %v3299_v34  ;;  %v3416_v43 = vmul.f32 %v7660_v28, %v3299_v34  ;;  %v3792_v46 = vmul.f32 %v7699_v52, %v3299_v34 }
0x1b1c   :  { %v3982_v51 = vmul.f32 %v7702_v53, %v3299_v34 }
0x1b1d   :  { %v3524_v48 = vmul.f32 %v7696_v49, %v3302_v38  ;;  %v3417_v50 = vmul.f32 %v7660_v28, %v3302_v38  ;;  %v3793_v57 = vmul.f32 %v7699_v52, %v3302_v38  ;;  %v3983_v54 = vmul.f32 %v7702_v53, %v3302_v38 }
0x1b1f   :  { %v7086_v55 = vpack.c.bf16 %v3524_v48, %v3523_v47  ;;  %v8234_v29 = vpack.c.bf16 %v3417_v50, %v3416_v43  ;;  %v8236_v59 = vpack.c.bf16 %v3793_v57, %v3792_v46  ;;  %v8238_v56 = vpack.c.bf16 %v3983_v54, %v3982_v51 }
0x1b58   :  { %v8240_v58 = vpop.f32.mrb[40].mxu1 }
0x1b59   :  { %v6742_v42 = vpop.f32.mrb[41].mxu1 }
0x1b5a   :  { %v3040_v60 = vpop.f32.mrb[42].mxu1 }
0x1b5b   :  { %v6743_v24 = vpop.f32.mrb[43].mxu1 }
0x1b60   :  { %v3174_v61 = vpop.f32.mrb[44].mxu1 }
0x1b61   :  { %v8245_v62 = vadd.f32 %v6069_v44, %v3174_v61  ;;  %v6750_v5 = vpop.f32.mrb[45].mxu1 }
0x1b62   :  { %v3177_v0 = vpop.f32.mrb[46].mxu1 }
0x1b63   :  { %v6751_v6 = vpop.f32.mrb[47].mxu1  ;;  %v3305_v1 = vmul.f32 %v7660_v28, %v8245_v62  ;;  %v3418_v36 = vmul.f32 %v7696_v49, %v8245_v62  ;;  %v8270_v19 = vadd.f32 %v6069_v44, %v3177_v0  ;;  %v3687_v4 = vmul.f32 %v7699_v52, %v8245_v62 }
0x1b65   :  { %6772 = vmatprep.mubr.msk.f32.mxu1 %vm212_vm1, %v3305_v1  ;;  %6779 = vmatprep.mubr.msk.f32.mxu0 %vm212_vm1, %v3418_v36  ;;  %v3306_v20 = vmul.f32 %v7660_v28, %v8270_v19  ;;  %v3419_v21 = vmul.f32 %v7696_v49, %v8270_v19  ;;  %v3688_v22 = vmul.f32 %v7699_v52, %v8270_v19 }
0x1b68   :  { %v3236_v3 = vpop.f32.mrb[48].mxu1 }
0x1b69   :  { %v6758_v7 = vpop.f32.mrb[49].mxu1  ;;  %v3237_v40 = vadd.f32 %v6077_v2, %v3236_v3 }
0x1b6a   :  { %v3239_v10 = vpop.f32.mrb[50].mxu1 }
0x1b6b   :  { %v3240_v12 = vadd.f32 %v6077_v2, %v3239_v10  ;;  %v6759_v13 = vpop.f32.mrb[51].mxu1 }
0x1b6d   :  { %v8256_v18 = vpack.c.bf16 %v3240_v12, %v3237_v40 }
0x1b6f   :  { %7076 = vmatprep.subr.msk.bf16.mxu1 %vm7672_vm4, %v8256_v18  ;;  %7082 = vmatprep.subr.msk.bf16.mxu0 %vm7672_vm4, %v8256_v18 }
0x1b70   :  { %7079 = vmatpush3.bf16.xpose.msk.msra.mxu1 %vm7672_vm4, %v8256_v18  ;;  %7085 = vmatpush3.bf16.xpose.msk.msra.mxu0 %vm7672_vm4, %v8256_v18 }
0x1b71   :  { %7087 = vmatprep.subr.bf16.mxu1 %v7086_v55  ;;  %7096 = vmatprep.subr.msk.bf16.mxu0 %vm7672_vm4, %v8256_v18 }
0x1b77   :  { %6773 = vmatmul.mubr.msk.f32.vlgmr.msra.gmra.mrb[38].mxu1 %vm212_vm1, %v3306_v20  ;;  %6780 = vmatmul.mubr.msk.f32.vlgmr.msra.gmra.mrb[40].mxu0 %vm212_vm1, %v3419_v21 }
0x1b78   :  { %7089 = vmatpush3.bf16.msra.mxu1 %v7086_v55  ;;  %7099 = vmatpush3.bf16.xpose.msk.msra.mxu0 %vm7672_vm4, %v8256_v18 }
0x1b79   :  { %6800 = vmatprep.mubr.msk.f32.mxu0 %vm212_vm1, %v3687_v4  ;;  %7091 = vmatprep.subr.bf16.mxu1 %v8234_v29 }
0x1b7a   :  { %6824 = vmatprep.subr.bf16.mxu0 %v7474_v63 }
0x1b7f   :  { %6801 = vmatmul.mubr.msk.f32.vlgmr.msra.gmra.mrb[42].mxu0 %vm212_vm1, %v3688_v22 }
0x1b80   :  { %6828 = vmatprep.mubr.msk.bf16.mxu0 %vm7475_vm2, %v7474_v63 }
0x1c4a   :  { %v6774_v26 = vpop.f32.mrb[38].mxu1  ;;  %v6781_v9 = vpop.f32.mrb[40].mxu0 }
0x1c4b   :  { %v3498_v8 = vadd.f32 %v6781_v9, %v8303_v25  ;;  %v3385_v27 = vpop.f32.mrb[39].mxu1  ;;  %v3492_v33 = vpop.f32.mrb[41].mxu0  ;;  %v3391_v15 = vadd.f32 %v6774_v26, %v8303_v25 }
0x1c4c   :  { %v3493_v11 = vadd.f32 %v3492_v33, %v8306_v32  ;;  %v3386_v16 = vadd.f32 %v3385_v27, %v8306_v32 }
0x1c4d   :  { %v3504_v34 = vsel %vm590_vm13, %v3498_v8, -inf  ;;  %v3397_v17 = vsel %vm590_vm13, %v3391_v15, -inf }
0x1c4e   :  { %3505 = vmax.xlane.f32.xlu1 %v3504_v34  ;;  %v3501_v35 = vsel %vm590_vm13, %v3493_v11, -inf  ;;  %v3394_v38 = vsel %vm590_vm13, %v3386_v16, -inf }
0x1c4f   :  { %3502 = vmax.xlane.f32.xlu0 %v3501_v35 }
0x1c52   :  { %3398 = vmax.xlane.f32.xlu1 %v3397_v17  ;;  %v6802_v37 = vpop.f32.mrb[42].mxu0 }
0x1c53   :  { %v3767_v39 = vadd.f32 %v6802_v37, %v8303_v25  ;;  %v3761_v47 = vpop.f32.mrb[43].mxu0  ;;  %3395 = vmax.xlane.f32.xlu0 %v3394_v38 }
0x1c54   :  { %v3762_v43 = vadd.f32 %v3761_v47, %v8306_v32 }
0x1c55   :  { %v3773_v46 = vsel %vm590_vm13, %v3767_v39, -inf }
0x1c56   :  { %3774 = vmax.xlane.f32.xlu1 %v3773_v46  ;;  %v3770_v51 = vsel %vm590_vm13, %v3762_v43, -inf }
0x1c57   :  { %3771 = vmax.xlane.f32.xlu0 %v3770_v51 }
0x1cdb   :  { %v3506_v48 = vpop.xlane.xlu1 %3505 }
0x1cdc   :  { %v3508_v50 = vsub.f32 %v3498_v8, %v3506_v48  ;;  %v3503_v57 = vpop.xlane.xlu0 %3502 }
0x1cdd   :  { %v3507_v54 = vsub.f32 %v3493_v11, %v3503_v57 }
0x1cde   :  { %v3511_v55 = vmul.f32 1.442695, %v3508_v50  ;;  %v3877_v50 = vmul.f32 %v7702_v53, %v8245_v62 }
0x1cdf   :  { %v3509_v42 = vmul.f32 1.442695, %v3507_v54  ;;  %v3399_v60 = vpop.xlane.xlu1 %3398 }
0x1ce0   :  { %7377 = vpow2.f32 %v3511_v55  ;;  %v3401_v24 = vsub.f32 %v3391_v15, %v3399_v60  ;;  %v3396_v44 = vpop.xlane.xlu0 %3395 }
0x1ce1   :  { %7379 = vpow2.f32 %v3509_v42  ;;  %v3400_v61 = vsub.f32 %v3386_v16, %v3396_v44 }
0x1ce2   :  { %v3404_v5 = vmul.f32 1.442695, %v3401_v24 }
0x1ce3   :  { %v3402_v0 = vmul.f32 1.442695, %v3400_v61  ;;  %v3775_v6 = vpop.xlane.xlu1 %3774 }
0x1ce4   :  { %7381 = vpow2.f32 %v3404_v5  ;;  %v3777_v1 = vsub.f32 %v3767_v39, %v3775_v6  ;;  %v3772_v36 = vpop.xlane.xlu0 %3771 }
0x1ce5   :  { %7383 = vpow2.f32 %v3402_v0  ;;  %v3776_v2 = vsub.f32 %v3762_v43, %v3772_v36  ;;  %v7245_v36 = vld [vmem:[%s8713_s4 + $0xb0] sm:$0xff]  }
0x1ce6   :  { %v3780_v3 = vmul.f32 1.442695, %v3777_v1  ;;  %6825 = vmatpush3.bf16.msra.mxu0 %v7245_v36  ;;  %v7252_v36 = vld [vmem:[%s8716_s6 + $0x98] sm:$0xff]  }
0x1ce7   :  { %v3778_v7 = vmul.f32 1.442695, %v3776_v2  ;;  %6826 = vmatprep.subr.bf16.mxu0 %v7474_v63 }
0x1ce8   :  { %7385 = vpow2.f32 %v3780_v3 }
0x1ce9   :  { %7387 = vpow2.f32 %v3778_v7 }
0x1cea   :  { %v7378_v10 = vpop.eup %7377 }
0x1ceb   :  { %v7380_v40 = vpop.eup %7379  ;;  %v3516_v12 = vsel %vm590_vm13, %v7378_v10, 0.0 }
0x1cec   :  { %3517 = vadd.xlane.f32.xlu1 %v3516_v12  ;;  %v3513_v13 = vsel %vm590_vm13, %v7380_v40, 0.0 }
0x1ced   :  { %3514 = vadd.xlane.f32.xlu0 %v3513_v13  ;;  %v7246_v13 = vld [vmem:[%s8713_s4 + $0xb8] sm:$0xff]  }
0x1cee   :  { %v7382_v20 = vpop.eup %7381  ;;  %6827 = vmatpush3.bf16.msra.mxu0 %v7246_v13 }
0x1cef   :  { %v7384_v21 = vpop.eup %7383  ;;  %v3409_v4 = vsel %vm590_vm13, %v7382_v20, 0.0  ;;  %6832 = vmatprep.subr.bf16.mxu0 %v7474_v63 }
0x1cf0   :  { %3410 = vadd.xlane.f32.xlu1 %v3409_v4  ;;  %v3406_v22 = vsel %vm590_vm13, %v7384_v21, 0.0 }
0x1cf1   :  { %3407 = vadd.xlane.f32.xlu0 %v3406_v22  ;;  %v6120_v22 = vld [vmem:[%s8714_s7 + $0x17] ss:$0 sm:$0xff] }
0x1cf2   :  { %v7386_v23 = vpop.eup %7385 }
0x1cf3   :  { %v7388_v31 = vpop.eup %7387  ;;  %v3785_v26 = vsel %vm590_vm13, %v7386_v23, 0.0 }
0x1cf4   :  { %3786 = vadd.xlane.f32.xlu1 %v3785_v26  ;;  %v3782_v9 = vsel %vm590_vm13, %v7388_v31, 0.0 }
0x1cf5   :  { %3783 = vadd.xlane.f32.xlu0 %v3782_v9 }
0x1d79   :  { %v3518_v8 = vpop.xlane.xlu1 %3517 }
0x1d7a   :  { %7389 = vrcp.f32 %v3518_v8  ;;  %v3515_v27 = vpop.xlane.xlu0 %3514 }
0x1d7b   :  { %7391 = vrcp.f32 %v3515_v27 }
0x1d7d   :  { %v3411_v11 = vpop.xlane.xlu1 %3410 }
0x1d7e   :  { %v3408_v33 = vpop.xlane.xlu0 %3407 }
0x1d7f   :  { %7393 = vrcp.f32 %v3408_v33 }
0x1d80   :  { %7395 = vrcp.f32 %v3411_v11 }
0x1d81   :  { %v3787_v37 = vpop.xlane.xlu1 %3786 }
0x1d82   :  { %v3784_v15 = vpop.xlane.xlu0 %3783 }
0x1d83   :  { %7397 = vrcp.f32 %v3784_v15 }
0x1d84   :  { %v7390_v34 = vpop.eup %7389  ;;  %7399 = vrcp.f32 %v3787_v37 }
0x1d85   :  { %v7392_v16 = vpop.eup %7391  ;;  %v3522_v17 = vmul.f32 %v7390_v34, %v7378_v10 }
0x1d86   :  { %v3521_v35 = vmul.f32 %v7392_v16, %v7380_v40 }
0x1d88   :  { %6786 = vmatprep.mubr.msk.f32.mxu1 %vm590_vm13, %v3521_v35 }
0x1d89   :  { %v7394_v38 = vpop.eup %7393  ;;  %6787 = vmatmul.mubr.msk.f32.vlgmr.msra.gmra.mrb[52].mxu1 %vm590_vm13, %v3522_v17 }
0x1d8a   :  { %7093 = vmatpush3.bf16.msra.mxu1 %v8234_v29  ;;  %v3414_v39 = vmul.f32 %v7394_v38, %v7384_v21  ;;  %v7396_v47 = vpop.eup %7395 }
0x1d8b   :  { %7101 = vmatprep.subr.bf16.mxu1 %v8236_v59  ;;  %v3415_v46 = vmul.f32 %v7396_v47, %v7382_v20 }
0x1d8c   :  { %6793 = vmatprep.mubr.msk.f32.mxu1 %vm590_vm13, %v3414_v39 }
0x1d8d   :  { %v7398_v43 = vpop.eup %7397 }
0x1d8e   :  { %v3790_v51 = vmul.f32 %v7398_v43, %v7388_v31  ;;  %v7400_v29 = vpop.eup %7399 }
0x1d8f   :  { %v3791_v48 = vmul.f32 %v7400_v29, %v7386_v23  ;;  %v7249_v29 = vld [vmem:[%s8716_s6 + $0x80] sm:$0xff]  }
0x1d91   :  { %6794 = vmatmul.mubr.msk.f32.vlgmr.msra.gmra.mrb[52].mxu1 %vm590_vm13, %v3415_v46  ;;  %v7247_v46 = vld [vmem:[%s8715_s5 + $0x20] sm:$0xff]  }
0x1d92   :  { %7103 = vmatpush3.bf16.msra.mxu1 %v8236_v59  ;;  %6807 = vmatprep.mubr.msk.f32.mxu1 %vm590_vm13, %v3790_v51  ;;  %v3878_v59 = vmul.f32 %v7702_v53, %v8270_v19  ;;  %v7248_v51 = vld [vmem:[%s8715_s5 + $0x28] sm:$0xff]  }
0x1d93   :  { %7106 = vmatprep.subr.msk.bf16.mxu1 %vm7672_vm4, %v8256_v18 }
0x1d99   :  { %6808 = vmatmul.mubr.msk.f32.vlgmr.msra.gmra.mrb[52].mxu1 %vm590_vm13, %v3791_v48  ;;  %v7250_v48 = vld [vmem:[%s8716_s6 + $0x88] sm:$0xff]  }
0x1d9a   :  { %6814 = vmatprep.mubr.msk.f32.mxu1 %vm212_vm1, %v3877_v50 }
0x1d9b   :  { %7109 = vmatpush3.bf16.xpose.msk.msra.mxu1 %vm7672_vm4, %v8256_v18 }
0x1d9c   :  { %7111 = vmatprep.subr.bf16.mxu1 %v8238_v56 }
0x1da2   :  { %6815 = vmatmul.mubr.msk.f32.vlgmr.msra.gmra.mrb[54].mxu1 %vm212_vm1, %v3878_v59 }
0x1da3   :  { %7113 = vmatpush3.bf16.msra.mxu1 %v8238_v56 }
0x1da4   :  { %6840 = vmatprep.subr.bf16.mxu1 %v7474_v63 }
0x1e75   :  { %v6816_v62 = vpop.f32.mrb[54].mxu1 }
0x1e76   :  { %v3957_v57 = vadd.f32 %v6816_v62, %v8303_v25  ;;  %v3951_v54 = vpop.f32.mrb[55].mxu1 }
0x1e77   :  { %v3952_v55 = vadd.f32 %v3951_v54, %v8306_v32 }
0x1e78   :  { %v3963_v42 = vsel %vm590_vm13, %v3957_v57, -inf }
0x1e79   :  { %3964 = vmax.xlane.f32.xlu1 %v3963_v42  ;;  %v3960_v18 = vsel %vm590_vm13, %v3952_v55, -inf }
0x1e7a   :  { %3961 = vmax.xlane.f32.xlu0 %v3960_v18  ;;  %v6121_v18 = vld [vmem:[%s8714_s7 + $0x18] ss:$0 sm:$0xff] }
0x1f06   :  { %v3965_v60 = vpop.xlane.xlu1 %3964 }
0x1f07   :  { %v3967_v19 = vsub.f32 %v3957_v57, %v3965_v60  ;;  %v3962_v24 = vpop.xlane.xlu0 %3961 }
0x1f08   :  { %v3966_v44 = vsub.f32 %v3952_v55, %v3962_v24 }
0x1f09   :  { %v3970_v61 = vmul.f32 1.442695, %v3967_v19 }
0x1f0a   :  { %v3968_v56 = vmul.f32 1.442695, %v3966_v44 }
0x1f0b   :  { %7401 = vpow2.f32 %v3970_v61  ;;  %v6122_v61 = vld [vmem:[%s8714_s7 + $0x19] ss:$0 sm:$0xff] }
0x1f0c   :  { %7403 = vpow2.f32 %v3968_v56 }
0x1f15   :  { %v7402_v5 = vpop.eup %7401 }
0x1f16   :  { %v7404_v0 = vpop.eup %7403  ;;  %v3975_v6 = vsel %vm590_vm13, %v7402_v5, 0.0 }
0x1f17   :  { %3976 = vadd.xlane.f32.xlu1 %v3975_v6  ;;  %v3972_v1 = vsel %vm590_vm13, %v7404_v0, 0.0 }
0x1f18   :  { %3973 = vadd.xlane.f32.xlu0 %v3972_v1  ;;  %v7251_v1 = vld [vmem:[%s8716_s6 + $0x90] sm:$0xff]  }
0x1fa4   :  { %v3977_v2 = vpop.xlane.xlu1 %3976 }
0x1fa5   :  { %7405 = vrcp.f32 %v3977_v2  ;;  %v3974_v3 = vpop.xlane.xlu0 %3973  ;;  %v7253_v2 = vld [vmem:[%s8716_s6 + $0xa0] sm:$0xff]  }
0x1fa6   :  { %7407 = vrcp.f32 %v3974_v3  ;;  %v7254_v3 = vld [vmem:[%s8716_s6 + $0xa8] sm:$0xff]  }
0x1faf   :  { %v7406_v7 = vpop.eup %7405 }
0x1fb0   :  { %v7408_v10 = vpop.eup %7407  ;;  %v3981_v12 = vmul.f32 %v7406_v7, %v7402_v5  ;;  %v7255_v7 = vld [vmem:[%s8716_s6 + $0xb0] sm:$0xff]  }
0x1fb1   :  { %v3980_v40 = vmul.f32 %v7408_v10, %v7404_v0  ;;  %v7256_v10 = vld [vmem:[%s8716_s6 + $0xb8] sm:$0xff]  }
0x1fb3   :  { %6821 = vmatprep.mubr.msk.f32.mxu1 %vm590_vm13, %v3980_v40  ;;  %v6128_v40 = vld [vmem:[%s8717_s8 + $0x2] ss:$0 sm:$0xff] }
0x1fb4   :  { %6822 = vmatmul.mubr.msk.f32.vlgmr.msra.gmra.mrb[52].mxu1 %vm590_vm13, %v3981_v12 }
0x1fb5   :  { %6856 = vmatprep.mubr.msk.bf16.mxu1 %vm7475_vm2, %v7474_v63  ;;  %6841 = vmatpush3.bf16.msra.mxu1 %v7249_v29 }
0x1fb6   :  { %6842 = vmatprep.subr.bf16.mxu1 %v7474_v63 }
0x1fb9   :  { %6843 = vmatpush3.bf16.msra.mxu1 %v7250_v48 }
0x1fba   :  { %6844 = vmatprep.subr.bf16.mxu1 %v7474_v63 }
0x1fbd   :  { %6845 = vmatpush3.bf16.msra.mxu1 %v7251_v1  ;;  %v6157_v1 = vld [vmem:[%s8714_s7 + $0x1b] ss:$0 sm:$0xff] }
0x1fbe   :  { %6846 = vmatprep.subr.bf16.mxu1 %v7474_v63 }
0x1fc1   :  { %6847 = vmatpush3.bf16.msra.mxu1 %v7252_v36 }
0x1fc2   :  { %6848 = vmatprep.subr.bf16.mxu1 %v7474_v63 }
0x1fc5   :  { %6849 = vmatpush3.bf16.msra.mxu1 %v7253_v2 }
0x1fc6   :  { %6850 = vmatprep.subr.bf16.mxu1 %v7474_v63 }
0x1fc9   :  { %6851 = vmatpush3.bf16.msra.mxu1 %v7254_v3 }
0x1fca   :  { %6852 = vmatprep.subr.bf16.mxu1 %v7474_v63 }
0x1fcd   :  { %6853 = vmatpush3.bf16.msra.mxu1 %v7255_v7 }
0x1fce   :  { %6854 = vmatprep.subr.bf16.mxu1 %v7474_v63 }
0x1fd1   :  { %6855 = vmatpush3.bf16.msra.mxu1 %v7256_v10  ;;  %v6158_v10 = vld [vmem:[%s8714_s7 + $0x1c] ss:$0 sm:$0xff] }
0x2087   :  { %v6823_v20 = vpop.f32.mrb[52].mxu1 }
0x2088   :  { %v4056_v21 = vpop.f32.mrb[53].mxu1 }
0x2089   :  { %v4072_v4 = vpack.c.bf16 %v6823_v20, %v4056_v21 }
0x208b   :  { %6829 = vmatmul.mubr.msk.bf16.vlgmr.msra.gmra.mrb[44].mxu0 %vm212_vm1, %v4072_v4 }
0x208c   :  { %6836 = vmatprep.mubr.msk.bf16.mxu0 %vm7475_vm2, %v7474_v63  ;;  %6833 = vmatpush3.bf16.msra.mxu0 %v7247_v46 }
0x208d   :  { %6834 = vmatprep.subr.bf16.mxu0 %v7474_v63 }
0x2090   :  { %6835 = vmatpush3.bf16.msra.mxu0 %v7248_v51 }
0x2091   :  { %6860 = vmatprep.subr.bf16.mxu0 %v7474_v63 }
0x215e   :  { %v4122_v23 = vpop.f32.mrb[44].mxu0 }
0x215f   :  { %v4129_v31 = vadd.f32 %v4122_v23, %v8148_v45  ;;  %v6830_v26 = vpop.f32.mrb[45].mxu0 }
0x2160   :  { %v4125_v9 = vpop.f32.mrb[46].mxu0 }
0x2161   :  { %v8375_v8 = vadd.f32 %v6120_v22, %v4129_v31  ;;  %v4130_v27 = vadd.f32 %v4125_v9, %v8154_v14  ;;  %v6831_v33 = vpop.f32.mrb[47].mxu0 }
0x2163   :  { %v8378_v11 = vadd.f32 %v6120_v22, %v4130_v27  ;;  %v4137_v15 = vsel %vm212_vm1, %v8375_v8, 0.0 }
0x2164   :  { %4138 = vadd.xlane.f32.xlu0 %v4137_v15 }
0x2165   :  { %v4140_v34 = vsel %vm212_vm1, %v8378_v11, 0.0 }
0x2166   :  { %4141 = vadd.xlane.f32.xlu1 %v4140_v34 }
0x21f1   :  { %v4139_v16 = vpop.xlane.xlu0 %4138 }
0x21f2   :  { %v4143_v35 = vmul.f32 0.03125, %v4139_v16 }
0x21f3   :  { %v4142_v45 = vpop.xlane.xlu1 %4141 }
0x21f4   :  { %v4145_v17 = vsub.f32 %v8375_v8, %v4143_v35  ;;  %v4144_v37 = vmul.f32 0.03125, %v4142_v45 }
0x21f6   :  { %v4146_v38 = vsub.f32 %v8378_v11, %v4144_v37  ;;  %v4147_v14 = vmul.f32 %v4145_v17, %v4145_v17 }
0x21f8   :  { %v4149_v39 = vsel %vm212_vm1, %v4147_v14, 0.0  ;;  %v4148_v47 = vmul.f32 %v4146_v38, %v4146_v38 }
0x21f9   :  { %4150 = vadd.xlane.f32.xlu0 %v4149_v39 }
0x21fa   :  { %v4152_v43 = vsel %vm212_vm1, %v4148_v47, 0.0 }
0x21fb   :  { %4153 = vadd.xlane.f32.xlu1 %v4152_v43 }
0x2286   :  { %v4151_v50 = vpop.xlane.xlu0 %4150 }
0x2287   :  { %v4155_v59 = vmul.f32 0.03125, %v4151_v50 }
0x2288   :  { %v4154_v62 = vpop.xlane.xlu1 %4153 }
0x2289   :  { %v4157_v57 = vadd.f32 1e-05, %v4155_v59  ;;  %v4156_v54 = vmul.f32 0.03125, %v4154_v62 }
0x228b   :  { %7409 = vrsqrt.f32 %v4157_v57  ;;  %v4158_v55 = vadd.f32 1e-05, %v4156_v54 }
0x228d   :  { %7411 = vrsqrt.f32 %v4158_v55 }
0x2295   :  { %v7410_v42 = vpop.eup %7409 }
0x2296   :  { %v4161_v60 = vmul.f32 %v7410_v42, %v4145_v17  ;;  %v6156_v17 = vld [vmem:[%s8714_s7 + $0x1a] ss:$0 sm:$0xff] }
0x2297   :  { %v7412_v19 = vpop.eup %7411 }
0x2298   :  { %v4167_v24 = vmul.f32 %v6121_v18, %v4161_v60  ;;  %v4162_v44 = vmul.f32 %v7412_v19, %v4146_v38  ;;  %v7257_v60 = vld [vmem:[%s8713_s4 + $0xc0] sm:$0xff]   ;;  %v7258_v19 = vld [vmem:[%s8713_s4 + $0xc8] sm:$0xff]  }
0x229a   :  { %v4168_v56 = vmul.f32 %v6121_v18, %v4162_v44  ;;  %v4173_v5 = vadd.f32 %v6122_v61, %v4167_v24 }
0x229c   :  { %v4174_v0 = vadd.f32 %v6122_v61, %v4168_v56 }
0x229e   :  { %v4180_v6 = vpack.c.bf16 %v4174_v0, %v4173_v5 }
0x22a0   :  { %6837 = vmatmul.mubr.msk.bf16.vlgmr.msra.gmra.mrb[48].mxu0 %vm212_vm1, %v4180_v6 }
0x22a1   :  { %6864 = vmatprep.mubr.msk.bf16.mxu0 %vm7475_vm2, %v7474_v63  ;;  %6861 = vmatpush3.bf16.msra.mxu0 %v7257_v60 }
0x22a2   :  { %6862 = vmatprep.subr.bf16.mxu0 %v7474_v63 }
0x22a5   :  { %6863 = vmatpush3.bf16.msra.mxu0 %v7258_v19 }
0x22a6   :  { %6868 = vmatprep.subr.bf16.mxu0 %v7474_v63 }
0x2373   :  { %v4238_v12 = vpop.f32.mrb[48].mxu0 }
0x2374   :  { %v4239_v13 = vadd.f32 %v6128_v40, %v4238_v12  ;;  %v6838_v20 = vpop.f32.mrb[49].mxu0 }
0x2375   :  { %v4241_v21 = vpop.f32.mrb[50].mxu0  ;;  %v7259_v20 = vld [vmem:[%s8713_s4 + $0xd0] sm:$0xff]  }
0x2376   :  { %v4247_v4 = vmul.f32 0.70710677, %v4239_v13  ;;  %v4242_v22 = vadd.f32 %v6128_v40, %v4241_v21  ;;  %v6839_v23 = vpop.f32.mrb[51].mxu0  ;;  %v4245_v33 = vmul.f32 0.5, %v4239_v13 }
0x2377   :  { %v7262_v23 = vld [vmem:[%s8713_s4 + $0xe8] sm:$0xff]  }
0x2378   :  { %7413 = verf.f32 %v4247_v4  ;;  %v4248_v31 = vmul.f32 0.70710677, %v4242_v22  ;;  %v4246_v15 = vmul.f32 0.5, %v4242_v22  ;;  %v7260_v4 = vld [vmem:[%s8713_s4 + $0xd8] sm:$0xff]   ;;  %v7261_v22 = vld [vmem:[%s8713_s4 + $0xe0] sm:$0xff]  }
0x237a   :  { %7415 = verf.f32 %v4248_v31  ;;  %v6163_v31 = vld [vmem:[%s8714_s7 + $0x1d] ss:$0 sm:$0xff] }
0x2382   :  { %v7414_v26 = vpop.eup %7413 }
0x2383   :  { %v4251_v9 = vadd.f32 1.0, %v7414_v26 }
0x2384   :  { %v7416_v27 = vpop.eup %7415 }
0x2385   :  { %v4252_v34 = vadd.f32 1.0, %v7416_v27  ;;  %v4253_v16 = vmul.f32 %v4251_v9, %v4245_v33 }
0x2387   :  { %v4254_v35 = vmul.f32 %v4252_v34, %v4246_v15 }
0x2389   :  { %v4272_v45 = vpack.c.bf16 %v4254_v35, %v4253_v16  ;;  %v6171_v35 = vld [vmem:[%s8714_s7 + $0x1e] ss:$0 sm:$0xff] }
0x238b   :  { %6857 = vmatmul.mubr.bf16.vlgmr.msra.gmra.mrb[56].mxu1 %v4272_v45 }
0x245e   :  { %v4355_v37 = vpop.f32.mrb[56].mxu1 }
0x245f   :  { %v4362_v38 = vadd.f32 %v4355_v37, %v8375_v8  ;;  %v6858_v14 = vpop.f32.mrb[57].mxu1 }
0x2460   :  { %v4358_v39 = vpop.f32.mrb[58].mxu1 }
0x2461   :  { %v8443_v47 = vadd.f32 %v6156_v17, %v4362_v38  ;;  %v4363_v43 = vadd.f32 %v4358_v39, %v8378_v11  ;;  %v6859_v46 = vpop.f32.mrb[59].mxu1 }
0x2462   :  { %v6179_v46 = vld [vmem:[%s8714_s7 + $0x1f] ss:$0 sm:$0xff] }
0x2463   :  { %v8446_v51 = vadd.f32 %v6156_v17, %v4363_v43  ;;  %v4379_v29 = vsel %vm212_vm1, %v8443_v47, 0.0 }
0x2464   :  { %4380 = vadd.xlane.f32.xlu0 %v4379_v29 }
0x2465   :  { %v4382_v48 = vsel %vm212_vm1, %v8446_v51, 0.0 }
0x2466   :  { %4383 = vadd.xlane.f32.xlu1 %v4382_v48 }
0x24f1   :  { %v4381_v50 = vpop.xlane.xlu0 %4380 }
0x24f2   :  { %v4385_v59 = vmul.f32 0.03125, %v4381_v50 }
0x24f3   :  { %v4384_v8 = vpop.xlane.xlu1 %4383 }
0x24f4   :  { %v4387_v62 = vsub.f32 %v8443_v47, %v4385_v59  ;;  %v4386_v57 = vmul.f32 0.03125, %v4384_v8 }
0x24f6   :  { %v4388_v54 = vsub.f32 %v8446_v51, %v4386_v57  ;;  %v4389_v11 = vmul.f32 %v4387_v62, %v4387_v62 }
0x24f8   :  { %v4391_v55 = vsel %vm212_vm1, %v4389_v11, 0.0  ;;  %v4390_v42 = vmul.f32 %v4388_v54, %v4388_v54 }
0x24f9   :  { %4392 = vadd.xlane.f32.xlu0 %v4391_v55 }
0x24fa   :  { %v4394_v18 = vsel %vm212_vm1, %v4390_v42, 0.0 }
0x24fb   :  { %4395 = vadd.xlane.f32.xlu1 %v4394_v18 }
0x2586   :  { %v4393_v24 = vpop.xlane.xlu0 %4392 }
0x2587   :  { %v4397_v44 = vmul.f32 0.03125, %v4393_v24 }
0x2588   :  { %v4396_v61 = vpop.xlane.xlu1 %4395 }
0x2589   :  { %v4399_v56 = vadd.f32 1e-05, %v4397_v44  ;;  %v4398_v5 = vmul.f32 0.03125, %v4396_v61 }
0x258b   :  { %7417 = vrsqrt.f32 %v4399_v56  ;;  %v4400_v0 = vadd.f32 1e-05, %v4398_v5 }
0x258d   :  { %7419 = vrsqrt.f32 %v4400_v0 }
0x2595   :  { %v7418_v6 = vpop.eup %7417 }
0x2596   :  { %v4403_v36 = vmul.f32 %v7418_v6, %v4387_v62 }
0x2597   :  { %v7420_v2 = vpop.eup %7419 }
0x2598   :  { %v4409_v3 = vmul.f32 %v6157_v1, %v4403_v36  ;;  %v4404_v7 = vmul.f32 %v7420_v2, %v4388_v54 }
0x259a   :  { %v4410_v40 = vmul.f32 %v6157_v1, %v4404_v7  ;;  %v4415_v12 = vadd.f32 %v6158_v10, %v4409_v3 }
0x259c   :  { %v4416_v13 = vadd.f32 %v6158_v10, %v4410_v40 }
0x259e   :  { %v4422_v21 = vpack.c.bf16 %v4416_v13, %v4415_v12 }
0x25a0   :  { %6865 = vmatmul.mubr.msk.bf16.vlgmr.msra.gmra.mrb[52].mxu0 %vm212_vm1, %v4422_v21 }
0x25a1   :  { %6869 = vmatpush3.bf16.msra.mxu0 %v7259_v20  ;;  %6872 = vmatprep.mubr.msk.bf16.mxu0 %vm7475_vm2, %v7474_v63 }
0x25a2   :  { %6870 = vmatprep.subr.bf16.mxu0 %v7474_v63 }
0x25a5   :  { %6871 = vmatpush3.bf16.msra.mxu0 %v7260_v4 }
0x25a6   :  { %6876 = vmatprep.subr.bf16.mxu0 %v7474_v63 }
0x25a8   :  { %6873 = vmatmul.mubr.msk.bf16.vlgmr.msra.gmra.mrb[56].mxu0 %vm212_vm1, %v4422_v21 }
0x25a9   :  { %6877 = vmatpush3.bf16.msra.mxu0 %v7261_v22  ;;  %6880 = vmatprep.mubr.msk.bf16.mxu0 %vm7475_vm2, %v7474_v63 }
0x25aa   :  { %6878 = vmatprep.subr.bf16.mxu0 %v7474_v63 }
0x25ad   :  { %6879 = vmatpush3.bf16.msra.mxu0 %v7262_v23 }
0x25b0   :  { %6881 = vmatmul.mubr.msk.bf16.vlgmr.msra.gmra.mrb[60].mxu0 %vm212_vm1, %v4422_v21 }
0x2673   :  { %v4476_v26 = vpop.f32.mrb[52].mxu0 }
0x2674   :  { %v4477_v9 = vadd.f32 %v6163_v31, %v4476_v26  ;;  %v6866_v27 = vpop.f32.mrb[53].mxu0 }
0x2675   :  { %v4479_v33 = vpop.f32.mrb[54].mxu0 }
0x2676   :  { %v6867_v15 = vpop.f32.mrb[55].mxu0  ;;  %v4607_v34 = vmul.f32 %v7660_v28, %v4477_v9  ;;  %v4720_v16 = vmul.f32 %v7696_v49, %v4477_v9  ;;  %v4480_v29 = vadd.f32 %v6163_v31, %v4479_v33  ;;  %v4989_v61 = vmul.f32 %v7699_v52, %v4477_v9 }
0x2677   :  { %v5179_v1 = vmul.f32 %v7702_v53, %v4477_v9 }
0x2678   :  { %6888 = vmatprep.mubr.msk.f32.mxu0 %vm212_vm1, %v4607_v34  ;;  %6895 = vmatprep.mubr.msk.f32.mxu1 %vm212_vm1, %v4720_v16  ;;  %v4608_v62 = vmul.f32 %v7660_v28, %v4480_v29  ;;  %v4721_v11 = vmul.f32 %v7696_v49, %v4480_v29  ;;  %v5180_v36 = vmul.f32 %v7702_v53, %v4480_v29 }
0x267b   :  { %v4538_v45 = vpop.f32.mrb[56].mxu0 }
0x267c   :  { %v6874_v17 = vpop.f32.mrb[57].mxu0  ;;  %v4539_v38 = vadd.f32 %v6171_v35, %v4538_v45 }
0x267d   :  { %v4541_v37 = vpop.f32.mrb[58].mxu0 }
0x267e   :  { %v4542_v14 = vadd.f32 %v6171_v35, %v4541_v37  ;;  %v6875_v39 = vpop.f32.mrb[59].mxu0 }
0x2680   :  { %v7114_v43 = vpack.c.bf16 %v4542_v14, %v4539_v38 }
0x2682   :  { %7116 = vmatprep.subr.msk.bf16.mxu0 %vm7672_vm4, %v7114_v43  ;;  %7122 = vmatprep.subr.msk.bf16.mxu1 %vm7672_vm4, %v7114_v43 }
0x2683   :  { %v4600_v48 = vpop.f32.mrb[60].mxu0  ;;  %7119 = vmatpush3.bf16.xpose.msk.msra.mxu0 %vm7672_vm4, %v7114_v43  ;;  %7125 = vmatpush3.bf16.xpose.msk.msra.mxu1 %vm7672_vm4, %v7114_v43 }
0x2684   :  { %v4601_v50 = vadd.f32 %v6179_v46, %v4600_v48  ;;  %v6882_v59 = vpop.f32.mrb[61].mxu0  ;;  %7136 = vmatprep.subr.msk.bf16.mxu1 %vm7672_vm4, %v7114_v43 }
0x2685   :  { %v4603_v8 = vpop.f32.mrb[62].mxu0 }
0x2686   :  { %v4604_v57 = vadd.f32 %v6179_v46, %v4603_v8  ;;  %v6883_v54 = vpop.f32.mrb[63].mxu0  ;;  %v4825_v55 = vmul.f32 %v7696_v49, %v4601_v50  ;;  %v4718_v42 = vmul.f32 %v7660_v28, %v4601_v50  ;;  %v5094_v18 = vmul.f32 %v7699_v52, %v4601_v50 }
0x2687   :  { %v5284_v56 = vmul.f32 %v7702_v53, %v4601_v50 }
0x2688   :  { %v4826_v60 = vmul.f32 %v7696_v49, %v4604_v57  ;;  %v4719_v19 = vmul.f32 %v7660_v28, %v4604_v57  ;;  %v5095_v24 = vmul.f32 %v7699_v52, %v4604_v57  ;;  %v5285_v44 = vmul.f32 %v7702_v53, %v4604_v57 }
0x2689   :  { %v4990_v49 = vmul.f32 %v7699_v52, %v4480_v29 }
0x268a   :  { %6889 = vmatmul.mubr.msk.f32.vlgmr.msra.gmra.mrb[64].mxu0 %vm212_vm1, %v4608_v62  ;;  %6896 = vmatmul.mubr.msk.f32.vlgmr.msra.gmra.mrb[60].mxu1 %vm212_vm1, %v4721_v11  ;;  %v7126_v5 = vpack.c.bf16 %v4826_v60, %v4825_v55  ;;  %v8528_v0 = vpack.c.bf16 %v4719_v19, %v4718_v42  ;;  %v8530_v6 = vpack.c.bf16 %v5095_v24, %v5094_v18 }
0x268b   :  { %7139 = vmatpush3.bf16.xpose.msk.msra.mxu1 %vm7672_vm4, %v7114_v43  ;;  %6916 = vmatprep.mubr.msk.f32.mxu1 %vm212_vm1, %v4989_v61  ;;  %v8535_v28 = vpack.c.bf16 %v5285_v44, %v5284_v56 }
0x268c   :  { %7127 = vmatprep.subr.bf16.mxu0 %v7126_v5  ;;  %7146 = vmatprep.subr.msk.bf16.mxu1 %vm7672_vm4, %v7114_v43 }
0x268d   :  { %7129 = vmatpush3.bf16.msra.mxu0 %v7126_v5 }
0x268e   :  { %7131 = vmatprep.subr.bf16.mxu0 %v8528_v0 }
0x2692   :  { %6917 = vmatmul.mubr.msk.f32.vlgmr.msra.gmra.mrb[62].mxu1 %vm212_vm1, %v4990_v49 }
0x2693   :  { %7149 = vmatpush3.bf16.xpose.msk.msra.mxu1 %vm7672_vm4, %v7114_v43  ;;  %6930 = vmatprep.mubr.msk.f32.mxu1 %vm212_vm1, %v5179_v1  ;;  %vm3044_vm4 = vcmask 1041408  }
0x2694   :  { %6948 = vmatprep.subr.bf16.mxu1 %v7474_v63 }
0x269a   :  { %6931 = vmatmul.mubr.msk.f32.vlgmr.msra.gmra.mrb[64].mxu1 %vm212_vm1, %v5180_v36 }
0x269b   :  { %6952 = vmatprep.mubr.msk.bf16.mxu1 %vm7475_vm2, %v7474_v63 }
0x275d   :  { %v6890_v2 = vpop.f32.mrb[64].mxu0  ;;  %v6897_v52 = vpop.f32.mrb[60].mxu1 }
0x275e   :  { %v4800_v3 = vadd.f32 %v6897_v52, %v8303_v25  ;;  %v4687_v7 = vpop.f32.mrb[65].mxu0  ;;  %v4794_v10 = vpop.f32.mrb[61].mxu1  ;;  %v4693_v40 = vadd.f32 %v6890_v2, %v8303_v25 }
0x275f   :  { %v4795_v41 = vadd.f32 %v4794_v10, %v8306_v32  ;;  %v4688_v13 = vadd.f32 %v4687_v7, %v8306_v32 }
0x2760   :  { %v4806_v12 = vsel %vm590_vm13, %v4800_v3, -inf  ;;  %v4699_v20 = vsel %vm590_vm13, %v4693_v40, -inf }
0x2761   :  { %4807 = vmax.xlane.f32.xlu1 %v4806_v12  ;;  %v4803_v53 = vsel %vm590_vm13, %v4795_v41, -inf  ;;  %v4696_v4 = vsel %vm590_vm13, %v4688_v13, -inf }
0x2762   :  { %4804 = vmax.xlane.f32.xlu0 %v4803_v53 }
0x2765   :  { %v6918_v21 = vpop.f32.mrb[62].mxu1  ;;  %4700 = vmax.xlane.f32.xlu1 %v4699_v20 }
0x2766   :  { %v5069_v22 = vadd.f32 %v6918_v21, %v8303_v25  ;;  %v5063_v23 = vpop.f32.mrb[63].mxu1  ;;  %4697 = vmax.xlane.f32.xlu0 %v4696_v4 }
0x2767   :  { %v5064_v31 = vadd.f32 %v5063_v23, %v8306_v32 }
0x2768   :  { %v5075_v26 = vsel %vm590_vm13, %v5069_v22, -inf }
0x2769   :  { %5076 = vmax.xlane.f32.xlu1 %v5075_v26  ;;  %v5072_v9 = vsel %vm590_vm13, %v5064_v31, -inf }
0x276a   :  { %5073 = vmax.xlane.f32.xlu0 %v5072_v9 }
0x276d   :  { %v6932_v27 = vpop.f32.mrb[64].mxu1 }
0x276e   :  { %v5259_v33 = vadd.f32 %v6932_v27, %v8303_v25  ;;  %v5253_v15 = vpop.f32.mrb[65].mxu1 }
0x276f   :  { %v5254_v34 = vadd.f32 %v5253_v15, %v8306_v32 }
0x2770   :  { %v5265_v16 = vsel %vm590_vm13, %v5259_v33, -inf }
0x2771   :  { %5266 = vmax.xlane.f32.xlu1 %v5265_v16  ;;  %v5262_v35 = vsel %vm590_vm13, %v5254_v34, -inf }
0x2772   :  { %5263 = vmax.xlane.f32.xlu0 %v5262_v35 }
0x27ee   :  { %v4808_v45 = vpop.xlane.xlu1 %4807 }
0x27ef   :  { %v4810_v17 = vsub.f32 %v4800_v3, %v4808_v45  ;;  %v4805_v37 = vpop.xlane.xlu0 %4804 }
0x27f0   :  { %v4809_v38 = vsub.f32 %v4795_v41, %v4805_v37 }
0x27f1   :  { %v4813_v14 = vmul.f32 1.442695, %v4810_v17 }
0x27f2   :  { %v4811_v39 = vmul.f32 1.442695, %v4809_v38  ;;  %v4701_v43 = vpop.xlane.xlu1 %4700 }
0x27f3   :  { %7421 = vpow2.f32 %v4813_v14  ;;  %v4703_v46 = vsub.f32 %v4693_v40, %v4701_v43  ;;  %v4698_v29 = vpop.xlane.xlu0 %4697 }
0x27f4   :  { %7423 = vpow2.f32 %v4811_v39  ;;  %v4702_v25 = vsub.f32 %v4688_v13, %v4698_v29 }
0x27f5   :  { %v4706_v48 = vmul.f32 1.442695, %v4703_v46 }
0x27f6   :  { %v4704_v32 = vmul.f32 1.442695, %v4702_v25  ;;  %v5077_v50 = vpop.xlane.xlu1 %5076 }
0x27f7   :  { %7425 = vpow2.f32 %v4706_v48  ;;  %v5079_v59 = vsub.f32 %v5069_v22, %v5077_v50  ;;  %v5074_v8 = vpop.xlane.xlu0 %5073  ;;  %v6214_v48 = vld [vmem:[%s8714_s7 + $0x20] ss:$0 sm:$0xff] }
0x27f8   :  { %7427 = vpow2.f32 %v4704_v32  ;;  %v5078_v62 = vsub.f32 %v5064_v31, %v5074_v8 }
0x27f9   :  { %v5082_v57 = vmul.f32 1.442695, %v5079_v59 }
0x27fa   :  { %v5080_v54 = vmul.f32 1.442695, %v5078_v62 }
0x27fb   :  { %7429 = vpow2.f32 %v5082_v57 }
0x27fc   :  { %7431 = vpow2.f32 %v5080_v54 }
0x27fd   :  { %v7422_v11 = vpop.eup %7421 }
0x27fe   :  { %v7424_v55 = vpop.eup %7423  ;;  %v5267_v42 = vpop.xlane.xlu1 %5266  ;;  %v4818_v18 = vsel %vm590_vm13, %v7422_v11, 0.0 }
0x27ff   :  { %v5269_v60 = vsub.f32 %v5259_v33, %v5267_v42  ;;  %4819 = vadd.xlane.f32.xlu1 %v4818_v18  ;;  %v5264_v19 = vpop.xlane.xlu0 %5263  ;;  %v4815_v24 = vsel %vm590_vm13, %v7424_v55, 0.0 }
0x2800   :  { %v5268_v44 = vsub.f32 %v5254_v34, %v5264_v19  ;;  %4816 = vadd.xlane.f32.xlu0 %v4815_v24 }
0x2801   :  { %v7426_v61 = vpop.eup %7425  ;;  %v5272_v56 = vmul.f32 1.442695, %v5269_v60 }
0x2802   :  { %v7428_v5 = vpop.eup %7427  ;;  %v5270_v49 = vmul.f32 1.442695, %v5268_v44  ;;  %v4711_v1 = vsel %vm590_vm13, %v7426_v61, 0.0 }
0x2803   :  { %7433 = vpow2.f32 %v5272_v56  ;;  %4712 = vadd.xlane.f32.xlu1 %v4711_v1  ;;  %v4708_v36 = vsel %vm590_vm13, %v7428_v5, 0.0  ;;  %v7266_v1 = vld [vmem:[%s8715_s5 + $0x38] sm:$0xff]  }
0x2804   :  { %7435 = vpow2.f32 %v5270_v49  ;;  %4709 = vadd.xlane.f32.xlu0 %v4708_v36  ;;  %v7265_v49 = vld [vmem:[%s8715_s5 + $0x30] sm:$0xff]   ;;  %v7267_v36 = vld [vmem:[%s8716_s6 + $0xc0] sm:$0xff]  }
0x2805   :  { %v7430_v2 = vpop.eup %7429  ;;  %6949 = vmatpush3.bf16.msra.mxu1 %v7265_v49 }
0x2806   :  { %v7432_v52 = vpop.eup %7431  ;;  %v5087_v3 = vsel %vm590_vm13, %v7430_v2, 0.0  ;;  %6950 = vmatprep.subr.bf16.mxu1 %v7474_v63 }
0x2807   :  { %5088 = vadd.xlane.f32.xlu1 %v5087_v3  ;;  %v5084_v7 = vsel %vm590_vm13, %v7432_v52, 0.0 }
0x2808   :  { %5085 = vadd.xlane.f32.xlu0 %v5084_v7 }
0x2809   :  { %6951 = vmatpush3.bf16.msra.mxu1 %v7266_v1 }
0x280a   :  { %7154 = vmatprep.subr.bf16.mxu1 %v7477_v30 }
0x280d   :  { %v7434_v10 = vpop.eup %7433 }
0x280e   :  { %v7436_v41 = vpop.eup %7435  ;;  %v5277_v40 = vsel %vm590_vm13, %v7434_v10, 0.0 }
0x280f   :  { %5278 = vadd.xlane.f32.xlu1 %v5277_v40  ;;  %v5274_v12 = vsel %vm590_vm13, %v7436_v41, 0.0 }
0x2810   :  { %5275 = vadd.xlane.f32.xlu0 %v5274_v12  ;;  %v6215_v12 = vld [vmem:[%s8714_s7 + $0x21] ss:$0 sm:$0xff] }
0x288c   :  { %v4820_v13 = vpop.xlane.xlu1 %4819 }
0x288d   :  { %7437 = vrcp.f32 %v4820_v13  ;;  %v4817_v53 = vpop.xlane.xlu0 %4816 }
0x288e   :  { %7439 = vrcp.f32 %v4817_v53 }
0x2890   :  { %v4713_v21 = vpop.xlane.xlu1 %4712 }
0x2891   :  { %v4710_v20 = vpop.xlane.xlu0 %4709 }
0x2892   :  { %7441 = vrcp.f32 %v4710_v20 }
0x2893   :  { %7443 = vrcp.f32 %v4713_v21 }
0x2894   :  { %v5089_v9 = vpop.xlane.xlu1 %5088 }
0x2895   :  { %v5086_v4 = vpop.xlane.xlu0 %5085 }
0x2896   :  { %7445 = vrcp.f32 %v5086_v4  ;;  %v6216_v4 = vld [vmem:[%s8714_s7 + $0x22] ss:$0 sm:$0xff] }
0x2897   :  { %v7438_v22 = vpop.eup %7437  ;;  %7447 = vrcp.f32 %v5089_v9  ;;  %v7269_v9 = vld [vmem:[%s8716_s6 + $0xd0] sm:$0xff]  }
0x2898   :  { %v7440_v23 = vpop.eup %7439  ;;  %v4824_v26 = vmul.f32 %v7438_v22, %v7422_v11 }
0x2899   :  { %v4823_v31 = vmul.f32 %v7440_v23, %v7424_v55 }
0x289b   :  { %6902 = vmatprep.mubr.msk.f32.mxu0 %vm590_vm13, %v4823_v31 }
0x289c   :  { %v7442_v27 = vpop.eup %7441  ;;  %6903 = vmatmul.mubr.msk.f32.vlgmr.msra.gmra.mrb[66].mxu0 %vm590_vm13, %v4824_v26  ;;  %v5279_v45 = vpop.xlane.xlu1 %5278 }
0x289d   :  { %7133 = vmatpush3.bf16.msra.mxu0 %v8528_v0  ;;  %v5276_v33 = vpop.xlane.xlu0 %5275  ;;  %v4716_v15 = vmul.f32 %v7442_v27, %v7428_v5  ;;  %v7444_v34 = vpop.eup %7443  ;;  %v7270_v27 = vld [vmem:[%s8716_s6 + $0xd8] sm:$0xff]  }
0x289e   :  { %7141 = vmatprep.subr.bf16.mxu0 %v8530_v6  ;;  %7449 = vrcp.f32 %v5276_v33  ;;  %v4717_v35 = vmul.f32 %v7444_v34, %v7426_v61  ;;  %v7271_v33 = vld [vmem:[%s8716_s6 + $0xe0] sm:$0xff]   ;;  %v7273_v34 = vld [vmem:[%s8716_s6 + $0xf0] sm:$0xff]  }
0x289f   :  { %6909 = vmatprep.mubr.msk.f32.mxu0 %vm590_vm13, %v4716_v15  ;;  %7451 = vrcp.f32 %v5279_v45  ;;  %v7272_v15 = vld [vmem:[%s8716_s6 + $0xe8] sm:$0xff]  }
0x28a0   :  { %v7446_v16 = vpop.eup %7445 }
0x28a1   :  { %v5092_v17 = vmul.f32 %v7446_v16, %v7432_v52  ;;  %v7448_v0 = vpop.eup %7447  ;;  %v7274_v16 = vld [vmem:[%s8716_s6 + $0xf8] sm:$0xff]  }
0x28a2   :  { %v5093_v38 = vmul.f32 %v7448_v0, %v7430_v2  ;;  %v7268_v2 = vld [vmem:[%s8716_s6 + $0xc8] sm:$0xff]  }
0x28a4   :  { %6910 = vmatmul.mubr.msk.f32.vlgmr.msra.gmra.mrb[66].mxu0 %vm590_vm13, %v4717_v35  ;;  %v6222_v35 = vld [vmem:[%s8717_s8 + $0x3] ss:$0 sm:$0xff] }
0x28a5   :  { %7143 = vmatpush3.bf16.msra.mxu0 %v8530_v6  ;;  %6923 = vmatprep.mubr.msk.f32.mxu0 %vm590_vm13, %v5092_v17  ;;  %v7263_v6 = vld [vmem:[%s8713_s4 + $0xf0] sm:$0xff]  }
0x28a6   :  { %7151 = vmatprep.subr.bf16.mxu0 %v8535_v28 }
0x28a8   :  { %v7450_v37 = vpop.eup %7449 }
0x28a9   :  { %v5282_v14 = vmul.f32 %v7450_v37, %v7436_v41  ;;  %v7452_v39 = vpop.eup %7451 }
0x28aa   :  { %v5283_v43 = vmul.f32 %v7452_v39, %v7434_v10 }
0x28ac   :  { %6924 = vmatmul.mubr.msk.f32.vlgmr.msra.gmra.mrb[66].mxu0 %vm590_vm13, %v5093_v38 }
0x28ad   :  { %7153 = vmatpush3.bf16.msra.mxu0 %v8535_v28  ;;  %6937 = vmatprep.mubr.msk.f32.mxu0 %vm590_vm13, %v5282_v14  ;;  %v7264_v28 = vld [vmem:[%s8713_s4 + $0xf8] sm:$0xff]  }
0x28ae   :  { %6940 = vmatprep.subr.bf16.mxu0 %v7474_v63 }
0x28b4   :  { %6938 = vmatmul.mubr.msk.f32.vlgmr.msra.gmra.mrb[66].mxu0 %vm590_vm13, %v5283_v43 }
0x28b5   :  { %6941 = vmatpush3.bf16.msra.mxu0 %v7263_v6  ;;  %6944 = vmatprep.mubr.msk.bf16.mxu0 %vm7475_vm2, %v7474_v63 }
0x28b6   :  { %6942 = vmatprep.subr.bf16.mxu0 %v7474_v63 }
0x28b9   :  { %6943 = vmatpush3.bf16.msra.mxu0 %v7264_v28 }
0x28ba   :  { %6956 = vmatprep.subr.bf16.mxu0 %v7474_v63 }
0x2987   :  { %v6939_v46 = vpop.f32.mrb[66].mxu0 }
0x2988   :  { %v5358_v29 = vpop.f32.mrb[67].mxu0 }
0x2989   :  { %v5374_v25 = vpack.c.bf16 %v6939_v46, %v5358_v29 }
0x298b   :  { %6945 = vmatmul.mubr.msk.bf16.vlgmr.msra.gmra.mrb[68].mxu0 %vm212_vm1, %v5374_v25 }
0x298c   :  { %6972 = vmatprep.mubr.msk.bf16.mxu0 %vm7475_vm2, %v7474_v63  ;;  %6957 = vmatpush3.bf16.msra.mxu0 %v7267_v36 }
0x298d   :  { %6958 = vmatprep.subr.bf16.mxu0 %v7474_v63 }
0x2990   :  { %6959 = vmatpush3.bf16.msra.mxu0 %v7268_v2 }
0x2991   :  { %6960 = vmatprep.subr.bf16.mxu0 %v7474_v63 }
0x2994   :  { %6961 = vmatpush3.bf16.msra.mxu0 %v7269_v9 }
0x2995   :  { %6962 = vmatprep.subr.bf16.mxu0 %v7474_v63 }
0x2998   :  { %6963 = vmatpush3.bf16.msra.mxu0 %v7270_v27 }
0x2999   :  { %6964 = vmatprep.subr.bf16.mxu0 %v7474_v63 }
0x299c   :  { %6965 = vmatpush3.bf16.msra.mxu0 %v7271_v33  ;;  %v5712_v33 = vld [vmem:[%s8719_s10] sm:$0x3] }
0x299d   :  { %6966 = vmatprep.subr.bf16.mxu0 %v7474_v63 }
0x29a0   :  { %6967 = vmatpush3.bf16.msra.mxu0 %v7272_v15  ;;  %v7275_v15 = vld [vmem:[%s8718_s9 + $0x10] sm:$0xff]  }
0x29a1   :  { %6968 = vmatprep.subr.bf16.mxu0 %v7474_v63 }
0x29a4   :  { %6969 = vmatpush3.bf16.msra.mxu0 %v7273_v34  ;;  %v7276_v34 = vld [vmem:[%s8718_s9 + $0x18] sm:$0xff]  }
0x29a5   :  { %6970 = vmatprep.subr.bf16.mxu0 %v7474_v63 }
0x29a8   :  { %6971 = vmatpush3.bf16.msra.mxu0 %v7274_v16 }
0x2a5e   :  { %v5424_v32 = vpop.f32.mrb[68].mxu0 }
0x2a5f   :  { %v5431_v50 = vadd.f32 %v5424_v32, %v8443_v47  ;;  %v6946_v59 = vpop.f32.mrb[69].mxu0 }
0x2a60   :  { %v5427_v8 = vpop.f32.mrb[70].mxu0 }
0x2a61   :  { %v8606_v62 = vadd.f32 %v6214_v48, %v5431_v50  ;;  %v5432_v57 = vadd.f32 %v5427_v8, %v8446_v51  ;;  %v6947_v54 = vpop.f32.mrb[71].mxu0  ;;  %v6250_v8 = vld [vmem:[%s8714_s7 + $0x23] ss:$0 sm:$0xff] }
0x2a63   :  { %v8609_v11 = vadd.f32 %v6214_v48, %v5432_v57  ;;  %v5439_v55 = vsel %vm212_vm1, %v8606_v62, 0.0 }
0x2a64   :  { %5440 = vadd.xlane.f32.xlu0 %v5439_v55 }
0x2a65   :  { %v5442_v42 = vsel %vm212_vm1, %v8609_v11, 0.0 }
0x2a66   :  { %5443 = vadd.xlane.f32.xlu1 %v5442_v42 }
0x2af1   :  { %v5441_v18 = vpop.xlane.xlu0 %5440 }
0x2af2   :  { %v5445_v60 = vmul.f32 0.03125, %v5441_v18 }
0x2af3   :  { %v5444_v47 = vpop.xlane.xlu1 %5443 }
0x2af4   :  { %v5447_v19 = vsub.f32 %v8606_v62, %v5445_v60  ;;  %v5446_v24 = vmul.f32 0.03125, %v5444_v47 }
0x2af6   :  { %v5448_v44 = vsub.f32 %v8609_v11, %v5446_v24  ;;  %v5449_v51 = vmul.f32 %v5447_v19, %v5447_v19 }
0x2af8   :  { %v5451_v61 = vsel %vm212_vm1, %v5449_v51, 0.0  ;;  %v5450_v56 = vmul.f32 %v5448_v44, %v5448_v44 }
0x2af9   :  { %5452 = vadd.xlane.f32.xlu0 %v5451_v61 }
0x2afa   :  { %v5454_v5 = vsel %vm212_vm1, %v5450_v56, 0.0 }
0x2afb   :  { %5455 = vadd.xlane.f32.xlu1 %v5454_v5 }
0x2b86   :  { %v5453_v52 = vpop.xlane.xlu0 %5452 }
0x2b87   :  { %v5457_v3 = vmul.f32 0.03125, %v5453_v52 }
0x2b88   :  { %v5456_v7 = vpop.xlane.xlu1 %5455 }
0x2b89   :  { %v5459_v10 = vadd.f32 1e-05, %v5457_v3  ;;  %v5458_v41 = vmul.f32 0.03125, %v5456_v7 }
0x2b8b   :  { %7453 = vrsqrt.f32 %v5459_v10  ;;  %v5460_v30 = vadd.f32 1e-05, %v5458_v41 }
0x2b8d   :  { %7455 = vrsqrt.f32 %v5460_v30 }
0x2b95   :  { %v7454_v40 = vpop.eup %7453 }
0x2b96   :  { %v5463_v13 = vmul.f32 %v7454_v40, %v5447_v19 }
0x2b97   :  { %v7456_v53 = vpop.eup %7455 }
0x2b98   :  { %v5469_v20 = vmul.f32 %v6215_v12, %v5463_v13  ;;  %v5464_v21 = vmul.f32 %v7456_v53, %v5448_v44  ;;  %v6251_v53 = vld [vmem:[%s8712_s3 + $0x4] ss:$0 sm:$0xff] }
0x2b9a   :  { %v5470_v22 = vmul.f32 %v6215_v12, %v5464_v21  ;;  %v5475_v23 = vadd.f32 %v6216_v4, %v5469_v20 }
0x2b9c   :  { %v5476_v31 = vadd.f32 %v6216_v4, %v5470_v22 }
0x2b9e   :  { %v5482_v26 = vpack.c.bf16 %v5476_v31, %v5475_v23  ;;  %v6252_v23 = vld [vmem:[%s8712_s3 + $0x5] ss:$0 sm:$0xff] }
0x2ba0   :  { %6953 = vmatmul.mubr.msk.bf16.vlgmr.msra.gmra.mrb[68].mxu1 %vm212_vm1, %v5482_v26 }
0x2ba1   :  { %6980 = vmatprep.mubr.msk.f32.mxu1 %vm7475_vm2, %v7474_v63 }
0x2c73   :  { %v5540_v45 = vpop.f32.mrb[68].mxu1 }
0x2c74   :  { %v5541_v17 = vadd.f32 %v6222_v35, %v5540_v45  ;;  %v6954_v0 = vpop.f32.mrb[69].mxu1 }
0x2c75   :  { %v5543_v37 = vpop.f32.mrb[70].mxu1 }
0x2c76   :  { %v5549_v38 = vmul.f32 0.70710677, %v5541_v17  ;;  %v5544_v14 = vadd.f32 %v6222_v35, %v5543_v37  ;;  %v6955_v39 = vpop.f32.mrb[71].mxu1  ;;  %v5547_v29 = vmul.f32 0.5, %v5541_v17 }
0x2c78   :  { %7457 = verf.f32 %v5549_v38  ;;  %v5550_v6 = vmul.f32 0.70710677, %v5544_v14  ;;  %v5548_v25 = vmul.f32 0.5, %v5544_v14 }
0x2c7a   :  { %7459 = verf.f32 %v5550_v6 }
0x2c82   :  { %v7458_v43 = vpop.eup %7457 }
0x2c83   :  { %v5553_v28 = vadd.f32 1.0, %v7458_v43 }
0x2c84   :  { %v7460_v46 = vpop.eup %7459 }
0x2c85   :  { %v5554_v48 = vadd.f32 1.0, %v7460_v46  ;;  %v5555_v32 = vmul.f32 %v5553_v28, %v5547_v29 }
0x2c87   :  { %v5556_v50 = vmul.f32 %v5554_v48, %v5548_v25 }
0x2c89   :  { %v5574_v59 = vpack.c.bf16 %v5556_v50, %v5555_v32 }
0x2c8b   :  { %6973 = vmatmul.mubr.bf16.vlgmr.msra.gmra.mrb[72].mxu0 %v5574_v59 }
0x2d5e   :  { %v5657_v57 = vpop.f32.mrb[72].mxu0 }
0x2d5f   :  { %v5664_v54 = vadd.f32 %v5657_v57, %v8606_v62  ;;  %v6974_v55 = vpop.f32.mrb[73].mxu0 }
0x2d60   :  { %v5660_v42 = vpop.f32.mrb[74].mxu0 }
0x2d61   :  { %v5670_v18 = vadd.f32 %v6250_v8, %v5664_v54  ;;  %v5665_v60 = vadd.f32 %v5660_v42, %v8609_v11  ;;  %v6975_v47 = vpop.f32.mrb[75].mxu0  ;;  %v3043_v11 = vmul.f32 %v8240_v58, %v8240_v58 }
0x2d63   :  { %v5671_v19 = vadd.f32 %v6250_v8, %v5665_v60  ;;  %v5674_v24 = vsel %vm212_vm1, %v5670_v18, 0.0  ;;  %v3045_v3 = vsel %vm3044_vm4, %v3043_v11, 0.0 }
0x2d64   :  { %5675 = vadd.xlane.f32.xlu0 %v5674_v24 }
0x2d65   :  { %v5677_v44 = vsel %vm212_vm1, %v5671_v19, 0.0 }
0x2d66   :  { %5678 = vadd.xlane.f32.xlu1 %v5677_v44 }
0x2df1   :  { %v5676_v51 = vpop.xlane.xlu0 %5675 }
0x2df2   :  { %v5680_v61 = vmul.f32 0.03125, %v5676_v51 }
0x2df3   :  { %v5679_v56 = vpop.xlane.xlu1 %5678 }
0x2df4   :  { %v5682_v5 = vsub.f32 %v5670_v18, %v5680_v61  ;;  %v5681_v49 = vmul.f32 0.03125, %v5679_v56 }
0x2df6   :  { %v5683_v1 = vsub.f32 %v5671_v19, %v5681_v49  ;;  %v5684_v62 = vmul.f32 %v5682_v5, %v5682_v5 }
0x2df8   :  { %v5686_v36 = vsel %vm212_vm1, %v5684_v62, 0.0  ;;  %v5685_v2 = vmul.f32 %v5683_v1, %v5683_v1 }
0x2df9   :  { %5687 = vadd.xlane.f32.xlu0 %v5686_v36 }
0x2dfa   :  { %v5689_v52 = vsel %vm212_vm1, %v5685_v2, 0.0 }
0x2dfb   :  { %5690 = vadd.xlane.f32.xlu1 %v5689_v52 }
0x2dff   :  { %3046 = vadd.xlane.f32.xlu1 %v3045_v3 }
0x2e86   :  { %v5688_v7 = vpop.xlane.xlu0 %5687 }
0x2e87   :  { %v5692_v10 = vmul.f32 0.03125, %v5688_v7 }
0x2e88   :  { %v5691_v41 = vpop.xlane.xlu1 %5690 }
0x2e89   :  { %v5694_v30 = vadd.f32 1e-05, %v5692_v10  ;;  %v5693_v40 = vmul.f32 0.03125, %v5691_v41 }
0x2e8b   :  { %7461 = vrsqrt.f32 %v5694_v30  ;;  %v5695_v12 = vadd.f32 1e-05, %v5693_v40 }
0x2e8c   :  { %v3047_v6 = vpop.xlane.xlu1 %3046 }
0x2e8d   :  { %7463 = vrsqrt.f32 %v5695_v12  ;;  %v3053_v29 = vand.u32 2147483648, %v3047_v6  ;;  %vm3052_vm6 = vcmp.eq.f32.partialorder %v3047_v6, 0.0 }
0x2e8e   :  { %7465 = vrsqrt.f32 %v3047_v6 }
0x2e95   :  { %v7462_v13 = vpop.eup %7461 }
0x2e96   :  { %v5698_v20 = vmul.f32 %v7462_v13, %v5682_v5 }
0x2e97   :  { %v7464_v21 = vpop.eup %7463 }
0x2e98   :  { %v5699_v4 = vmul.f32 %v7464_v21, %v5683_v1  ;;  %v5704_v22 = vmul.f32 %v6251_v53, %v5698_v20 }
0x2e9a   :  { %v5705_v31 = vmul.f32 %v6251_v53, %v5699_v4  ;;  %v5710_v26 = vadd.f32 %v6252_v23, %v5704_v22 }
0x2e9c   :  { %v5711_v9 = vadd.f32 %v6252_v23, %v5705_v31 }
0x2e9e   :  { %v7155_v27 = vpack.c.bf16 %v5711_v9, %v5710_v26 }
0x2ea0   :  { %7156 = vmatpush3.bf16.msra.mxu1 %v7155_v27 }
0x2ea1   :  { %6983 = vmatprep.subr.bf16.mxu1 %v7474_v63 }
0x2ea3   :  { %6981 = vmatmul.mubr.msk.f32.vlgmr.msra.gmra.mrb[66].mxu1 %vm590_vm13, %v5712_v33 }
0x2ea4   :  { %6984 = vmatpush3.bf16.msra.mxu1 %v7275_v15  ;;  %6987 = vmatprep.mubr.msk.bf16.mxu1 %vm7475_vm2, %v7474_v63  ;;  %vm3050_vm2 = vcmp.eq.f32.partialorder %v3047_v6, inf }
0x2ea5   :  { %6985 = vmatprep.subr.bf16.mxu1 %v7474_v63  ;;  %v7466_v63 = vpop.eup %7465 }
0x2ea6   :  { %v3049_v28 = vmul.f32 %v7466_v63, %v3047_v6 }
0x2ea8   :  { %6986 = vmatpush3.bf16.msra.mxu1 %v7276_v34  ;;  %v3051_v46 = vsel %vm3050_vm2, %v3047_v6, %v3049_v28 }
0x2ea9   :  { %v3054_v25 = vsel %vm3052_vm6, %v3053_v29, %v3051_v46 }
0x2eaa   :  { %v3055_v50 = vmax.f32 %v3054_v25, 1e-12 }
0x2f76   :  { %v5782_v16 = vpop.f32.mrb[66].mxu1 }
0x2f77   :  { %v5791_v35 = vpack.c.bf16 %v5782_v16, %v5782_v16  ;;  %v6982_v45 = vpop.f32.mrb[67].mxu1 }
0x2f79   :  { %6988 = vmatmul.mubr.msk.bf16.vlgmr.msra.gmra.mrb[72].mxu1 %vm212_vm1, %v5791_v35 }
0x304c   :  { %v5841_v17 = vpop.f32.mrb[72].mxu1 }
0x304d   :  { %v5847_v0 = vmul.f32 %v5841_v17, %v5841_v17  ;;  %v6989_v37 = vpop.f32.mrb[73].mxu1 }
0x304e   :  { %v5844_v38 = vpop.f32.mrb[74].mxu1 }
0x304f   :  { %v5848_v14 = vsel %vm3044_vm4, %v5847_v0, 0.0  ;;  %v6990_v39 = vpop.f32.mrb[75].mxu1 }
0x3050   :  { %5849 = vadd.xlane.f32.xlu0 %v5848_v14 }
0x30dd   :  { %v5850_v43 = vpop.xlane.xlu0 %5849 }
0x30de   :  { %7467 = vrsqrt.f32 %v5850_v43  ;;  %vm5853_vm1 = vcmp.eq.f32.partialorder %v5850_v43, inf  ;;  %v5856_v59 = vand.u32 2147483648, %v5850_v43  ;;  %vm5855_vm7 = vcmp.eq.f32.partialorder %v5850_v43, 0.0 }
0x30df   :  { %7469 = vrcp.f32 %v3055_v50 }
0x30e8   :  { %v7468_v48 = vpop.eup %7467 }
0x30e9   :  { %v5852_v32 = vmul.f32 %v7468_v48, %v5850_v43  ;;  %v7470_v55 = vpop.eup %7469 }
0x30ea   :  { %v3057_v60 = vmul.f32 %v7470_v55, %v8240_v58 }
0x30eb   :  { %v5854_v8 = vsel %vm5853_vm1, %v5850_v43, %v5852_v32 }
0x30ec   :  { %v5857_v57 = vsel %vm5855_vm7, %v5856_v59, %v5854_v8 }
0x30ed   :  { %v5858_v54 = vmax.f32 %v5857_v57, 1e-12 }
0x30ef   :  { %7471 = vrcp.f32 %v5858_v54 }
0x30f9   :  { %v7472_v42 = vpop.eup %7471 }
0x30fa   :  { %v5860_v18 = vmul.f32 %v7472_v42, %v5841_v17 }
0x30fc   :  { %v5862_v47 = vrot.slane %v5860_v18, 6 }
0x30fe   :  { %v5864_v19 = vsel %vm3044_vm4, %v3057_v60, %v5862_v47 }
0x30ff   :  { %v5866_v24 = vsel %vm5865_vm8, %v5864_v19, 0.0 }
0x3100   :  { %5867 = vst [vmem:[%s8720_s11] sm:$0xff] %v5866_v24 }

</bundles_post_ra>
